<compile_context>
chip_gen: v7x
topology: tpu7x:2x2x1
jax: 0.10.0
libtpu: 0.0.40
codegen_flags: <defaults>
</compile_context>

<pallas_src>
import jax
import jax.numpy as jnp
from jax.experimental import pallas as pl
from jax.experimental.pallas import tpu as pltpu

PI = 3.141592653589793

# Segment order inside the packed (7*H, B) sin-argument block:
#   0: w_odd * e          (shared by hipMax / hipMin / kneeMin)
#   1: w_odd * t_swing_R   2: w_odd * t_stance_R   3: w_knee * t_swing_R
#   4: w_odd * t_swing_L   5: w_odd * t_stance_L   6: w_knee * t_swing_L
# Rows of the packed coefficient matrix (9, 7*H) / of the matmul result:
#   0 hipMax, 1 hipMin(-), 2 kneeMin(-),
#   3 hipSwingR, 4 hipStanceR, 5 kneeSwingR,
#   6 hipSwingL, 7 hipStanceL, 8 kneeSwingL


def actor_kernel(state_ref, wodd_ref, wknee_ref, cmat_ref, out_ref):
    state = state_ref[...]                         # (3, Bt)  batch on lanes
    w_odd = wodd_ref[...]                          # (H, 1)   (2n-1)*pi/2
    w_knee = wknee_ref[...]                        # (H, 1)   n*pi
    cmat = cmat_ref[...]                           # (9, 7H)  packed coeffs

    phase = state[0:1, :]                          # (1, Bt)
    sT = state[1:2, :]
    cT = jnp.maximum(state[2:3, :], 0.5)           # clamp(0.5, None)

    cR = phase - jnp.floor(phase)                  # Decimal(phase)
    phase_l = phase + 0.5
    cL = phase_l - jnp.floor(phase_l)              # Decimal(phase + 0.5)
    e = 2.0 * (1.0 - sT) * (18.0 * cT + 1.0) / (20.0 * cT)

    # Shared reciprocals (exact); eps guard keeps the packed matmul NaN-free
    # even at the sT in {0,1} singular points of the original formulation.
    inv_swing = pl.reciprocal(jnp.maximum(1.0 - sT, 1e-12), approx=False)
    inv_stance = pl.reciprocal(jnp.maximum(sT, 1e-12), approx=False)

    t_sw_r = (cR - sT) * inv_swing
    t_st_r = (sT - cR) * inv_stance
    t_sw_l = (cL - sT) * inv_swing
    t_st_l = (sT - cL) * inv_stance

    # Pack all 7 Fourier arguments along the sublane axis -> one sin call,
    # every vreg fully lane-dense in the batch.
    arg = jnp.concatenate(
        [
            w_odd * e,
            w_odd * t_sw_r, w_odd * t_st_r, w_knee * t_sw_r,
            w_odd * t_sw_l, w_odd * t_st_l, w_knee * t_sw_l,
        ],
        axis=0,
    )                                              # (7H, Bt)
    s = jnp.sin(arg)
    s2 = s * s

    # All 9 coefficient-weighted reductions as a single MXU matmul.
    r = jnp.dot(
        cmat, s2,
        precision=jax.lax.Precision.HIGHEST,
        preferred_element_type=jnp.float32,
    )                                              # (9, Bt)

    hip_max = r[0:1, :]
    hip_min = r[1:2, :]
    knee_min = r[2:3, :]
    hip_span = hip_max - hip_min

    swing_r = cR >= sT
    swing_l = cL >= sT
    hip_r = jnp.where(swing_r, r[3:4, :], r[4:5, :])
    knee_r = jnp.where(swing_r, r[5:6, :], 0.0)
    hip_l = jnp.where(swing_l, r[6:7, :], r[7:8, :])
    knee_l = jnp.where(swing_l, r[8:9, :], 0.0)

    # Single lane-dense store (no per-column masked vst.msk).
    out_ref[...] = jnp.concatenate(
        [
            hip_span * hip_r + hip_min,
            knee_min * knee_r,
            hip_span * hip_l + hip_min,
            knee_min * knee_l,
        ],
        axis=0,
    )                                              # (4, Bt)


def fuse_actor_params(params):
    """Precompute every parameter-only quantity once, outside the kernel."""
    H = params["n"].shape[-1]
    n = params["n"].reshape(1, H).astype(jnp.float32)
    tnm1 = 2.0 * n - 1.0

    def norm_odd(coeff, sign=1.0):
        r = coeff.reshape(1, H).astype(jnp.float32) / tnm1
        return (sign * r / jnp.sum(r)).reshape(H)

    knee_r = params["swingKnee"].reshape(1, H).astype(jnp.float32) / n
    knee_norm = (knee_r / jnp.sum(knee_r)).reshape(H)

    c_max = norm_odd(params["maxHip"])
    c_min_hip = norm_odd(params["minHip"], -1.0)
    c_min_knee = norm_odd(params["minKnee"], -1.0)
    c_swing_hip = norm_odd(params["swingHip"])
    c_stance_hip = norm_odd(params["stanceHip"])

    cm = jnp.zeros((9, 7 * H), jnp.float32)
    cm = cm.at[0, 0 * H:1 * H].set(c_max)
    cm = cm.at[1, 0 * H:1 * H].set(c_min_hip)
    cm = cm.at[2, 0 * H:1 * H].set(c_min_knee)
    cm = cm.at[3, 1 * H:2 * H].set(c_swing_hip)
    cm = cm.at[4, 2 * H:3 * H].set(c_stance_hip)
    cm = cm.at[5, 3 * H:4 * H].set(knee_norm)
    cm = cm.at[6, 4 * H:5 * H].set(c_swing_hip)
    cm = cm.at[7, 5 * H:6 * H].set(c_stance_hip)
    cm = cm.at[8, 6 * H:7 * H].set(knee_norm)

    return {
        "w_odd": (tnm1 * (PI / 2.0)).reshape(H, 1),
        "w_knee": (n * PI).reshape(H, 1),
        "c_mat": cm,
    }


def actor_net_forward(state, fused, *, block_b=None, max_block=512):
    B = state.shape[0]
    H = fused["w_odd"].shape[0]

    # Block selection: multiple of 128 (lane-dense, unmasked stores), capped
    # for VMEM headroom (v7x 64 MiB), >= 2 grid steps when possible so the
    # "parallel" axis is sharded across v7x's two TensorCores.
    b128 = pl.cdiv(B, 128) * 128
    if block_b is not None and block_b > 0 and block_b % 128 == 0:
        blk = block_b
    elif b128 <= 128:
        blk = b128
    else:
        blk = min(max_block, pl.cdiv(b128, 2 * 128) * 128)
    B_pad = pl.cdiv(B, blk) * blk
    grid = (B_pad // blk,)

    # Batch onto the lane axis; pad with benign rows [phase=0, sT=0.5, cT=1].
    state_t = jnp.transpose(state).astype(jnp.float32)          # (3, B)
    if B_pad > B:
        pad = jnp.tile(jnp.array([[0.0], [0.5], [1.0]], jnp.float32),
                       (1, B_pad - B))
        state_t = jnp.concatenate([state_t, pad], axis=1)        # (3, B_pad)

    cost = pl.CostEstimate(
        flops=B_pad * (7 * H * 20 + 2 * 9 * 7 * H + 64),
        transcendentals=7 * H * B_pad,
        bytes_accessed=4 * (3 * B_pad + 4 * B_pad
                            + fused["c_mat"].size + 2 * H),
    )

    out_t = pl.pallas_call(
        actor_kernel,
        out_shape=jax.ShapeDtypeStruct((4, B_pad), jnp.float32),
        grid_spec=pltpu.PrefetchScalarGridSpec(
            num_scalar_prefetch=0,
            grid=grid,
            in_specs=[
                pl.BlockSpec((3, blk), lambda i: (0, i)),
                pl.BlockSpec((H, 1), lambda i: (0, 0)),
                pl.BlockSpec((H, 1), lambda i: (0, 0)),
                pl.BlockSpec((9, 7 * H), lambda i: (0, 0)),
            ],
            out_specs=pl.BlockSpec((4, blk), lambda i: (0, i)),
        ),
        compiler_params=pltpu.CompilerParams(
            dimension_semantics=("parallel",)),
        cost_estimate=cost,
    )(state_t, fused["w_odd"], fused["w_knee"], fused["c_mat"])

    return jnp.transpose(out_t[:, :B])                           # (B, 4)


def ref_forward(state, p):
    # Pure-JAX reference mirroring the PyTorch math (per-row semantics).
    n = p["n"]
    tnm1 = 2.0 * n - 1.0
    phase = state[:, 0:1]
    cR = phase - jnp.floor(phase)
    cL = (phase + 0.5) - jnp.floor(phase + 0.5)
    sT = state[:, 1:2]
    cT = jnp.maximum(state[:, 2:3], 0.5)
    e = 2.0 * (1.0 - sT) * (18.0 * cT + 1.0) / (20.0 * cT)

    def odd(coeff, t):
        return jnp.sum(coeff * jnp.sin(tnm1 * t * PI / 2.0) ** 2 / tnm1,
                       axis=-1, keepdims=True)

    hip_max = odd(p["maxHip"], e) / jnp.sum(p["maxHip"] / tnm1)
    hip_min = -odd(p["minHip"], e) / jnp.sum(p["minHip"] / tnm1)
    knee_min = -odd(p["minKnee"], e) / jnp.sum(p["minKnee"] / tnm1)

    cols = []
    for c in (cR, cL):
        t_sw = (c - sT) / (1.0 - sT)
        t_st = (sT - c) / sT
        m = (c >= sT).astype(jnp.float32)
        hip = (m * odd(p["swingHip"], t_sw) / jnp.sum(p["swingHip"] / tnm1)
               + (1.0 - m) * odd(p["stanceHip"], t_st)
               / jnp.sum(p["stanceHip"] / tnm1))
        knee = m * (jnp.sum(p["swingKnee"] * jnp.sin(n * t_sw * PI) ** 2 / n,
                            axis=-1, keepdims=True)
                    / jnp.sum(p["swingKnee"] / n))
        cols.append((hip_max - hip_min) * hip + hip_min)
        cols.append(knee_min * knee)
    return jnp.concatenate(cols, axis=1)


if __name__ == "__main__":
    B, H = 4, 32
    key = jax.random.PRNGKey(0)
    keys = jax.random.split(key, 9)

    params = {
        "n": (1.0 + jnp.arange(H, dtype=jnp.float32)).reshape(1, H),
        "swingHip": jax.random.normal(keys[0], (1, H), jnp.float32),
        "stanceHip": jax.random.normal(keys[1], (1, H), jnp.float32),
        "swingKnee": jax.random.normal(keys[2], (1, H), jnp.float32),
        "maxHip": jax.random.normal(keys[3], (1, H), jnp.float32),
        "minHip": jax.random.normal(keys[4], (1, H), jnp.float32),
        "minKnee": jax.random.normal(keys[5], (1, H), jnp.float32),
    }

    phase = jax.random.uniform(keys[6], (B, 1), jnp.float32, 0.0, 2.0)
    sT = jax.random.uniform(keys[7], (B, 1), jnp.float32, 0.3, 0.7)
    cT = jax.random.uniform(keys[8], (B, 1), jnp.float32, 0.3, 1.5)
    state = jnp.concatenate([phase, sT, cT], axis=1)             # (B, 3)

    fused = fuse_actor_params(params)                            # once
    out = actor_net_forward(state, fused)
    out = jax.block_until_ready(out)

    expected = ref_forward(state, params)
    assert out.shape == (B, 4)
    assert bool(jnp.all(jnp.isfinite(out)))
    # fp32 reassociation (pre-scaled pi, norm-folded coefficients, MXU-order
    # reduction) vs the torch-order reference -> tight but not bitwise.
    assert bool(jnp.allclose(out, expected, atol=2e-4, rtol=2e-4))
    print("KERNEL_OK")
</pallas_src>

<mosaic_0001>
module attributes {stable_mosaic.version = 11 : i64} {
  func.func @actor_kernel(%arg0: i32, %arg1: memref<3x128xf32, #tpu.memory_space<vmem>>, %arg2: memref<32x1xf32, #tpu.memory_space<vmem>>, %arg3: memref<32x1xf32, #tpu.memory_space<vmem>>, %arg4: memref<9x224xf32, #tpu.memory_space<vmem>>, %arg5: memref<4x128xf32, #tpu.memory_space<vmem>>) attributes {dimension_semantics = [#tpu.dimension_semantics<parallel>], iteration_bounds = array<i64: 1>, scalar_prefetch = 0 : i64, scratch_operands = 0 : i64, tpu.core_type = #tpu.core_type<tc>, window_params = [{transform_indices = @transform_0, window_bounds = array<i64: 3, 128>}, {pipeline_mode = #tpu.pipeline_mode<synchronous>, transform_indices = @transform_1, window_bounds = array<i64: 32, 1>}, {pipeline_mode = #tpu.pipeline_mode<synchronous>, transform_indices = @transform_2, window_bounds = array<i64: 32, 1>}, {pipeline_mode = #tpu.pipeline_mode<synchronous>, transform_indices = @transform_3, window_bounds = array<i64: 9, 224>}, {transform_indices = @transform_4, window_bounds = array<i64: 4, 128>}]} {
    %c0 = arith.constant 0 : index
    %c0_0 = arith.constant 0 : index
    %0 = vector.load %arg1[%c0, %c0_0] : memref<3x128xf32, #tpu.memory_space<vmem>>, vector<3x128xf32>
    %c0_1 = arith.constant 0 : index
    %c0_2 = arith.constant 0 : index
    %1 = vector.load %arg2[%c0_1, %c0_2] : memref<32x1xf32, #tpu.memory_space<vmem>>, vector<32x1xf32>
    %c0_3 = arith.constant 0 : index
    %c0_4 = arith.constant 0 : index
    %2 = vector.load %arg3[%c0_3, %c0_4] : memref<32x1xf32, #tpu.memory_space<vmem>>, vector<32x1xf32>
    %c0_5 = arith.constant 0 : index
    %c0_6 = arith.constant 0 : index
    %3 = vector.load %arg4[%c0_5, %c0_6] : memref<9x224xf32, #tpu.memory_space<vmem>>, vector<9x224xf32>
    %4 = vector.extract_strided_slice %0 {offsets = [0, 0], sizes = [1, 128], strides = [1, 1]} : vector<3x128xf32> to vector<1x128xf32>
    %5 = vector.extract_strided_slice %0 {offsets = [1, 0], sizes = [1, 128], strides = [1, 1]} : vector<3x128xf32> to vector<1x128xf32>
    %6 = vector.extract_strided_slice %0 {offsets = [2, 0], sizes = [1, 128], strides = [1, 1]} : vector<3x128xf32> to vector<1x128xf32>
    %cst = arith.constant 5.000000e-01 : f32
    %7 = vector.broadcast %cst : f32 to vector<1x128xf32>
    %8 = arith.maximumf %6, %7 : vector<1x128xf32>
    %9 = math.floor %4 : vector<1x128xf32>
    %10 = arith.subf %4, %9 : vector<1x128xf32>
    %cst_7 = arith.constant 5.000000e-01 : f32
    %11 = vector.broadcast %cst_7 : f32 to vector<1x128xf32>
    %12 = arith.addf %4, %11 : vector<1x128xf32>
    %13 = math.floor %12 : vector<1x128xf32>
    %14 = arith.subf %12, %13 : vector<1x128xf32>
    %cst_8 = arith.constant 1.000000e+00 : f32
    %15 = vector.broadcast %cst_8 : f32 to vector<1x128xf32>
    %16 = arith.subf %15, %5 : vector<1x128xf32>
    %cst_9 = arith.constant 2.000000e+00 : f32
    %17 = vector.broadcast %cst_9 : f32 to vector<1x128xf32>
    %18 = arith.mulf %17, %16 : vector<1x128xf32>
    %cst_10 = arith.constant 1.800000e+01 : f32
    %19 = vector.broadcast %cst_10 : f32 to vector<1x128xf32>
    %20 = arith.mulf %19, %8 : vector<1x128xf32>
    %cst_11 = arith.constant 1.000000e+00 : f32
    %21 = vector.broadcast %cst_11 : f32 to vector<1x128xf32>
    %22 = arith.addf %20, %21 : vector<1x128xf32>
    %23 = arith.mulf %18, %22 : vector<1x128xf32>
    %cst_12 = arith.constant 2.000000e+01 : f32
    %24 = vector.broadcast %cst_12 : f32 to vector<1x128xf32>
    %25 = arith.mulf %24, %8 : vector<1x128xf32>
    %26 = arith.divf %23, %25 : vector<1x128xf32>
    %cst_13 = arith.constant 1.000000e+00 : f32
    %27 = vector.broadcast %cst_13 : f32 to vector<1x128xf32>
    %28 = arith.subf %27, %5 : vector<1x128xf32>
    %cst_14 = arith.constant 9.99999996E-13 : f32
    %29 = vector.broadcast %cst_14 : f32 to vector<1x128xf32>
    %30 = arith.maximumf %28, %29 : vector<1x128xf32>
    %31 = tpu.reciprocal %30 : vector<1x128xf32> -> vector<1x128xf32>
    %cst_15 = arith.constant 9.99999996E-13 : f32
    %32 = vector.broadcast %cst_15 : f32 to vector<1x128xf32>
    %33 = arith.maximumf %5, %32 : vector<1x128xf32>
    %34 = tpu.reciprocal %33 : vector<1x128xf32> -> vector<1x128xf32>
    %35 = arith.subf %10, %5 : vector<1x128xf32>
    %36 = arith.mulf %35, %31 : vector<1x128xf32>
    %37 = arith.subf %5, %10 : vector<1x128xf32>
    %38 = arith.mulf %37, %34 : vector<1x128xf32>
    %39 = arith.subf %14, %5 : vector<1x128xf32>
    %40 = arith.mulf %39, %31 : vector<1x128xf32>
    %41 = arith.subf %5, %14 : vector<1x128xf32>
    %42 = arith.mulf %41, %34 : vector<1x128xf32>
    %43 = vector.broadcast %1 : vector<32x1xf32> to vector<32x128xf32>
    %44 = vector.broadcast %26 : vector<1x128xf32> to vector<32x128xf32>
    %45 = arith.mulf %43, %44 : vector<32x128xf32>
    %46 = vector.broadcast %1 : vector<32x1xf32> to vector<32x128xf32>
    %47 = vector.broadcast %36 : vector<1x128xf32> to vector<32x128xf32>
    %48 = arith.mulf %46, %47 : vector<32x128xf32>
    %49 = vector.broadcast %1 : vector<32x1xf32> to vector<32x128xf32>
    %50 = vector.broadcast %38 : vector<1x128xf32> to vector<32x128xf32>
    %51 = arith.mulf %49, %50 : vector<32x128xf32>
    %52 = vector.broadcast %2 : vector<32x1xf32> to vector<32x128xf32>
    %53 = vector.broadcast %36 : vector<1x128xf32> to vector<32x128xf32>
    %54 = arith.mulf %52, %53 : vector<32x128xf32>
    %55 = vector.broadcast %1 : vector<32x1xf32> to vector<32x128xf32>
    %56 = vector.broadcast %40 : vector<1x128xf32> to vector<32x128xf32>
    %57 = arith.mulf %55, %56 : vector<32x128xf32>
    %58 = vector.broadcast %1 : vector<32x1xf32> to vector<32x128xf32>
    %59 = vector.broadcast %42 : vector<1x128xf32> to vector<32x128xf32>
    %60 = arith.mulf %58, %59 : vector<32x128xf32>
    %61 = vector.broadcast %2 : vector<32x1xf32> to vector<32x128xf32>
    %62 = vector.broadcast %40 : vector<1x128xf32> to vector<32x128xf32>
    %63 = arith.mulf %61, %62 : vector<32x128xf32>
    %64 = tpu.concatenate %45, %48, %51, %54, %57, %60, %63 in 0 : vector<32x128xf32>, vector<32x128xf32>, vector<32x128xf32>, vector<32x128xf32>, vector<32x128xf32>, vector<32x128xf32>, vector<32x128xf32> -> vector<224x128xf32>
    %65 = math.sin %64 : vector<224x128xf32>
    %66 = arith.mulf %65, %65 : vector<224x128xf32>
    %cst_16 = arith.constant dense<0.000000e+00> : vector<9x128xf32>
    %67 = tpu.matmul %3, %66, %cst_16 {dimension_numbers = #tpu.dot_dimension_numbers<[1], [0], [0], [1], [0, 0, 1, 1], [], []>, precision = #tpu.contract_precision<fp32>} : vector<9x224xf32>, vector<224x128xf32>, vector<9x128xf32> -> vector<9x128xf32>
    %68 = vector.extract_strided_slice %67 {offsets = [0, 0], sizes = [1, 128], strides = [1, 1]} : vector<9x128xf32> to vector<1x128xf32>
    %69 = vector.extract_strided_slice %67 {offsets = [1, 0], sizes = [1, 128], strides = [1, 1]} : vector<9x128xf32> to vector<1x128xf32>
    %70 = vector.extract_strided_slice %67 {offsets = [2, 0], sizes = [1, 128], strides = [1, 1]} : vector<9x128xf32> to vector<1x128xf32>
    %71 = arith.subf %68, %69 : vector<1x128xf32>
    %72 = arith.cmpf oge, %10, %5 : vector<1x128xf32>
    %73 = arith.cmpf oge, %14, %5 : vector<1x128xf32>
    %74 = vector.extract_strided_slice %67 {offsets = [3, 0], sizes = [1, 128], strides = [1, 1]} : vector<9x128xf32> to vector<1x128xf32>
    %75 = vector.extract_strided_slice %67 {offsets = [4, 0], sizes = [1, 128], strides = [1, 1]} : vector<9x128xf32> to vector<1x128xf32>
    %76 = arith.select %72, %74, %75 : vector<1x128xi1>, vector<1x128xf32>
    %77 = vector.extract_strided_slice %67 {offsets = [5, 0], sizes = [1, 128], strides = [1, 1]} : vector<9x128xf32> to vector<1x128xf32>
    %cst_17 = arith.constant 0.000000e+00 : f32
    %78 = vector.broadcast %cst_17 : f32 to vector<1x128xf32>
    %79 = arith.select %72, %77, %78 : vector<1x128xi1>, vector<1x128xf32>
    %80 = vector.extract_strided_slice %67 {offsets = [6, 0], sizes = [1, 128], strides = [1, 1]} : vector<9x128xf32> to vector<1x128xf32>
    %81 = vector.extract_strided_slice %67 {offsets = [7, 0], sizes = [1, 128], strides = [1, 1]} : vector<9x128xf32> to vector<1x128xf32>
    %82 = arith.select %73, %80, %81 : vector<1x128xi1>, vector<1x128xf32>
    %83 = vector.extract_strided_slice %67 {offsets = [8, 0], sizes = [1, 128], strides = [1, 1]} : vector<9x128xf32> to vector<1x128xf32>
    %cst_18 = arith.constant 0.000000e+00 : f32
    %84 = vector.broadcast %cst_18 : f32 to vector<1x128xf32>
    %85 = arith.select %73, %83, %84 : vector<1x128xi1>, vector<1x128xf32>
    %86 = arith.mulf %71, %76 : vector<1x128xf32>
    %87 = arith.addf %86, %69 : vector<1x128xf32>
    %88 = arith.mulf %70, %79 : vector<1x128xf32>
    %89 = arith.mulf %71, %82 : vector<1x128xf32>
    %90 = arith.addf %89, %69 : vector<1x128xf32>
    %91 = arith.mulf %70, %85 : vector<1x128xf32>
    %92 = tpu.concatenate %87, %88, %90, %91 in 0 : vector<1x128xf32>, vector<1x128xf32>, vector<1x128xf32>, vector<1x128xf32> -> vector<4x128xf32>
    %c0_19 = arith.constant 0 : index
    %c0_20 = arith.constant 0 : index
    %93 = vector.load %arg5[%c0_19, %c0_20] : memref<4x128xf32, #tpu.memory_space<vmem>>, vector<4x128xf32>
    tpu.vector_store %arg5[%c0_19, %c0_20], %92 {strides = array<i32>} : memref<4x128xf32, #tpu.memory_space<vmem>>, vector<4x128xf32>,
    return
  }
  func.func @transform_0(%arg0: i32) -> (i32, i32) {
    %c0_i32 = arith.constant 0 : i32
    %c0_i32_0 = arith.constant 0 : i32
    return %c0_i32, %arg0 : i32, i32
  }
  func.func @transform_1(%arg0: i32) -> (i32, i32) {
    %c0_i32 = arith.constant 0 : i32
    %c0_i32_0 = arith.constant 0 : i32
    %c0_i32_1 = arith.constant 0 : i32
    return %c0_i32, %c0_i32_0 : i32, i32
  }
  func.func @transform_2(%arg0: i32) -> (i32, i32) {
    %c0_i32 = arith.constant 0 : i32
    %c0_i32_0 = arith.constant 0 : i32
    %c0_i32_1 = arith.constant 0 : i32
    return %c0_i32, %c0_i32_0 : i32, i32
  }
  func.func @transform_3(%arg0: i32) -> (i32, i32) {
    %c0_i32 = arith.constant 0 : i32
    %c0_i32_0 = arith.constant 0 : i32
    %c0_i32_1 = arith.constant 0 : i32
    return %c0_i32, %c0_i32_0 : i32, i32
  }
  func.func @transform_4(%arg0: i32) -> (i32, i32) {
    %c0_i32 = arith.constant 0 : i32
    %c0_i32_0 = arith.constant 0 : i32
    return %c0_i32, %arg0 : i32, i32
  }
}

</mosaic_0001>

<bundles_post_ra>
// kernel: tpu_custom_call.1
= control target key start
LH: loop header
LB: loop body
LE: loop exit
PB: predicated region body
PF: predicated region fallthrough
CT: control target
= control target key end

     0   :  { %v4685_v2 = vmov 0   ;;  %s8926_s0 = inlined_call_operand.vmem [shape: f32[3,128], index: 0, kind: input, shape index: {}]   ;;  %s8927_s1 = inlined_call_operand.vmem [shape: f32[32,1], index: 1, kind: input, shape index: {}]   ;;  %s8928_s2 = inlined_call_operand.vmem [shape: f32[32,1], index: 2, kind: input, shape index: {}]   ;;  %s8929_s3 = inlined_call_operand.vmem [shape: f32[9,224], index: 3, kind: input, shape index: {}]   ;;  %s8930_s4 = inlined_call_operand.hbm [shape: f32[4,128], index: 4, kind: output, shape index: {}]  }
   0x1   :  { %v21_v0 = vld [vmem:[%s8927_s1 + $0x10] sm:$0xff]  ;;  %v19_v1 = vld [vmem:[%s8927_s1] sm:$0xff]  ;;  %4542 = vset.pattern.permute.xlu1 %v4685_v2  ;;  %4541 = vset.pattern.permute.xlu0 %v4685_v2  ;;  %v22_v3 = vld [vmem:[%s8927_s1 + $0x18] sm:$0xff] }
   0x2   :  { %87 = vperm.xlu1 %4542, %v21_v0   ;;  %77 = vperm.xlu0 %4541, %v19_v1   ;;  %v20_v4 = vld [vmem:[%s8927_s1 + $0x8] sm:$0xff]  ;;  %v18_v5 = vld [vmem:[%s8926_s0] sm:$0x7] }
   0x3   :  { %9 = vsyncpa [#allocation3], 0  ;;  %v32_v6 = vfloor.f32 %v18_v5  ;;  %v34_v7 = vadd.f32 0.5, %v18_v5  ;;  %v37_v8 = vsub.f32 1.0, %v18_v5  ;;  %v53_v9 = vmax.f32 %v18_v5, 1e-12 }
   0x4   :  { %v24_v11 = vld [vmem:[%s8928_s2 + $0x8] sm:$0xff]  ;;  %v23_v12 = vld [vmem:[%s8928_s2] sm:$0xff]  ;;  %v95_v15 = vlaneseq  ;;  %v26_v18 = vld [vmem:[%s8928_s2 + $0x18] sm:$0xff]  ;;  %v4752_v22 = vrot.slane %v18_v5, 1  ;;  %v31_v40 = vmax.f32 %v18_v5, 0.5 }
   0x5   :  { %v4734_v10 = vsub.f32 %v18_v5, %v32_v6  ;;  %v35_v13 = vfloor.f32 %v34_v7  ;;  %v51_v14 = vmax.f32 %v37_v8, 1e-12  ;;  %4543 = vrcp.f32 %v53_v9  ;;  %v25_v19 = vld [vmem:[%s8928_s2 + $0x10] sm:$0xff] }
   0x6   :  { %92 = vperm.xlu1 %4542, %v22_v3   ;;  %82 = vperm.xlu0 %4541, %v20_v4   ;;  %v96_v21 = vshrl.u32 %v95_v15, 7  ;;  %9229 = vst [vmem:[#allocation7_spill] sm:$0xff] %v4752_v22  ;;  %v45_v41 = vmul.f32 20.0, %v31_v40  ;;  %v39_v43 = vmul.f32 18.0, %v31_v40  ;;  %v38_v45 = vmul.f32 2.0, %v37_v8 }
   0x7   :  { %9227 = vst [vmem:[#allocation5_spill] sm:$0xff] %v4734_v10  ;;  %v4742_v16 = vsub.f32 %v34_v7, %v35_v13  ;;  %4545 = vrcp.f32 %v51_v14  ;;  %v64_v17 = vrot.slane %v4734_v10, 7  ;;  %v58_v27 = vsub.f32 %v4734_v10, %v4752_v22 }
   0x8   :  { %v97_v25 = vsub.s32 1, %v96_v21  ;;  %v105_v32 = vsub.s32 0, %v96_v21  ;;  %v47_v42 = vrot.slane %v45_v41, 1  ;;  %v40_v44 = vadd.f32 1.0, %v39_v43 }
   0x9   :  { %9228 = vst [vmem:[#allocation6_spill] sm:$0xff] %v4742_v16  ;;  %v71_v20 = vrot.slane %v4742_v16, 7  ;;  %v66_v23 = vsub.f32 %v18_v5, %v64_v17  ;;  %v68_v29 = vsub.f32 %v4742_v16, %v4752_v22  ;;  %v9273_v10 = vmov 2102212464  }
   0xa   :  { %126 = vperm.xlu1 %4542, %v24_v11   ;;  %121 = vperm.xlu0 %4541, %v23_v12   ;;  %4547 = vrcp.f32 %v47_v42  ;;  %v42_v46 = vrot.slane %v40_v44, 1 }
   0xb   :  { %v73_v24 = vsub.f32 %v18_v5, %v71_v20 }
   0xc   :  { %v44_v47 = vmul.f32 %v42_v46, %v38_v45 }
   0xe   :  { %136 = vperm.xlu1 %4542, %v26_v18   ;;  %131 = vperm.xlu0 %4541, %v25_v19  }
   0xf   :  { %v4544_v26 = vpop.eup %4543 }
  0x10   :  { %v67_v28 = vmul.f32 %v4544_v26, %v66_v23  ;;  %v74_v30 = vmul.f32 %v4544_v26, %v73_v24 }
  0x11   :  { %v4546_v31 = vpop.eup %4545 }
  0x12   :  { %v60_v33 = vrot.slane %v4546_v31, 1  ;;  %v4758_v34 = vrot.slane %v67_v28, %v97_v25  ;;  %v4760_v35 = vrot.slane %v74_v30, %v97_v25 }
  0x14   :  { %v62_v36 = vmul.f32 %v60_v33, %v58_v27  ;;  %v69_v37 = vmul.f32 %v68_v29, %v60_v33  ;;  %v4548_v48 = vpop.eup %4547 }
  0x15   :  { %v50_v49 = vmul.f32 %v4548_v48, %v44_v47 }
  0x16   :  { %v4762_v38 = vrot.slane %v62_v36, %v105_v32  ;;  %v4764_v39 = vrot.slane %v69_v37, %v105_v32 }
  0x17   :  { %v4769_v53 = vrot.slane %v50_v49, %v97_v25  ;;  %v8935_v49 = vmov 2102212464  }
  0x81   :  { %v88_v50 = vpop.permute.xlu1 %87  ;;  %v78_v51 = vpop.permute.xlu0 %77 }
  0x82   :  { %v4767_v52 = vmul.f32 %v4758_v34, %v88_v50  ;;  %v4772_v54 = vmul.f32 %v4760_v35, %v88_v50  ;;  %v4775_v55 = vmul.f32 %v4758_v34, %v78_v51  ;;  %v4778_v56 = vmul.f32 %v4760_v35, %v78_v51 }
  0x83   :  { %v4781_v57 = vmul.f32 %v4769_v53, %v88_v50  ;;  %v4784_v58 = vmul.f32 %v4762_v38, %v88_v50  ;;  %v4789_v61 = vmul.f32 %v4764_v39, %v88_v50  ;;  %v4794_v7 = vmul.f32 %v4769_v53, %v78_v51 }
  0x84   :  { %9230 = vst [vmem:[#allocation8_spill] sm:$0xff] %v4767_v52  ;;  %9231 = vst [vmem:[#allocation9_spill] sm:$0xff] %v4772_v54  ;;  %v1206_v62 = vand.u32 2139095040, %v4767_v52  ;;  %v2454_v13 = vand.u32 2139095040, %v4772_v54  ;;  %v4798_v14 = vmul.f32 %v4762_v38, %v78_v51  ;;  %v998_v24 = vand.u32 2139095040, %v4775_v55 }
  0x85   :  { %9232 = vst [vmem:[#allocation10_spill] sm:$0xff] %v4775_v55  ;;  %9233 = vst [vmem:[#allocation11_spill] sm:$0xff] %v4778_v56  ;;  %v374_v59 = vand.u32 2139095040, %v4781_v57  ;;  %v790_v60 = vand.u32 2139095040, %v4784_v58  ;;  %v2038_v2 = vand.u32 2139095040, %v4789_v61  ;;  %v166_v15 = vand.u32 2139095040, %v4794_v7  ;;  %v4818_v44 = vpop.permute.xlu1 %92 }
  0x86   :  { %9234 = vst [vmem:[#allocation12_spill] sm:$0xff] %v4781_v57  ;;  %9235 = vst [vmem:[#allocation13_spill] sm:$0xff] %v4784_v58  ;;  %v1207_v1 = vshrl.u32 %v1206_v62, 23  ;;  %v2455_v19 = vshrl.u32 %v2454_v13, 23  ;;  %v582_v21 = vand.u32 2139095040, %v4798_v14  ;;  %v999_v32 = vshrl.u32 %v998_v24, 23 }
  0x87   :  { %9236 = vst [vmem:[#allocation14_spill] sm:$0xff] %v4789_v61  ;;  %v375_v63 = vshrl.u32 %v374_v59, 23  ;;  %v791_v0 = vshrl.u32 %v790_v60, 23  ;;  %v2039_v6 = vshrl.u32 %v2038_v2, 23  ;;  %9237 = vst [vmem:[#allocation15_spill] sm:$0xff] %v4798_v14  ;;  %v167_v20 = vshrl.u32 %v166_v15, 23 }
  0x88   :  { %v4078_v5 = vadd.s32 4294967169, %v1207_v1  ;;  %v4126_v28 = vadd.s32 4294967169, %v2455_v19  ;;  %v583_v30 = vshrl.u32 %v582_v21, 23  ;;  %v4813_v37 = vmul.f32 %v4764_v39, %v78_v51 }
  0x89   :  { %v4046_v3 = vadd.s32 4294967169, %v375_v63  ;;  %v4062_v4 = vadd.s32 4294967169, %v791_v0  ;;  %v4110_v12 = vadd.s32 4294967169, %v2039_v6  ;;  %v4038_v29 = vadd.s32 4294967169, %v167_v20 }
  0x8a   :  { %v1213_v11 = vadd.s32 1, %v4078_v5  ;;  %9242 = vst [vmem:[#allocation20_spill] sm:$0xff] %v4813_v37  ;;  %v2461_v41 = vadd.s32 1, %v4126_v28  ;;  %v4054_v43 = vadd.s32 4294967169, %v583_v30  ;;  %v4070_v48 = vadd.s32 4294967169, %v999_v32 }
  0x8b   :  { %v381_v8 = vadd.s32 1, %v4046_v3  ;;  %v797_v9 = vadd.s32 1, %v4062_v4  ;;  %v2045_v17 = vadd.s32 1, %v4110_v12  ;;  %v173_v42 = vadd.s32 1, %v4038_v29 }
  0x8c   :  { %vm1214_vm2 = vcmp.gt.s32.totalorder %v1213_v11, 0  ;;  %v8933_v62 = vmov 920167782   ;;  %v8931_v1 = vmov 1326507024   ;;  %v4843_v3 = vmul.f32 %v4758_v34, %v4818_v44 }
  0x8d   :  { %vm382_vm0 = vcmp.gt.s32.totalorder %v381_v8, 0  ;;  %vm798_vm1 = vcmp.gt.s32.totalorder %v797_v9, 0  ;;  %v1215_v25 = vsel %vm1214_vm2, %v1213_v11, 0  ;;  %vm2046_vm3 = vcmp.gt.s32.totalorder %v2045_v17, 0 }
  0x8e   :  { %v383_v18 = vsel %vm382_vm0, %v381_v8, 0  ;;  %v799_v23 = vsel %vm798_vm1, %v797_v9, 0  ;;  %v4807_v31 = vand.u32 31, %v1215_v25  ;;  %v2047_v33 = vsel %vm2046_vm3, %v2045_v17, 0  ;;  %9250 = vst [vmem:[#allocation28_spill] sm:$0xff] %v4843_v3 }
  0x8f   :  { %v4803_v26 = vand.u32 31, %v383_v18  ;;  %v4805_v27 = vand.u32 31, %v799_v23  ;;  %v4820_v45 = vshrl.u32 %v383_v18, 5  ;;  %v4825_v47 = vand.u32 31, %v2047_v33 }
  0x90   :  { %9240 = vst [vmem:[#allocation18_spill] sm:$0xff] %v4807_v31  ;;  %v4823_v46 = vsub.s32 32, %v4807_v31  ;;  %v4829_v51 = vshrl.u32 %v799_v23, 5  ;;  %v4831_v59 = vshrl.u32 %v1215_v25, 5  ;;  %v4833_v60 = vshrl.u32 %v2047_v33, 5 }
  0x91   :  { %9238 = vst [vmem:[#allocation16_spill] sm:$0xff] %v4803_v26  ;;  %9239 = vst [vmem:[#allocation17_spill] sm:$0xff] %v4805_v27  ;;  %v4810_v36 = vsub.s32 32, %v4803_v26  ;;  %v4816_v40 = vsub.s32 32, %v4805_v27  ;;  %v397_v50 = vshll.u32 %v8935_v49, %v4803_v26  ;;  %v400_v0 = vshll.u32 %v8933_v62, %v4803_v26 }
  0x92   :  { %9244 = vst [vmem:[#allocation22_spill] sm:$0xff] %v4820_v45  ;;  %9245 = vst [vmem:[#allocation23_spill] sm:$0xff] %v4823_v46  ;;  %v813_v4 = vshll.u32 %v8935_v49, %v4805_v27  ;;  %v816_v6 = vshll.u32 %v8933_v62, %v4805_v27  ;;  %v4853_v8 = vmul.f32 %v4760_v35, %v4818_v44  ;;  %v4862_v13 = vsub.s32 32, %v4825_v47 }
  0x93   :  { %9241 = vst [vmem:[#allocation19_spill] sm:$0xff] %v4810_v36  ;;  %9243 = vst [vmem:[#allocation21_spill] sm:$0xff] %v4816_v40  ;;  %v398_v63 = vshrl.u32 %v8933_v62, %v4810_v36  ;;  %v401_v2 = vshrl.u32 %v8931_v1, %v4810_v36  ;;  %v814_v5 = vshrl.u32 %v8933_v62, %v4816_v40  ;;  %vm406_vm4 = vcmp.lt.s32.totalorder %v4820_v45, 4 }
  0x94   :  { %9246 = vst [vmem:[#allocation24_spill] sm:$0xff] %v4825_v47  ;;  %9247 = vst [vmem:[#allocation25_spill] sm:$0xff] %v4829_v51  ;;  %v817_v9 = vshrl.u32 %v8931_v1, %v4816_v40  ;;  %v1229_v11 = vshll.u32 %v8935_v49, %v4807_v31  ;;  %v1230_v12 = vshrl.u32 %v8933_v62, %v4823_v46  ;;  %vm9142_vm5 = vcmp.lt.s32.totalorder %v4829_v51, 4 }
  0x95   :  { %9248 = vst [vmem:[#allocation26_spill] sm:$0xff] %v4831_v59  ;;  %9249 = vst [vmem:[#allocation27_spill] sm:$0xff] %v4833_v60  ;;  %v1232_v15 = vshll.u32 %v8933_v62, %v4807_v31  ;;  %vm9130_vm6 = vcmp.lt.s32.totalorder %v4831_v59, 4  ;;  %v4869_v17 = vor.u32 %v398_v63, %v397_v50  ;;  %v402_v18 = vor.u32 %v401_v2, %v400_v0 }
  0x96   :  { %9251 = vst [vmem:[#allocation29_spill] sm:$0xff] %v4853_v8  ;;  %9252 = vst [vmem:[#allocation30_spill] sm:$0xff] %v4862_v13  ;;  %v1233_v19 = vshrl.u32 %v8931_v1, %v4823_v46  ;;  %vm2462_vm7 = vcmp.gt.s32.totalorder %v2461_v41, 0  ;;  %v4873_v20 = vor.u32 %v814_v5, %v813_v4  ;;  %vm174_vm8 = vcmp.gt.s32.totalorder %v173_v42, 0 }
  0x97   :  { %9253 = vst [vmem:[#allocation31_spill] sm:$0xff] %v4869_v17  ;;  %v1830_v21 = vand.u32 2139095040, %v4813_v37  ;;  %v4878_v23 = vmul.f32 %v4769_v53, %v4818_v44  ;;  %v818_v24 = vor.u32 %v817_v9, %v816_v6  ;;  %v4880_v25 = vor.u32 %v1230_v12, %v1229_v11 }
  0x98   :  { %9254 = vst [vmem:[#allocation32_spill] sm:$0xff] %v4873_v20  ;;  %v2061_v28 = vshll.u32 %v8935_v49, %v4825_v47  ;;  %v2062_v29 = vshrl.u32 %v8933_v62, %v4862_v13  ;;  %v2463_v30 = vsel %vm2462_vm7, %v2461_v41, 0  ;;  %v589_v32 = vadd.s32 1, %v4054_v43 }
  0x99   :  { %9255 = vst [vmem:[#allocation33_spill] sm:$0xff] %v4878_v23  ;;  %9256 = vst [vmem:[#allocation34_spill] sm:$0xff] %v4880_v25  ;;  %v1005_v33 = vadd.s32 1, %v4070_v48  ;;  %v2246_v50 = vand.u32 2139095040, %v4778_v56  ;;  %v2064_v63 = vshll.u32 %v8933_v62, %v4825_v47  ;;  %v2065_v0 = vshrl.u32 %v8931_v1, %v4862_v13 }
  0x9a   :  { %v175_v2 = vsel %vm174_vm8, %v173_v42, 0  ;;  %v4893_v4 = vmul.f32 %v4762_v38, %v4818_v44  ;;  %v4898_v5 = vsel %vm406_vm4, %v4869_v17, 920167782  ;;  %v1234_v41 = vor.u32 %v1233_v19, %v1232_v15 }
  0x9b   :  { %9258 = vst [vmem:[#allocation36_spill] sm:$0xff] %v4898_v5  ;;  %v1831_v43 = vshrl.u32 %v1830_v21, 23  ;;  %v478_v48 = vand.u32 2139095040, %v4878_v23  ;;  %v4903_v6 = vsel %vm406_vm4, %v402_v18, 1326507024  ;;  %v4910_v9 = vor.u32 %v2062_v29, %v2061_v28 }
  0x9c   :  { %9257 = vst [vmem:[#allocation35_spill] sm:$0xff] %v4893_v4  ;;  %9259 = vst [vmem:[#allocation37_spill] sm:$0xff] %v4903_v6  ;;  %v4908_v42 = vsel %vm9142_vm5, %v4873_v20, 920167782  ;;  %v4912_v11 = vand.u32 31, %v2463_v30  ;;  %v4914_v12 = vand.u32 31, %v175_v2  ;;  %v2066_v21 = vor.u32 %v2065_v0, %v2064_v63 }
  0x9d   :  { %9260 = vst [vmem:[#allocation38_spill] sm:$0xff] %v4908_v42  ;;  %9261 = vst [vmem:[#allocation39_spill] sm:$0xff] %v4910_v9  ;;  %vm590_vm9 = vcmp.gt.s32.totalorder %v589_v32, 0  ;;  %vm1006_vm10 = vcmp.gt.s32.totalorder %v1005_v33, 0  ;;  %v2247_v15 = vshrl.u32 %v2246_v50, 23  ;;  %v894_v28 = vand.u32 2139095040, %v4893_v4 }
  0x9e   :  { %9262 = vst [vmem:[#allocation40_spill] sm:$0xff] %v4912_v11  ;;  %9263 = vst [vmem:[#allocation41_spill] sm:$0xff] %v4914_v12  ;;  %v4918_v19 = vsel %vm9142_vm5, %v818_v24, 1326507024  ;;  %v4923_v18 = vsel %vm9130_vm6, %v4880_v25, 920167782  ;;  %v2477_v22 = vshll.u32 %v9273_v10, %v4912_v11 }
  0x9f   :  { %9264 = vst [vmem:[#allocation42_spill] sm:$0xff] %v4918_v19  ;;  %9265 = vst [vmem:[#allocation43_spill] sm:$0xff] %v4923_v18  ;;  %v4928_v29 = vsel %vm9130_vm6, %v1234_v41, 1326507024  ;;  %vm9070_vm11 = vcmp.lt.s32.totalorder %v4833_v60, 4  ;;  %v4102_v1 = vadd.s32 4294967169, %v1831_v43  ;;  %v4946_v43 = vmul.f32 %v4764_v39, %v4818_v44 }
  0xa0   :  { %9266 = vst [vmem:[#allocation44_spill] sm:$0xff] %v4928_v29  ;;  %v479_v50 = vshrl.u32 %v478_v48, 23  ;;  %v4934_v24 = vsel %vm9070_vm11, %v4910_v9, 920167782  ;;  %v4937_v62 = vsub.s32 32, %v4912_v11  ;;  %v591_v49 = vsel %vm590_vm9, %v589_v32, 0 }
  0xa1   :  { %9267 = vst [vmem:[#allocation45_spill] sm:$0xff] %v4934_v24  ;;  %v1007_v63 = vsel %vm1006_vm10, %v1005_v33, 0  ;;  %v4939_v0 = vshrl.u32 %v2463_v30, 5  ;;  %v4942_v16 = vsub.s32 32, %v4914_v12  ;;  %v4118_v41 = vadd.s32 4294967169, %v2247_v15  ;;  %9271 = vst [vmem:[#allocation49_spill] sm:$0xff] %v4946_v43 }
  0xa2   :  { %9268 = vst [vmem:[#allocation46_spill] sm:$0xff] %v4937_v62  ;;  %v4950_v48 = vsel %vm9070_vm11, %v2066_v21, 1326507024  ;;  %v4954_v54 = vshrl.u32 %v175_v2, 5  ;;  %v895_v32 = vshrl.u32 %v894_v28, 23  ;;  %v4956_v30 = vand.u32 31, %v591_v49 }
  0xa3   :  { %9269 = vst [vmem:[#allocation47_spill] sm:$0xff] %v4939_v0  ;;  %9270 = vst [vmem:[#allocation48_spill] sm:$0xff] %v4942_v16  ;;  %v4958_v33 = vand.u32 31, %v1007_v63  ;;  %v1837_v56 = vadd.s32 1, %v4102_v1  ;;  %v4050_v15 = vadd.s32 4294967169, %v479_v50  ;;  %v1310_v60 = vand.u32 2139095040, %v4843_v3 }
  0xa4   :  { %9272 = vst [vmem:[#allocation50_spill] sm:$0xff] %v4950_v48  ;;  %9274 = vst [vmem:[#allocation51_spill] sm:$0xff] %v4954_v54  ;;  %v9277_v9 = vmov 920167782   ;;  %v9278_v21 = vmov 1326507024   ;;  %v189_v50 = vshll.u32 %v9273_v10, %v4914_v12  ;;  %v605_v46 = vshll.u32 %v9273_v10, %v4956_v30 }
  0xa5   :  { %9275 = vst [vmem:[#allocation52_spill] sm:$0xff] %v4956_v30  ;;  %9276 = vst [vmem:[#allocation53_spill] sm:$0xff] %v4958_v33  ;;  %v2478_v44 = vshrl.u32 %v9277_v9, %v4937_v62  ;;  %v2480_v24 = vshll.u32 %v9277_v9, %v4912_v11  ;;  %v2481_v48 = vshrl.u32 %v9278_v21, %v4937_v62  ;;  %v2253_v13 = vadd.s32 1, %v4118_v41 }
  0xa6   :  { %v190_v2 = vshrl.u32 %v9277_v9, %v4942_v16  ;;  %v193_v28 = vshrl.u32 %v9278_v21, %v4942_v16  ;;  %v2142_v1 = vand.u32 2139095040, %v4946_v43  ;;  %vm9048_vm12 = vcmp.lt.s32.totalorder %v4939_v0, 4 }
  0xa7   :  { %v192_v11 = vshll.u32 %v9277_v9, %v4914_v12  ;;  %v4977_v62 = vshrl.u32 %v591_v49, 5  ;;  %v4066_v47 = vadd.s32 4294967169, %v895_v32  ;;  %v4980_v61 = vsub.s32 32, %v4956_v30  ;;  %v4992_v32 = vpop.permute.xlu0 %82 }
  0xa8   :  { %v4983_v37 = vsub.s32 32, %v4958_v33  ;;  %vm1838_vm13 = vcmp.gt.s32.totalorder %v1837_v56, 0  ;;  %v485_v41 = vadd.s32 1, %v4050_v15  ;;  %v4985_v43 = vor.u32 %v2478_v44, %v2477_v22 }
  0xa9   :  { %9279 = vst [vmem:[#allocation54_spill] sm:$0xff] %v4977_v62  ;;  %9280 = vst [vmem:[#allocation55_spill] sm:$0xff] %v4980_v61  ;;  %v2482_v3 = vor.u32 %v2481_v48, %v2480_v24  ;;  %v4987_v25 = vshrl.u32 %v1007_v63, 5  ;;  %v1311_v29 = vshrl.u32 %v1310_v60, 23  ;;  %v4989_v18 = vor.u32 %v190_v2, %v189_v50 }
  0xaa   :  { %9281 = vst [vmem:[#allocation56_spill] sm:$0xff] %v4983_v37  ;;  %9282 = vst [vmem:[#allocation57_spill] sm:$0xff] %v4985_v43  ;;  %v194_v59 = vor.u32 %v193_v28, %v192_v11  ;;  %vm198_vm14 = vcmp.lt.s32.totalorder %v4954_v54, 4  ;;  %vm2254_vm15 = vcmp.gt.s32.totalorder %v2253_v13, 0  ;;  %v2143_v49 = vshrl.u32 %v2142_v1, 23 }
  0xab   :  { %9283 = vst [vmem:[#allocation58_spill] sm:$0xff] %v4987_v25  ;;  %9284 = vst [vmem:[#allocation59_spill] sm:$0xff] %v4989_v18  ;;  %v608_v22 = vshll.u32 %v9277_v9, %v4956_v30  ;;  %v1839_v15 = vsel %vm1838_vm13, %v1837_v56, 0  ;;  %v901_v24 = vadd.s32 1, %v4066_v47  ;;  %v606_v60 = vshrl.u32 %v9277_v9, %v4980_v61 }
  0xac   :  { %v609_v11 = vshrl.u32 %v9278_v21, %v4980_v61  ;;  %v1022_v63 = vshrl.u32 %v9277_v9, %v4983_v37  ;;  %vm486_vm0 = vcmp.gt.s32.totalorder %v485_v41, 0  ;;  %v1025_v48 = vshrl.u32 %v9278_v21, %v4983_v37 }
  0xad   :  { %v2255_v44 = vsel %vm2254_vm15, %v2253_v13, 0  ;;  %v4082_v2 = vadd.s32 4294967169, %v1311_v29  ;;  %v5008_v28 = vmul.f32 %v4758_v34, %v4992_v32  ;;  %v1021_v56 = vshll.u32 %v9273_v10, %v4958_v33 }
  0xae   :  { %v5012_v47 = vand.u32 31, %v1839_v15  ;;  %v4114_v1 = vadd.s32 4294967169, %v2143_v49  ;;  %v5016_v50 = vmul.f32 %v4760_v35, %v4992_v32  ;;  %v1024_v31 = vshll.u32 %v9277_v9, %v4958_v33 }
  0xaf   :  { %9285 = vst [vmem:[#allocation60_spill] sm:$0xff] %v5008_v28  ;;  %v487_v52 = vsel %vm486_vm0, %v485_v41, 0  ;;  %vm902_vm1 = vcmp.gt.s32.totalorder %v901_v24, 0  ;;  %v2558_v13 = vand.u32 2139095040, %v4853_v8  ;;  %v5024_v34 = vsel %vm9048_vm12, %v4985_v43, 920167782 }
  0xb0   :  { %9286 = vst [vmem:[#allocation61_spill] sm:$0xff] %v5012_v47  ;;  %9287 = vst [vmem:[#allocation62_spill] sm:$0xff] %v5016_v50  ;;  %v5026_v29 = vor.u32 %v606_v60, %v605_v46  ;;  %v610_v37 = vor.u32 %v609_v11, %v608_v22  ;;  %v5028_v49 = vand.u32 31, %v2255_v44  ;;  %v5032_v35 = vsel %vm9048_vm12, %v2482_v3, 1326507024 }
  0xb1   :  { %9288 = vst [vmem:[#allocation63_spill] sm:$0xff] %v5024_v34  ;;  %9291 = vst [vmem:[#allocation66_spill] sm:$0xff] %v5032_v35  ;;  %v5034_v55 = vor.u32 %v1022_v63, %v1021_v56  ;;  %v1026_v41 = vor.u32 %v1025_v48, %v1024_v31  ;;  %v1317_v33 = vadd.s32 1, %v4082_v2  ;;  %v5037_v8 = vsub.s32 32, %v5012_v47 }
  0xb2   :  { %9289 = vst [vmem:[#allocation64_spill] sm:$0xff] %v5026_v29  ;;  %9290 = vst [vmem:[#allocation65_spill] sm:$0xff] %v5028_v49  ;;  %v5039_v4 = vand.u32 31, %v487_v52  ;;  %v903_v43 = vsel %vm902_vm1, %v901_v24, 0  ;;  %v2149_v34 = vadd.s32 1, %v4114_v1  ;;  %vm9152_vm2 = vcmp.lt.s32.totalorder %v4977_v62, 4 }
  0xb3   :  { %9292 = vst [vmem:[#allocation67_spill] sm:$0xff] %v5034_v55  ;;  %9293 = vst [vmem:[#allocation68_spill] sm:$0xff] %v5037_v8  ;;  %v5044_v46 = vsel %vm198_vm14, %v4989_v18, 920167782  ;;  %v5048_v3 = vsel %vm198_vm14, %v194_v59, 1326507024  ;;  %v1853_v56 = vshll.u32 %v9273_v10, %v5012_v47  ;;  %v1857_v35 = vshrl.u32 %v9278_v21, %v5037_v8 }
  0xb4   :  { %9294 = vst [vmem:[#allocation69_spill] sm:$0xff] %v5039_v4  ;;  %9295 = vst [vmem:[#allocation70_spill] sm:$0xff] %v5044_v46  ;;  %v2559_v31 = vshrl.u32 %v2558_v13, 23  ;;  %v5054_v22 = vsel %vm9152_vm2, %v5026_v29, 920167782  ;;  %vm9140_vm3 = vcmp.lt.s32.totalorder %v4987_v25, 4  ;;  %v5088_v13 = vmul.f32 %v4769_v53, %v4992_v32 }
  0xb5   :  { %9296 = vst [vmem:[#allocation71_spill] sm:$0xff] %v5048_v3  ;;  %9297 = vst [vmem:[#allocation72_spill] sm:$0xff] %v5054_v22  ;;  %v5058_v24 = vsel %vm9152_vm2, %v610_v37, 1326507024  ;;  %v5062_v60 = vsub.s32 32, %v5028_v49  ;;  %v5069_v11 = vshrl.u32 %v1839_v15, 5  ;;  %v1854_v37 = vshrl.u32 %v9277_v9, %v5037_v8 }
  0xb6   :  { %9298 = vst [vmem:[#allocation73_spill] sm:$0xff] %v5058_v24  ;;  %v5067_v59 = vsel %vm9140_vm3, %v5034_v55, 920167782  ;;  %v5071_v63 = vand.u32 31, %v903_v43  ;;  %vm1318_vm7 = vcmp.gt.s32.totalorder %v1317_v33, 0  ;;  %v5080_v2 = vsub.s32 32, %v5039_v4 }
  0xb7   :  { %9299 = vst [vmem:[#allocation74_spill] sm:$0xff] %v5062_v60  ;;  %9300 = vst [vmem:[#allocation75_spill] sm:$0xff] %v5067_v59  ;;  %v5075_v48 = vsel %vm9140_vm3, %v1026_v41, 1326507024  ;;  %vm2150_vm8 = vcmp.gt.s32.totalorder %v2149_v34, 0  ;;  %v5084_v1 = vshrl.u32 %v2255_v44, 5  ;;  %v1856_v41 = vshll.u32 %v9277_v9, %v5012_v47 }
  0xb8   :  { %9301 = vst [vmem:[#allocation76_spill] sm:$0xff] %v5069_v11  ;;  %9302 = vst [vmem:[#allocation77_spill] sm:$0xff] %v5071_v63  ;;  %v4130_v15 = vadd.s32 4294967169, %v2559_v31  ;;  %v2270_v0 = vshrl.u32 %v9277_v9, %v5062_v60  ;;  %v1319_v59 = vsel %vm1318_vm7, %v1317_v33, 0  ;;  %vm9071_vm9 = vcmp.lt.s32.totalorder %v5069_v11, 4 }
  0xb9   :  { %9303 = vst [vmem:[#allocation78_spill] sm:$0xff] %v5075_v48  ;;  %9304 = vst [vmem:[#allocation79_spill] sm:$0xff] %v5080_v2  ;;  %v2273_v44 = vshrl.u32 %v9278_v21, %v5062_v60  ;;  %v5100_v31 = vsub.s32 32, %v5071_v63  ;;  %v2151_v53 = vsel %vm2150_vm8, %v2149_v34, 0  ;;  %v5102_v55 = vor.u32 %v1854_v37, %v1853_v56 }
  0xba   :  { %9305 = vst [vmem:[#allocation80_spill] sm:$0xff] %v5084_v1  ;;  %9306 = vst [vmem:[#allocation81_spill] sm:$0xff] %v5088_v13  ;;  %v2269_v47 = vshll.u32 %v9273_v10, %v5028_v49  ;;  %v2272_v8 = vshll.u32 %v9277_v9, %v5028_v49  ;;  %v502_v33 = vshrl.u32 %v9277_v9, %v5080_v2  ;;  %vm9059_vm10 = vcmp.lt.s32.totalorder %v5084_v1, 4 }
  0xbb   :  { %9307 = vst [vmem:[#allocation82_spill] sm:$0xff] %v5100_v31  ;;  %9308 = vst [vmem:[#allocation83_spill] sm:$0xff] %v5102_v55  ;;  %v505_v60 = vshrl.u32 %v9278_v21, %v5080_v2  ;;  %v5113_v48 = vand.u32 31, %v1319_v59  ;;  %v2565_v25 = vadd.s32 1, %v4130_v15  ;;  %v1858_v34 = vor.u32 %v1857_v35, %v1856_v41 }
  0xbc   :  { %v5115_v37 = vor.u32 %v2270_v0, %v2269_v47  ;;  %v501_v56 = vshll.u32 %v9273_v10, %v5039_v4  ;;  %v5119_v42 = vand.u32 31, %v2151_v53  ;;  %v2274_v49 = vor.u32 %v2273_v44, %v2272_v8  ;;  %v127_v44 = vpop.permute.xlu1 %126 }
  0xbd   :  { %9309 = vst [vmem:[#allocation84_spill] sm:$0xff] %v5113_v48  ;;  %v5121_v20 = vshrl.u32 %v487_v52, 5  ;;  %v504_v19 = vshll.u32 %v9277_v9, %v5039_v4  ;;  %v918_v51 = vshrl.u32 %v9277_v9, %v5100_v31  ;;  %v5130_v35 = vsel %vm9071_vm9, %v5102_v55, 920167782 }
  0xbe   :  { %9310 = vst [vmem:[#allocation85_spill] sm:$0xff] %v5115_v37  ;;  %9311 = vst [vmem:[#allocation86_spill] sm:$0xff] %v5119_v42  ;;  %v5132_v0 = vor.u32 %v502_v33, %v501_v56  ;;  %v5134_v47 = vshrl.u32 %v903_v43, 5  ;;  %v917_v8 = vshll.u32 %v9273_v10, %v5071_v63  ;;  %v921_v15 = vshrl.u32 %v9278_v21, %v5100_v31 }
  0xbf   :  { %9312 = vst [vmem:[#allocation87_spill] sm:$0xff] %v5121_v20  ;;  %9313 = vst [vmem:[#allocation88_spill] sm:$0xff] %v5130_v35  ;;  %v506_v52 = vor.u32 %v505_v60, %v504_v19  ;;  %v5141_v41 = vsub.s32 32, %v5113_v48  ;;  %vm2566_vm13 = vcmp.gt.s32.totalorder %v2565_v25, 0  ;;  %v5145_v55 = vsel %vm9071_vm9, %v1858_v34, 1326507024 }
  0xc0   :  { %9314 = vst [vmem:[#allocation89_spill] sm:$0xff] %v5132_v0  ;;  %9315 = vst [vmem:[#allocation90_spill] sm:$0xff] %v5134_v47  ;;  %v5150_v43 = vsel %vm9059_vm10, %v5115_v37, 920167782  ;;  %v5153_v33 = vsub.s32 32, %v5119_v42  ;;  %v5157_v19 = vmul.f32 %v4762_v38, %v4992_v32  ;;  %vm9153_vm15 = vcmp.lt.s32.totalorder %v5121_v20, 4 }
  0xc1   :  { %9316 = vst [vmem:[#allocation91_spill] sm:$0xff] %v5141_v41  ;;  %9317 = vst [vmem:[#allocation92_spill] sm:$0xff] %v5145_v55  ;;  %v5161_v60 = vsel %vm9059_vm10, %v2274_v49, 1326507024  ;;  %v5164_v34 = vor.u32 %v918_v51, %v917_v8  ;;  %v920_v56 = vshll.u32 %v9277_v9, %v5071_v63  ;;  %v5171_v37 = vsel %vm9153_vm15, %v5132_v0, 920167782 }
  0xc2   :  { %9318 = vst [vmem:[#allocation93_spill] sm:$0xff] %v5150_v43  ;;  %9319 = vst [vmem:[#allocation94_spill] sm:$0xff] %v5153_v33  ;;  %vm9141_vm0 = vcmp.lt.s32.totalorder %v5134_v47, 4  ;;  %v2567_v43 = vsel %vm2566_vm13, %v2565_v25, 0  ;;  %v5175_v55 = vmul.f32 %v127_v44, %v4762_v38  ;;  %v5179_v49 = vsel %vm9153_vm15, %v506_v52, 1326507024 }
  0xc3   :  { %9320 = vst [vmem:[#allocation95_spill] sm:$0xff] %v5157_v19  ;;  %9321 = vst [vmem:[#allocation96_spill] sm:$0xff] %v5161_v60  ;;  %v922_v51 = vor.u32 %v921_v15, %v920_v56  ;;  %v1334_v8 = vshrl.u32 %v9277_v9, %v5141_v41  ;;  %v1337_v60 = vshrl.u32 %v9278_v21, %v5141_v41  ;;  %v5185_v1 = vshrl.u32 %v1319_v59, 5 }
  0xc4   :  { %9322 = vst [vmem:[#allocation97_spill] sm:$0xff] %v5164_v34  ;;  %9323 = vst [vmem:[#allocation98_spill] sm:$0xff] %v5171_v37  ;;  %v2166_v35 = vshrl.u32 %v9277_v9, %v5153_v33  ;;  %v270_v25 = vand.u32 2139095040, %v5088_v13  ;;  %v686_v11 = vand.u32 2139095040, %v5157_v19  ;;  %v5194_v52 = vsel %vm9141_vm0, %v5164_v34, 920167782 }
  0xc5   :  { %9324 = vst [vmem:[#allocation99_spill] sm:$0xff] %v5179_v49  ;;  %9325 = vst [vmem:[#allocation100_spill] sm:$0xff] %v5185_v1  ;;  %v1333_v15 = vshll.u32 %v9273_v10, %v5113_v48  ;;  %v1336_v56 = vshll.u32 %v9277_v9, %v5113_v48  ;;  %v5200_v59 = vand.u32 31, %v2567_v43  ;;  %v5202_v41 = vshrl.u32 %v2151_v53, 5 }
  0xc6   :  { %9326 = vst [vmem:[#allocation101_spill] sm:$0xff] %v5194_v52  ;;  %v2165_v63 = vshll.u32 %v9273_v10, %v5119_v42  ;;  %v2169_v31 = vshrl.u32 %v9278_v21, %v5153_v33  ;;  %v5211_v34 = vsel %vm9141_vm0, %v922_v51, 1326507024  ;;  %v1518_v48 = vand.u32 2139095040, %v5175_v55 }
  0xc7   :  { %9327 = vst [vmem:[#allocation102_spill] sm:$0xff] %v5200_v59  ;;  %9328 = vst [vmem:[#allocation103_spill] sm:$0xff] %v5202_v41  ;;  %v5213_v52 = vor.u32 %v1334_v8, %v1333_v15  ;;  %v1338_v27 = vor.u32 %v1337_v60, %v1336_v56  ;;  %v2168_v53 = vshll.u32 %v9277_v9, %v5119_v42  ;;  %v271_v19 = vshrl.u32 %v270_v25, 23 }
  0xc8   :  { %9329 = vst [vmem:[#allocation104_spill] sm:$0xff] %v5211_v34  ;;  %v5216_v58 = vor.u32 %v2166_v35, %v2165_v63  ;;  %v687_v29 = vshrl.u32 %v686_v11, 23  ;;  %v5221_v33 = vsub.s32 32, %v5200_v59  ;;  %v5225_v40 = vmul.f32 %v4764_v39, %v4992_v32 }
  0xc9   :  { %9330 = vst [vmem:[#allocation105_spill] sm:$0xff] %v5213_v52  ;;  %v5228_v51 = vmul.f32 %v4764_v39, %v127_v44  ;;  %v1519_v60 = vshrl.u32 %v1518_v48, 23  ;;  %vm9114_vm1 = vcmp.lt.s32.totalorder %v5185_v1, 4  ;;  %v2170_v63 = vor.u32 %v2169_v31, %v2168_v53 }
  0xca   :  { %9331 = vst [vmem:[#allocation106_spill] sm:$0xff] %v5216_v58  ;;  %9332 = vst [vmem:[#allocation107_spill] sm:$0xff] %v5221_v33  ;;  %vm9060_vm7 = vcmp.lt.s32.totalorder %v5202_v41, 4  ;;  %v9335_v35 = vand.u32 2147483647, %v5175_v55  ;;  %v5243_v44 = vshrl.u32 %v2567_v43, 5  ;;  %v2582_v53 = vshrl.u32 %v9277_v9, %v5221_v33  ;;  %v5275_v41 = vpop.permute.xlu0 %121 }
  0xcb   :  { %9333 = vst [vmem:[#allocation108_spill] sm:$0xff] %v5225_v40  ;;  %9334 = vst [vmem:[#allocation109_spill] sm:$0xff] %v5228_v51  ;;  %v5237_v11 = vsel %vm9114_vm1, %v5213_v52, 920167782  ;;  %v5241_v32 = vsel %vm9114_vm1, %v1338_v27, 1326507024 }
  0xcc   :  { %v1522_v8 = vand.u32 8388607, %v9335_v35  ;;  %9336 = vst [vmem:[#allocation110_spill] sm:$0xff] %v5237_v11  ;;  %9337 = vst [vmem:[#allocation111_spill] sm:$0xff] %v5241_v32  ;;  %v4090_v48 = vadd.s32 4294967169, %v1519_v60  ;;  %v4042_v25 = vadd.s32 4294967169, %v271_v19  ;;  %v5261_v60 = vshrl.u32 %v9278_v21, %v5221_v33 }
  0xcd   :  { %9338 = vst [vmem:[#allocation112_spill] sm:$0xff] %v5243_v44  ;;  %v5248_v31 = vsel %vm9060_vm7, %v5216_v58, 920167782  ;;  %v4058_v15 = vadd.s32 4294967169, %v687_v29  ;;  %v1102_v56 = vand.u32 2139095040, %v5008_v28  ;;  %v1934_v35 = vand.u32 2139095040, %v5225_v40 }
  0xce   :  { %9339 = vst [vmem:[#allocation113_spill] sm:$0xff] %v5248_v31  ;;  %v1525_v42 = vadd.s32 1, %v4090_v48  ;;  %v2766_v27 = vand.u32 2139095040, %v5228_v51  ;;  %v5257_v43 = vsel %vm9060_vm7, %v2170_v63, 1326507024  ;;  %v2350_v29 = vand.u32 2139095040, %v5016_v50 }
  0xcf   :  { %9340 = vst [vmem:[#allocation114_spill] sm:$0xff] %v5257_v43  ;;  %v1523_v19 = vor.u32 8388608, %v1522_v8  ;;  %v2581_v58 = vshll.u32 %v9273_v10, %v5200_v59  ;;  %v5269_v40 = vshll.u32 %v9277_v9, %v5200_v59  ;;  %v5271_v63 = vadd.s32 1, %v4042_v25 }
  0xd0   :  { %vm1526_vm8 = vcmp.gt.s32.totalorder %v1525_v42, 0  ;;  %v2767_v48 = vshrl.u32 %v2766_v27, 23  ;;  %v5273_v43 = vadd.s32 1, %v4058_v15  ;;  %v1103_v8 = vshrl.u32 %v1102_v56, 23 }
  0xd1   :  { %v1527_v33 = vsel %vm1526_vm8, %v1525_v42, 0  ;;  %v5277_v50 = vor.u32 %v2582_v53, %v2581_v58  ;;  %v1935_v52 = vshrl.u32 %v1934_v35, 23  ;;  %v5281_v27 = vshrl.u32 %v2350_v29, 23 }
  0xd2   :  { %v1529_v32 = vand.u32 31, %v1527_v33  ;;  %v1528_v11 = vshrl.u32 %v1527_v33, 5  ;;  %v5283_v59 = vshll.u32 %v1523_v19, 8  ;;  %v4138_v1 = vadd.s32 4294967169, %v2767_v48 }
  0xd3   :  { %9341 = vst [vmem:[#allocation115_spill] sm:$0xff] %v5277_v50  ;;  %v9342_v15 = vand.u32 2147483647, %v5228_v51  ;;  %v5291_v58 = vmul.f32 %v5275_v41, %v4762_v38  ;;  %vm278_vm13 = vcmp.gt.s32.totalorder %v5271_v63, 0  ;;  %v9068_v56 = vmov 683565275  }
  0xd4   :  { %v1530_v25 = vsub.s32 32, %v1529_v32  ;;  %v1532_v53 = vshll.u32 %v9068_v56, %v1529_v32  ;;  %v9057_v35 = vmov 2475754826   ;;  %v9061_v29 = vmov 2131351028  }
  0xd5   :  { %v5287_v42 = vand.u32 8388607, %v9342_v15  ;;  %v1535_v33 = vshll.u32 %v9057_v35, %v1529_v32  ;;  %v1538_v19 = vshll.u32 %v9061_v29, %v1529_v32  ;;  %v1541_v48 = vshll.u32 %v9273_v10, %v1529_v32 }
  0xd6   :  { %v1533_v15 = vshrl.u32 %v9057_v35, %v1530_v25  ;;  %v1536_v31 = vshrl.u32 %v9061_v29, %v1530_v25  ;;  %v1539_v28 = vshrl.u32 %v9273_v10, %v1530_v25  ;;  %v1544_v34 = vshll.u32 %v9277_v9, %v1529_v32 }
  0xd7   :  { %vm9094_vm8 = vcmp.lt.s32.totalorder %v5243_v44, 4  ;;  %v1531_v47 = vshrl.u32 %v9068_v56, %v1530_v25  ;;  %v1542_v24 = vshrl.u32 %v9277_v9, %v1530_v25  ;;  %v1545_v22 = vshrl.u32 %v9278_v21, %v1530_v25 }
  0xd8   :  { %vm1547_vm12 = vcmp.lt.s32.totalorder %v1528_v11, 1  ;;  %v1534_v62 = vor.u32 %v1533_v15, %v1532_v53  ;;  %v1537_v30 = vor.u32 %v1536_v31, %v1535_v33  ;;  %v1540_v61 = vor.u32 %v1539_v28, %v1538_v19 }
  0xd9   :  { %v2773_v14 = vadd.s32 1, %v4138_v1  ;;  %v1543_v35 = vor.u32 %v1542_v24, %v1541_v48  ;;  %v1546_v37 = vor.u32 %v1545_v22, %v1544_v34  ;;  %vm1549_vm10 = vcmp.lt.s32.totalorder %v1528_v11, 3 }
  0xda   :  { %vm1550_vm7 = vcmp.lt.s32.totalorder %v1528_v11, 4  ;;  %v1551_v29 = vsel %vm1547_vm12, %v1531_v47, %v1534_v62  ;;  %v1555_v32 = vsel %vm1547_vm12, %v1534_v62, %v1537_v30  ;;  %v1559_v49 = vsel %vm1547_vm12, %v1537_v30, %v1540_v61 }
  0xdb   :  { %v1552_v0 = vsel %vm1550_vm7, %v1540_v61, 2102212464  ;;  %v1556_v4 = vsel %vm1550_vm7, %v1543_v35, 920167782  ;;  %v1560_v56 = vsel %vm1550_vm7, %v1546_v37, 1326507024 }
  0xdc   :  { %v1553_v20 = vsel %vm1549_vm10, %v1537_v30, %v1552_v0  ;;  %vm2774_vm11 = vcmp.gt.s32.totalorder %v2773_v14, 0  ;;  %vm1548_vm9 = vcmp.lt.s32.totalorder %v1528_v11, 2  ;;  %v1557_v2 = vsel %vm1549_vm10, %v1540_v61, %v1556_v4 }
  0xdd   :  { %v1561_v25 = vsel %vm1549_vm10, %v1543_v35, %v1560_v56  ;;  %v2775_v23 = vsel %vm2774_vm11, %v2773_v14, 0  ;;  %v1554_v53 = vsel %vm1548_vm9, %v1551_v29, %v1553_v20  ;;  %v1558_v31 = vsel %vm1548_vm9, %v1555_v32, %v1557_v2 }
  0xde   :  { %v1562_v28 = vsel %vm1548_vm9, %v1559_v49, %v1561_v25  ;;  %v1414_v24 = vand.u32 2139095040, %v5291_v58  ;;  %v5312_v62 = vmul.u32.u64.low %v5283_v59, %v1558_v31  ;;  %v5313_v47 = vmul.u32.u64.high %v5283_v59, %v1558_v31, %v5312_v62 }
  0xdf   :  { %v5308_v22 = vmul.u32.u64.low %v5283_v59, %v1562_v28  ;;  %v5309_v1 = vmul.u32.u64.high %v5283_v59, %v1562_v28, %v5308_v22  ;;  %vm694_vm12 = vcmp.gt.s32.totalorder %v5273_v43, 0  ;;  %v4074_v30 = vadd.s32 4294967169, %v1103_v8 }
  0xe0   :  { %v5317_v61 = vadd.s32 4294967169, %v1935_v52  ;;  %v2777_v14 = vand.u32 31, %v2775_v23  ;;  %v5322_v20 = vsel %vm9094_vm8, %v5277_v50, 920167782  ;;  %v279_v4 = vsel %vm278_vm13, %v5271_v63, 0 }
  0xe1   :  { %9343 = vst [vmem:[#allocation116_spill] sm:$0xff] %v5322_v20  ;;  %v1570_v2 = vmul.u32 %v5283_v59, %v1554_v53  ;;  %v2771_v37 = vor.u32 8388608, %v5287_v42  ;;  %v5329_v0 = vshrl.u32 %v2775_v23, 5  ;;  %v9344_v49 = vmov 683565275  }
  0xe2   :  { %v2778_v34 = vsub.s32 32, %v2777_v14  ;;  %v2780_v52 = vshll.u32 %v9344_v49, %v2777_v14  ;;  %v1415_v11 = vshrl.u32 %v1414_v24, 23  ;;  %vm1572_vm11 = vc.u32 %v5309_v1, %v5312_v62 }
  0xe3   :  { %v1573_v8 = vadd.s32 1, %v5313_v47  ;;  %v9345_v56 = vmov 2475754826   ;;  %v9346_v33 = vmov 2131351028   ;;  %v2789_v42 = vshll.u32 %v9273_v10, %v2777_v14 }
  0xe4   :  { %v2783_v35 = vshll.u32 %v9345_v56, %v2777_v14  ;;  %v2786_v29 = vshll.u32 %v9346_v33, %v2777_v14  ;;  %v2781_v63 = vshrl.u32 %v9345_v56, %v2778_v34  ;;  %v2784_v59 = vshrl.u32 %v9346_v33, %v2778_v34 }
  0xe5   :  { %v2787_v23 = vshrl.u32 %v9273_v10, %v2778_v34  ;;  %v1574_v19 = vsel %vm1572_vm11, %v1573_v8, %v5313_v47  ;;  %v2790_v48 = vshrl.u32 %v9277_v9, %v2778_v34  ;;  %v2792_v15 = vshll.u32 %v9277_v9, %v2777_v14 }
  0xe6   :  { %v2793_v32 = vshrl.u32 %v9278_v21, %v2778_v34  ;;  %v5345_v25 = vadd.s32 %v1574_v19, %v1570_v2  ;;  %v2782_v53 = vor.u32 %v2781_v63, %v2780_v52  ;;  %v2785_v31 = vor.u32 %v2784_v59, %v2783_v35 }
  0xe7   :  { %v2788_v28 = vor.u32 %v2787_v23, %v2786_v29  ;;  %v2791_v24 = vor.u32 %v2790_v48, %v2789_v42  ;;  %vm2795_vm9 = vcmp.lt.s32.totalorder %v5329_v0, 1  ;;  %v4086_v20 = vadd.s32 4294967169, %v1415_v11 }
  0xe8   :  { %v2794_v22 = vor.u32 %v2793_v32, %v2792_v15  ;;  %v695_v47 = vsel %vm694_vm12, %v5273_v43, 0  ;;  %vm2798_vm10 = vcmp.lt.s32.totalorder %v5329_v0, 4  ;;  %v2803_v14 = vsel %vm2795_vm9, %v2782_v53, %v2785_v31 }
  0xe9   :  { %v5354_v8 = vshll.u32 %v2771_v37, 8  ;;  %vm2797_vm7 = vcmp.lt.s32.totalorder %v5329_v0, 3  ;;  %v2804_v2 = vsel %vm2798_vm10, %v2791_v24, 920167782  ;;  %v2807_v52 = vsel %vm2795_vm9, %v2785_v31, %v2788_v28 }
  0xea   :  { %v2808_v11 = vsel %vm2798_vm10, %v2794_v22, 1326507024  ;;  %v1576_v43 = vadd.s32 536870912, %v5345_v25  ;;  %vm2796_vm13 = vcmp.lt.s32.totalorder %v5329_v0, 2  ;;  %v2805_v35 = vsel %vm2797_vm7, %v2788_v28, %v2804_v2 }
  0xeb   :  { %v2809_v37 = vsel %vm2797_vm7, %v2791_v24, %v2808_v11  ;;  %v5369_v29 = vand.u32 31, %v279_v4  ;;  %v2806_v63 = vsel %vm2796_vm13, %v2803_v14, %v2805_v35  ;;  %v1421_v23 = vadd.s32 1, %v4086_v20 }
  0xec   :  { %v2810_v59 = vsel %vm2796_vm13, %v2807_v52, %v2809_v37  ;;  %v9348_v42 = vor.u32 %v5261_v60, %v5269_v40  ;;  %v5382_v48 = vand.u32 31, %v695_v47  ;;  %v2800_v24 = vsel %vm2798_vm10, %v2788_v28, 2102212464 }
  0xed   :  { %9347 = vst [vmem:[#allocation117_spill] sm:$0xff] %v5369_v29  ;;  %v5385_v15 = vmul.u32.u64.low %v5354_v8, %v2810_v59  ;;  %v5386_v32 = vmul.u32.u64.high %v5354_v8, %v2810_v59, %v5385_v15  ;;  %v5391_v22 = vmul.u32.u64.low %v5354_v8, %v2806_v63  ;;  %v5392_v14 = vmul.u32.u64.high %v5354_v8, %v2806_v63, %v5391_v22 }
  0xee   :  { %v5380_v19 = vsel %vm9094_vm8, %v9348_v42, 1326507024  ;;  %9350 = vst [vmem:[#allocation119_spill] sm:$0xff] %v5382_v48  ;;  %vm1422_vm12 = vcmp.gt.s32.totalorder %v1421_v23, 0  ;;  %v5395_v40 = vshrl.u32 %v279_v4, 5  ;;  %v5397_v60 = vshrl.u32 %v1576_v43, 30 }
  0xef   :  { %9349 = vst [vmem:[#allocation118_spill] sm:$0xff] %v5380_v19  ;;  %v2779_v20 = vshrl.u32 %v9344_v49, %v2778_v34  ;;  %v1423_v2 = vsel %vm1422_vm12, %v1421_v23, 0  ;;  %v5401_v52 = vsub.s32 32, %v5369_v29  ;;  %v5403_v11 = vshrl.u32 %v695_v47, 5 }
  0xf0   :  { %9351 = vst [vmem:[#allocation120_spill] sm:$0xff] %v5395_v40  ;;  %v1109_v35 = vadd.s32 1, %v4074_v30  ;;  %v1425_v28 = vand.u32 31, %v1423_v2  ;;  %v5406_v37 = vsub.s32 32, %v5382_v48  ;;  %v1941_v63 = vadd.s32 1, %v5317_v61 }
  0xf1   :  { %9352 = vst [vmem:[#allocation121_spill] sm:$0xff] %v5401_v52  ;;  %9353 = vst [vmem:[#allocation122_spill] sm:$0xff] %v5403_v11  ;;  %v2799_v4 = vsel %vm2795_vm9, %v2779_v20, %v2782_v53  ;;  %v2801_v43 = vsel %vm2797_vm7, %v2785_v31, %v2800_v24  ;;  %v293_v34 = vshll.u32 %v9273_v10, %v5369_v29  ;;  %v5416_v59 = vadd.s32 4294967169, %v5281_v27 }
  0xf2   :  { %9354 = vst [vmem:[#allocation123_spill] sm:$0xff] %v5406_v37  ;;  %v2821_v30 = vadd.s32 1, %v5392_v14  ;;  %v5419_v47 = vsub.s32 32, %v1425_v28  ;;  %v5423_v23 = vshll.u32 %v9277_v9, %v5369_v29  ;;  %v709_v61 = vshll.u32 %v9273_v10, %v5382_v48 }
  0xf3   :  { %v1578_v53 = vshll.u32 %v5397_v60, 30  ;;  %vm2820_vm11 = vc.u32 %v5386_v32, %v5391_v22  ;;  %v294_v27 = vshrl.u32 %v9277_v9, %v5401_v52  ;;  %v5434_v31 = vshrl.u32 %v9278_v21, %v5401_v52 }
  0xf4   :  { %v5438_v42 = vshll.u32 %v9277_v9, %v5382_v48  ;;  %v2802_v15 = vsel %vm2796_vm13, %v2799_v4, %v2801_v43  ;;  %v710_v24 = vshrl.u32 %v9277_v9, %v5406_v37  ;;  %vm1110_vm9 = vcmp.gt.s32.totalorder %v1109_v35, 0 }
  0xf5   :  { %vm1942_vm10 = vcmp.gt.s32.totalorder %v1941_v63, 0  ;;  %v1438_v20 = vshrl.u32 %v9277_v9, %v5419_v47  ;;  %v2822_v50 = vsel %vm2820_vm11, %v2821_v30, %v5392_v14  ;;  %v5449_v19 = vmul.f32 %v4764_v39, %v5275_v41 }
  0xf6   :  { %v1441_v0 = vshrl.u32 %v9278_v21, %v5419_v47  ;;  %v5455_v4 = vsub.s32 %v5345_v25, %v1578_v53  ;;  %v2818_v43 = vmul.u32 %v5354_v8, %v2802_v15  ;;  %v5458_v48 = vshrl.u32 %v1423_v2, 5 }
  0xf7   :  { %9355 = vst [vmem:[#allocation124_spill] sm:$0xff] %v5449_v19  ;;  %v1437_v17 = vshll.u32 %v9273_v10, %v1425_v28  ;;  %v1429_v14 = vshrl.u32 %v9345_v56, %v5419_v47  ;;  %v1432_v41 = vshrl.u32 %v9346_v33, %v5419_v47  ;;  %v1435_v30 = vshrl.u32 %v9273_v10, %v5419_v47 }
  0xf8   :  { %v1440_v44 = vshll.u32 %v9277_v9, %v1425_v28  ;;  %v713_v25 = vshrl.u32 %v9278_v21, %v5406_v37  ;;  %v1111_v8 = vsel %vm1110_vm9, %v1109_v35, 0  ;;  %v2823_v2 = vadd.s32 %v2822_v50, %v2818_v43 }
  0xf9   :  { %v1439_v53 = vor.u32 %v1438_v20, %v1437_v17  ;;  %vm302_vm7 = vcmp.lt.s32.totalorder %v5395_v40, 4  ;;  %v1428_v15 = vshll.u32 %v9344_v49, %v1425_v28  ;;  %v1431_v6 = vshll.u32 %v9345_v56, %v1425_v28 }
  0xfa   :  { %v1434_v5 = vshll.u32 %v9346_v33, %v1425_v28  ;;  %v1442_v45 = vor.u32 %v1441_v0, %v1440_v44  ;;  %v1943_v36 = vsel %vm1942_vm10, %v1941_v63, 0  ;;  %v1581_v26 = vsub.s32 0, %v5455_v4 }
  0xfb   :  { %v9356_v57 = vand.u32 2147483647, %v5291_v58  ;;  %v2662_v35 = vand.u32 2139095040, %v5449_v19  ;;  %v1430_v50 = vor.u32 %v1429_v14, %v1428_v15  ;;  %v1433_v17 = vor.u32 %v1432_v41, %v1431_v6 }
  0xfc   :  { %v1436_v20 = vor.u32 %v1435_v30, %v1434_v5  ;;  %vm1446_vm13 = vcmp.lt.s32.totalorder %v5458_v48, 4  ;;  %v5481_v43 = vor.u32 %v294_v27, %v293_v34  ;;  %v5483_v29 = vand.u32 31, %v1111_v8 }
  0xfd   :  { %v1418_v37 = vand.u32 8388607, %v9356_v57  ;;  %v2824_v28 = vadd.s32 536870912, %v2823_v2  ;;  %v1452_v44 = vsel %vm1446_vm13, %v1439_v53, 920167782  ;;  %v298_v63 = vor.u32 %v5434_v31, %v5423_v23 }
  0xfe   :  { %9357 = vst [vmem:[#allocation125_spill] sm:$0xff] %v5481_v43  ;;  %9358 = vst [vmem:[#allocation126_spill] sm:$0xff] %v5483_v29  ;;  %v5489_v0 = vor.u32 %v710_v24, %v709_v61  ;;  %v5491_v57 = vshrl.u32 %v1111_v8, 5  ;;  %v1456_v5 = vsel %vm1446_vm13, %v1442_v45, 1326507024  ;;  %vm9144_vm12 = vcmp.lt.s32.totalorder %v5403_v11, 4 }
  0xff   :  { %v5496_v6 = vand.u32 31, %v1943_v36  ;;  %v1419_v34 = vor.u32 8388608, %v1418_v37  ;;  %vm1443_vm11 = vcmp.lt.s32.totalorder %v5458_v48, 1  ;;  %vm1445_vm9 = vcmp.lt.s32.totalorder %v5458_v48, 3 }
 0x100   :  { %9359 = vst [vmem:[#allocation127_spill] sm:$0xff] %v5489_v0  ;;  %9360 = vst [vmem:[#allocation128_spill] sm:$0xff] %v5491_v57  ;;  %v4091_v27 = vmin.u32 %v1581_v26, %v5455_v4  ;;  %v1451_v23 = vsel %vm1443_vm11, %v1430_v50, %v1433_v17  ;;  %v1453_v61 = vsel %vm1445_vm9, %v1436_v20, %v1452_v44  ;;  %v2663_v31 = vshrl.u32 %v2662_v35, 23 }
 0x101   :  { %9361 = vst [vmem:[#allocation129_spill] sm:$0xff] %v5496_v6  ;;  %v5506_v45 = vsub.s32 32, %v5483_v29  ;;  %v5508_v24 = vshrl.u32 %v2824_v28, 30  ;;  %v1455_v37 = vsel %vm1443_vm11, %v1433_v17, %v1436_v20  ;;  %v1457_v14 = vsel %vm1445_vm9, %v1439_v53, %v1456_v5 }
 0x102   :  { %v714_v26 = vor.u32 %v713_v25, %v5438_v42  ;;  %v5515_v41 = vshrl.u32 %v1943_v36, 5  ;;  %vm1444_vm10 = vcmp.lt.s32.totalorder %v5458_v48, 2  ;;  %v4134_v30 = vadd.s32 4294967169, %v2663_v31 }
 0x103   :  { %9362 = vst [vmem:[#allocation130_spill] sm:$0xff] %v5506_v45  ;;  %v5521_v8 = vsel %vm302_vm7, %v5481_v43, 920167782  ;;  %v5525_v15 = vsel %vm302_vm7, %v298_v63, 1326507024  ;;  %v1125_v35 = vshll.u32 %v9273_v10, %v5483_v29  ;;  %v1454_v42 = vsel %vm1444_vm10, %v1451_v23, %v1453_v61 }
 0x104   :  { %9363 = vst [vmem:[#allocation131_spill] sm:$0xff] %v5515_v41  ;;  %9364 = vst [vmem:[#allocation132_spill] sm:$0xff] %v5521_v8  ;;  %v1583_v36 = vclz %v4091_v27  ;;  %v1458_v25 = vsel %vm1444_vm10, %v1455_v37, %v1457_v14  ;;  %v5533_v53 = vshll.u32 %v1419_v34, 8  ;;  %v2669_v28 = vadd.s32 1, %v4134_v30  ;;  %v5572_v8 = vpop.permute.xlu1 %136 }
 0x105   :  { %9365 = vst [vmem:[#allocation133_spill] sm:$0xff] %v5525_v15  ;;  %v1126_v44 = vshrl.u32 %v9277_v9, %v5506_v45  ;;  %v5538_v5 = vsub.s32 32, %v5496_v6  ;;  %v2826_v63 = vshll.u32 %v5508_v24, 30  ;;  %v1448_v23 = vsel %vm1446_vm13, %v1436_v20, 2102212464 }
 0x106   :  { %v5545_v27 = vmul.u32.u64.low %v5533_v53, %v1454_v42  ;;  %v5546_v61 = vmul.u32.u64.high %v5533_v53, %v1454_v42, %v5545_v27  ;;  %vm2670_vm8 = vcmp.gt.s32.totalorder %v2669_v28, 0  ;;  %v1427_v34 = vshrl.u32 %v9344_v49, %v5419_v47 }
 0x107   :  { %9366 = vst [vmem:[#allocation134_spill] sm:$0xff] %v5538_v5  ;;  %v5552_v37 = vmul.u32.u64.low %v5533_v53, %v1458_v25  ;;  %v5553_v14 = vmul.u32.u64.high %v5533_v53, %v1458_v25, %v5552_v37  ;;  %v2671_v30 = vsel %vm2670_vm8, %v2669_v28, 0  ;;  %v5558_v31 = vsel %vm9144_vm12, %v5489_v0, 920167782 }
 0x108   :  { %9367 = vst [vmem:[#allocation135_spill] sm:$0xff] %v5558_v31  ;;  %v5562_v20 = vsel %vm9144_vm12, %v714_v26, 1326507024  ;;  %v4092_v42 = vadd.s32 4294967294, %v1583_v36  ;;  %v2673_v43 = vand.u32 31, %v2671_v30  ;;  %v5564_v15 = vsub.s32 %v2823_v2, %v2826_v63 }
 0x109   :  { %9368 = vst [vmem:[#allocation136_spill] sm:$0xff] %v5562_v20  ;;  %v1447_v47 = vsel %vm1443_vm11, %v1427_v34, %v1430_v50  ;;  %v1449_v25 = vsel %vm1445_vm9, %v1433_v17, %v1448_v23  ;;  %v9369_v28 = vand.u32 2147483647, %v5449_v19  ;;  %v5576_v0 = vshll.u32 %v9277_v9, %v5483_v29 }
 0x10a   :  { %v5580_v26 = vshrl.u32 %v9278_v21, %v5506_v45  ;;  %v5584_v2 = vshll.u32 %v9273_v10, %v5496_v6  ;;  %v2674_v50 = vsub.s32 32, %v2673_v43  ;;  %v5586_v36 = vor.u32 %v1126_v44, %v1125_v35 }
 0x10b   :  { %v2666_v37 = vand.u32 8388607, %v9369_v28  ;;  %v5590_v17 = vshrl.u32 %v9277_v9, %v5538_v5  ;;  %v5594_v63 = vshll.u32 %v9277_v9, %v5496_v6  ;;  %v5597_v23 = vadd.s32 1, %v5416_v59 }
 0x10c   :  { %9370 = vst [vmem:[#allocation137_spill] sm:$0xff] %v5586_v36  ;;  %vm4093_vm8 = vcmp.lt.s32.totalorder %v4092_v42, 0  ;;  %v1450_v34 = vsel %vm1444_vm10, %v1447_v47, %v1449_v25  ;;  %v2677_v28 = vshrl.u32 %v9345_v56, %v2674_v50  ;;  %v5604_v35 = vmul.f32 %v5572_v8, %v4762_v38 }
 0x10d   :  { %v2829_v44 = vsub.s32 0, %v5564_v15  ;;  %v2667_v29 = vor.u32 8388608, %v2666_v37  ;;  %v2676_v45 = vshll.u32 %v9344_v49, %v2673_v43  ;;  %v2680_v6 = vshrl.u32 %v9346_v33, %v2674_v50 }
 0x10e   :  { %9371 = vst [vmem:[#allocation138_spill] sm:$0xff] %v5604_v35  ;;  %v1469_v59 = vadd.s32 1, %v5546_v61  ;;  %v2679_v20 = vshll.u32 %v9345_v56, %v2673_v43  ;;  %v2682_v48 = vshll.u32 %v9346_v33, %v2673_v43  ;;  %v2683_v47 = vshrl.u32 %v9273_v10, %v2674_v50 }
 0x10f   :  { %v5613_v25 = vsel %vm4093_vm8, 0, %v4092_v42  ;;  %vm1468_vm13 = vc.u32 %v5553_v14, %v5545_v27  ;;  %v2672_v31 = vshrl.u32 %v2671_v30, 5  ;;  %v2678_v11 = vor.u32 %v2677_v28, %v2676_v45 }
 0x110   :  { %v2681_v37 = vor.u32 %v2680_v6, %v2679_v20  ;;  %v2684_v40 = vor.u32 %v2683_v47, %v2682_v48  ;;  %v2685_v52 = vshll.u32 %v9273_v10, %v2673_v43  ;;  %v2686_v13 = vshrl.u32 %v9277_v9, %v2674_v50 }
 0x111   :  { %v1466_v18 = vmul.u32 %v5533_v53, %v1450_v34  ;;  %v2688_v3 = vshll.u32 %v9277_v9, %v2673_v43  ;;  %v2689_v46 = vshrl.u32 %v9278_v21, %v2674_v50  ;;  %v1726_v42 = vand.u32 2139095040, %v5604_v35 }
 0x112   :  { %vm9131_vm11 = vcmp.lt.s32.totalorder %v5491_v57, 4  ;;  %v4139_v54 = vmin.u32 %v2829_v44, %v5564_v15  ;;  %v1470_v45 = vsel %vm1468_vm13, %v1469_v59, %v5546_v61  ;;  %v2687_v6 = vor.u32 %v2686_v13, %v2685_v52 }
 0x113   :  { %v2707_v30 = vshll.u32 %v2667_v29, 8  ;;  %v2675_v20 = vshrl.u32 %v9344_v49, %v2674_v50  ;;  %v2690_v28 = vor.u32 %v2689_v46, %v2688_v3  ;;  %vm2691_vm9 = vcmp.lt.s32.totalorder %v2672_v31, 1 }
 0x114   :  { %vm2694_vm10 = vcmp.lt.s32.totalorder %v2672_v31, 4  ;;  %vm2693_vm8 = vcmp.lt.s32.totalorder %v2672_v31, 3  ;;  %v2699_v43 = vsel %vm2691_vm9, %v2678_v11, %v2681_v37  ;;  %vm2692_vm1 = vcmp.lt.s32.totalorder %v2672_v31, 2 }
 0x115   :  { %v2696_v53 = vsel %vm2694_vm10, %v2684_v40, 2102212464  ;;  %v2700_v34 = vsel %vm2694_vm10, %v2687_v6, 920167782  ;;  %v2703_v47 = vsel %vm2691_vm9, %v2681_v37, %v2684_v40  ;;  %v1727_v12 = vshrl.u32 %v1726_v42, 23 }
 0x116   :  { %v2701_v48 = vsel %vm2693_vm8, %v2684_v40, %v2700_v34  ;;  %v5627_v16 = vadd.s32 %v1470_v45, %v1466_v18  ;;  %v2695_v44 = vsel %vm2691_vm9, %v2675_v20, %v2678_v11  ;;  %v2704_v13 = vsel %vm2694_vm10, %v2690_v28, 1326507024 }
 0x117   :  { %v2702_v61 = vsel %vm2692_vm1, %v2699_v43, %v2701_v48  ;;  %vm9123_vm13 = vcmp.lt.s32.totalorder %v5515_v41, 4  ;;  %v2697_v29 = vsel %vm2693_vm8, %v2681_v37, %v2696_v53  ;;  %v2705_v46 = vsel %vm2693_vm8, %v2687_v6, %v2704_v13 }
 0x118   :  { %v5631_v3 = vmul.u32.u64.low %v2707_v30, %v2702_v61  ;;  %v5632_v52 = vmul.u32.u64.high %v2707_v30, %v2702_v61, %v5631_v3  ;;  %v1130_v50 = vor.u32 %v5580_v26, %v5576_v0  ;;  %v1961_v40 = vshrl.u32 %v9278_v21, %v5538_v5 }
 0x119   :  { %v1591_v18 = vsub.s32 4294967266, %v5613_v25  ;;  %v2706_v11 = vsel %vm2692_vm1, %v2703_v47, %v2705_v46  ;;  %v5646_v37 = vmul.f32 %v4764_v39, %v5572_v8  ;;  %v4098_v45 = vadd.s32 4294967169, %v1727_v12 }
 0x11a   :  { %v5641_v59 = vmul.u32.u64.low %v2707_v30, %v2706_v11  ;;  %v5642_v42 = vmul.u32.u64.high %v2707_v30, %v2706_v11, %v5641_v59  ;;  %vm2358_vm9 = vcmp.gt.s32.totalorder %v5597_v23, 0  ;;  %v2831_v6 = vclz %v4139_v54 }
 0x11b   :  { %9372 = vst [vmem:[#allocation139_spill] sm:$0xff] %v5646_v37  ;;  %v1472_v0 = vadd.s32 536870912, %v5627_v16  ;;  %v2698_v26 = vsel %vm2692_vm1, %v2695_v44, %v2697_v29  ;;  %v5654_v20 = vsel %vm9131_vm11, %v5586_v36, 920167782  ;;  %v5658_v28 = vor.u32 %v5590_v17, %v5584_v2 }
 0x11c   :  { %9373 = vst [vmem:[#allocation140_spill] sm:$0xff] %v5654_v20  ;;  %v2717_v8 = vadd.s32 1, %v5632_v52  ;;  %v1733_v53 = vadd.s32 1, %v4098_v45  ;;  %v1571_v12 = vadd.s32 %v5312_v62, %v5309_v1  ;;  %v1587_v54 = vsub.s32 32, %v5613_v25 }
 0x11d   :  { %9374 = vst [vmem:[#allocation141_spill] sm:$0xff] %v5658_v28  ;;  %v1592_v43 = vadd.s32 127, %v1591_v18  ;;  %v9119_v31 = vand.u32 2147483647, %v5604_v35  ;;  %v2714_v34 = vmul.u32 %v2707_v30, %v2698_v26  ;;  %vm2716_vm1 = vc.u32 %v5642_v42, %v5631_v3 }
 0x11e   :  { %vm1734_vm10 = vcmp.gt.s32.totalorder %v1733_v53, 0  ;;  %v2974_v48 = vand.u32 2139095040, %v5646_v37  ;;  %v4140_v2 = vadd.s32 4294967294, %v2831_v6  ;;  %v5668_v17 = vshrl.u32 %v1472_v0, 30 }
 0x11f   :  { %v2718_v47 = vsel %vm2716_vm1, %v2717_v8, %v5632_v52  ;;  %v1735_v44 = vsel %vm1734_vm10, %v1733_v53, 0  ;;  %v5673_v1 = vsel %vm9131_vm11, %v1130_v50, 1326507024  ;;  %v1962_v62 = vor.u32 %v1961_v40, %v5594_v63 }
 0x120   :  { %9375 = vst [vmem:[#allocation142_spill] sm:$0xff] %v5673_v1  ;;  %v2719_v61 = vadd.s32 %v2718_v47, %v2714_v34  ;;  %v1737_v30 = vand.u32 31, %v1735_v44  ;;  %v5679_v13 = vsel %vm9123_vm13, %v5658_v28, 920167782  ;;  %v2359_v29 = vsel %vm2358_vm9, %v5597_v23, 0 }
 0x121   :  { %9376 = vst [vmem:[#allocation143_spill] sm:$0xff] %v5679_v13  ;;  %v1588_v46 = vshll.u32 %v5455_v4, %v5613_v25  ;;  %v1589_v52 = vshrl.u32 %v1571_v12, %v1587_v54  ;;  %v1593_v18 = vshll.u32 %v1592_v43, 23  ;;  %v2975_v59 = vshrl.u32 %v2974_v48, 23 }
 0x122   :  { %v2720_v50 = vadd.s32 536870912, %v2719_v61  ;;  %v1738_v11 = vsub.s32 32, %v1737_v30  ;;  %vm4141_vm8 = vcmp.lt.s32.totalorder %v4140_v2, 0  ;;  %v1474_v63 = vshll.u32 %v5668_v17, 30 }
 0x123   :  { %v1730_v40 = vand.u32 8388607, %v9119_v31  ;;  %v1736_v45 = vshrl.u32 %v1735_v44, 5  ;;  %v1740_v6 = vshll.u32 %v9344_v49, %v1737_v30  ;;  %v1743_v23 = vshll.u32 %v9345_v56, %v1737_v30 }
 0x124   :  { %v1741_v0 = vshrl.u32 %v9345_v56, %v1738_v11  ;;  %v1744_v4 = vshrl.u32 %v9346_v33, %v1738_v11  ;;  %v1746_v25 = vshll.u32 %v9346_v33, %v1737_v30  ;;  %v1747_v26 = vshrl.u32 %v9273_v10, %v1738_v11 }
 0x125   :  { %v1749_v8 = vshll.u32 %v9273_v10, %v1737_v30  ;;  %v1750_v53 = vshrl.u32 %v9277_v9, %v1738_v11  ;;  %v5697_v12 = vshrl.u32 %v2720_v50, 30  ;;  %v4146_v34 = vadd.s32 4294967169, %v2975_v59 }
 0x126   :  { %v1742_v54 = vor.u32 %v1741_v0, %v1740_v6  ;;  %v1745_v43 = vor.u32 %v1744_v4, %v1743_v23  ;;  %v1748_v48 = vor.u32 %v1747_v26, %v1746_v25  ;;  %v1752_v44 = vshll.u32 %v9277_v9, %v1737_v30 }
 0x127   :  { %v1751_v47 = vor.u32 %v1750_v53, %v1749_v8  ;;  %v1753_v31 = vshrl.u32 %v9278_v21, %v1738_v11  ;;  %v5703_v13 = vsel %vm9123_vm13, %v1962_v62, 1326507024  ;;  %v5705_v28 = vand.u32 31, %v2359_v29 }
 0x128   :  { %9377 = vst [vmem:[#allocation144_spill] sm:$0xff] %v5703_v13  ;;  %v1590_v5 = vor.u32 %v1589_v52, %v1588_v46  ;;  %v1594_v20 = vor.u32 4788187, %v1593_v18  ;;  %v5708_v50 = vsub.s32 %v5627_v16, %v1474_v63  ;;  %v1731_v6 = vor.u32 8388608, %v1730_v40 }
 0x129   :  { %9378 = vst [vmem:[#allocation145_spill] sm:$0xff] %v5705_v28  ;;  %v1754_v0 = vor.u32 %v1753_v31, %v1752_v44  ;;  %vm1755_vm9 = vcmp.lt.s32.totalorder %v1736_v45, 1  ;;  %v5711_v59 = vsel %vm4141_vm8, 0, %v4140_v2  ;;  %v2722_v30 = vshll.u32 %v5697_v12, 30 }
 0x12a   :  { %vm1758_vm1 = vcmp.lt.s32.totalorder %v1736_v45, 4  ;;  %v1763_v23 = vsel %vm1755_vm9, %v1742_v54, %v1745_v43  ;;  %vm1757_vm10 = vcmp.lt.s32.totalorder %v1736_v45, 3  ;;  %v2981_v25 = vadd.s32 1, %v4146_v34 }
 0x12b   :  { %v1760_v62 = vsel %vm1758_vm1, %v1748_v48, 2102212464  ;;  %v1764_v4 = vsel %vm1758_vm1, %v1751_v47, 920167782  ;;  %v1739_v46 = vshrl.u32 %v9344_v49, %v1738_v11  ;;  %vm1756_vm13 = vcmp.lt.s32.totalorder %v1736_v45, 2 }
 0x12c   :  { %v1765_v16 = vsel %vm1757_vm10, %v1748_v48, %v1764_v4  ;;  %v1767_v52 = vsel %vm1755_vm9, %v1745_v43, %v1748_v48  ;;  %v1477_v31 = vsub.s32 0, %v5708_v50  ;;  %v1768_v18 = vsel %vm1758_vm1, %v1754_v0, 1326507024 }
 0x12d   :  { %v1766_v2 = vsel %vm1756_vm13, %v1763_v23, %v1765_v16  ;;  %v1771_v63 = vshll.u32 %v1731_v6, 8  ;;  %v5719_v40 = vsub.s32 %v2719_v61, %v2722_v30  ;;  %v1759_v26 = vsel %vm1755_vm9, %v1739_v46, %v1742_v54 }
 0x12e   :  { %v1761_v8 = vsel %vm1757_vm10, %v1745_v43, %v1760_v62  ;;  %v1769_v53 = vsel %vm1757_vm10, %v1751_v47, %v1768_v18  ;;  %vm2982_vm8 = vcmp.gt.s32.totalorder %v2981_v25, 0  ;;  %v1595_v48 = vand.u32 2147483647, %v1594_v20 }
 0x12f   :  { %v1770_v34 = vsel %vm1756_vm13, %v1767_v52, %v1769_v53  ;;  %v5723_v44 = vmul.u32.u64.low %v1771_v63, %v1766_v2  ;;  %v5724_v11 = vmul.u32.u64.high %v1771_v63, %v1766_v2, %v5723_v44  ;;  %v2983_v23 = vsel %vm2982_vm8, %v2981_v25, 0 }
 0x130   :  { %v5727_v4 = vmul.u32.u64.low %v1771_v63, %v1770_v34  ;;  %v5728_v13 = vmul.u32.u64.high %v1771_v63, %v1770_v34, %v5727_v4  ;;  %v5730_v0 = vshrl.u32 %v2359_v29, 5  ;;  %v5733_v61 = vsub.s32 32, %v5705_v28 }
 0x131   :  { %v2839_v54 = vsub.s32 4294967266, %v5711_v59  ;;  %v2985_v43 = vand.u32 31, %v2983_v23  ;;  %v5738_v47 = vshll.u32 %v9273_v10, %v5705_v28  ;;  %v1597_v6 = vcvt.s32.f32 %v1590_v5 }
 0x132   :  { %9379 = vst [vmem:[#allocation146_spill] sm:$0xff] %v5730_v0  ;;  %9380 = vst [vmem:[#allocation147_spill] sm:$0xff] %v5733_v61  ;;  %v4087_v30 = vmin.u32 %v1477_v31, %v5708_v50  ;;  %v1762_v20 = vsel %vm1756_vm13, %v1759_v26, %v1761_v8  ;;  %v5744_v62 = vshll.u32 %v9277_v9, %v5705_v28  ;;  %v2725_v29 = vsub.s32 0, %v5719_v40 }
 0x133   :  { %v1781_v25 = vadd.s32 1, %v5724_v11  ;;  %v5748_v46 = vsub.s32 32, %v2985_v43  ;;  %v5750_v16 = vmul.f32 %v1597_v6, %v1595_v48  ;;  %v2819_v52 = vadd.s32 %v5391_v22, %v5386_v32 }
 0x134   :  { %v2835_v5 = vsub.s32 32, %v5711_v59  ;;  %v9126_v45 = vand.u32 2147483647, %v5646_v37  ;;  %v2840_v31 = vadd.s32 127, %v2839_v54  ;;  %v1778_v2 = vmul.u32 %v1771_v63, %v1762_v20 }
 0x135   :  { %vm1780_vm13 = vc.u32 %v5728_v13, %v5723_v44  ;;  %v2989_v18 = vshrl.u32 %v9345_v56, %v5748_v46  ;;  %v1479_v26 = vclz %v4087_v30  ;;  %v2988_v53 = vshll.u32 %v9344_v49, %v2985_v43 }
 0x136   :  { %v1782_v8 = vsel %vm1780_vm13, %v1781_v25, %v5724_v11  ;;  %v2992_v32 = vshrl.u32 %v9346_v33, %v5748_v46  ;;  %v4135_v22 = vmin.u32 %v2725_v29, %v5719_v40  ;;  %v2991_v48 = vshll.u32 %v9345_v56, %v2985_v43 }
 0x137   :  { %v1783_v34 = vadd.s32 %v1782_v8, %v1778_v2  ;;  %v2995_v63 = vshrl.u32 %v9273_v10, %v5748_v46  ;;  %v2978_v4 = vand.u32 8388607, %v9126_v45  ;;  %v5770_v54 = vshrl.u32 %v2983_v23, 5  ;;  %v5776_v2 = vpop.permute.xlu0 %131 }
 0x138   :  { %v2990_v6 = vor.u32 %v2989_v18, %v2988_v53  ;;  %v2994_v11 = vshll.u32 %v9346_v33, %v2985_v43  ;;  %v2993_v20 = vor.u32 %v2992_v32, %v2991_v48  ;;  %v2997_v25 = vshll.u32 %v9273_v10, %v2985_v43 }
 0x139   :  { %v1784_v30 = vadd.s32 536870912, %v1783_v34  ;;  %v2998_v29 = vshrl.u32 %v9277_v9, %v5748_v46  ;;  %v2836_v8 = vshll.u32 %v5564_v15, %v5711_v59  ;;  %v4088_v28 = vadd.s32 4294967294, %v1479_v26 }
 0x13a   :  { %v3000_v45 = vshll.u32 %v9277_v9, %v2985_v43  ;;  %v3001_v23 = vshrl.u32 %v9278_v21, %v5748_v46  ;;  %v2727_v18 = vclz %v4135_v22  ;;  %v2996_v32 = vor.u32 %v2995_v63, %v2994_v11 }
 0x13b   :  { %v5783_v53 = vshrl.u32 %v1784_v30, 30  ;;  %v2999_v48 = vor.u32 %v2998_v29, %v2997_v25  ;;  %v2979_v41 = vor.u32 8388608, %v2978_v4  ;;  %vm3003_vm9 = vcmp.lt.s32.totalorder %v5770_v54, 1 }
 0x13c   :  { %v3002_v36 = vor.u32 %v3001_v23, %v3000_v45  ;;  %v5788_v1 = vmul.f32 %v5776_v2, %v4762_v38  ;;  %v2841_v15 = vshll.u32 %v2840_v31, 23  ;;  %vm3006_vm1 = vcmp.lt.s32.totalorder %v5770_v54, 4 }
 0x13d   :  { %v1786_v59 = vshll.u32 %v5783_v53, 30  ;;  %v3011_v43 = vsel %vm3003_vm9, %v2990_v6, %v2993_v20  ;;  %v2837_v26 = vshrl.u32 %v2819_v52, %v2835_v5  ;;  %vm4089_vm10 = vcmp.lt.s32.totalorder %v4088_v28, 0 }
 0x13e   :  { %vm3005_vm8 = vcmp.lt.s32.totalorder %v5770_v54, 3  ;;  %v3012_v45 = vsel %vm3006_vm1, %v2999_v48, 920167782  ;;  %v4136_v22 = vadd.s32 4294967294, %v2727_v18  ;;  %vm3004_vm13 = vcmp.lt.s32.totalorder %v5770_v54, 2 }
 0x13f   :  { %v3013_v38 = vsel %vm3005_vm8, %v2996_v32, %v3012_v45  ;;  %v3015_v31 = vsel %vm3003_vm9, %v2993_v20, %v2996_v32  ;;  %v3016_v52 = vsel %vm3006_vm1, %v3002_v36, 1326507024  ;;  %v3019_v5 = vshll.u32 %v2979_v41, 8 }
 0x140   :  { %v3014_v63 = vsel %vm3004_vm13, %v3011_v43, %v3013_v38  ;;  %v1622_v4 = vand.u32 2139095040, %v5788_v1  ;;  %v2842_v11 = vor.u32 4788187, %v2841_v15  ;;  %v1482_v30 = vsel %vm4089_vm10, 0, %v4088_v28 }
 0x141   :  { %v5807_v25 = vsub.s32 %v1783_v34, %v1786_v59  ;;  %v3017_v29 = vsel %vm3005_vm8, %v2999_v48, %v3016_v52  ;;  %v3008_v23 = vsel %vm3006_vm1, %v2996_v32, 2102212464  ;;  %vm1517_vm6 = vcmp.lt.s32.totalorder %v5175_v55, 0 }
 0x142   :  { %v3018_v18 = vsel %vm3004_vm13, %v3015_v31, %v3017_v29  ;;  %v5815_v43 = vmul.u32.u64.low %v3019_v5, %v3014_v63  ;;  %v5816_v45 = vmul.u32.u64.high %v3019_v5, %v3014_v63, %v5815_v43  ;;  %vm4137_vm11 = vcmp.lt.s32.totalorder %v4136_v22, 0 }
 0x143   :  { %v2987_v41 = vshrl.u32 %v9344_v49, %v5748_v46  ;;  %v5822_v36 = vmul.u32.u64.low %v3019_v5, %v3018_v18  ;;  %v5823_v28 = vmul.u32.u64.high %v3019_v5, %v3018_v18, %v5822_v36  ;;  %v2374_v34 = vshrl.u32 %v9277_v9, %v5733_v61 }
 0x144   :  { %v1483_v32 = vsub.s32 32, %v1482_v30  ;;  %v1487_v48 = vsub.s32 4294967266, %v1482_v30  ;;  %v1623_v15 = vshrl.u32 %v1622_v4, 23  ;;  %v2838_v59 = vor.u32 %v2837_v26, %v2836_v8 }
 0x145   :  { %v1789_v38 = vsub.s32 0, %v5807_v25  ;;  %v3007_v31 = vsel %vm3003_vm9, %v2987_v41, %v2990_v6  ;;  %v3009_v63 = vsel %vm3005_vm8, %v2993_v20, %v3008_v23  ;;  %v9381_v46 = vand.u32 2147483647, %v5175_v55 }
 0x146   :  { %v1467_v29 = vadd.s32 %v5545_v27, %v5553_v14  ;;  %v5840_v18 = vsel %vm4137_vm11, 0, %v4136_v22  ;;  %v3029_v8 = vadd.s32 1, %v5816_v45  ;;  %v4094_v26 = vadd.s32 4294967169, %v1623_v15 }
 0x147   :  { %vm5834_vm1 = vcmp.le.f32.partialorder %v9381_v46, 0.7853982  ;;  %v5845_v6 = vshrl.u32 %v9278_v21, %v5733_v61  ;;  %v1599_v20 = vxor.u32 2147483648, %v5750_v16  ;;  %v2843_v4 = vand.u32 2147483647, %v2842_v11 }
 0x148   :  { %vm3028_vm9 = vc.u32 %v5823_v28, %v5815_v43  ;;  %v1485_v23 = vshrl.u32 %v1467_v29, %v1483_v32  ;;  %v1488_v41 = vadd.s32 127, %v1487_v48  ;;  %v3010_v27 = vsel %vm3004_vm13, %v3007_v31, %v3009_v63 }
 0x149   :  { %v1629_v14 = vadd.s32 1, %v4094_v26  ;;  %v2845_v22 = vcvt.s32.f32 %v2838_v59  ;;  %v2735_v36 = vsub.s32 4294967266, %v5840_v18  ;;  %v4099_v15 = vmin.u32 %v1789_v38, %v5807_v25 }
 0x14a   :  { %v5855_v46 = vor.u32 %v2374_v34, %v5738_v47  ;;  %v1484_v61 = vshll.u32 %v5708_v50, %v1482_v30  ;;  %v3030_v11 = vsel %vm3028_vm9, %v3029_v8, %v5816_v45  ;;  %v9137_v57 = vmov 0.0|0.0  }
 0x14b   :  { %vm1630_vm11 = vcmp.gt.s32.totalorder %v1629_v14, 0  ;;  %4150 = vmatprep.subr.bf16.mxu1 %v9137_v57  ;;  %4276 = vmatprep.subr.bf16.mxu0 %v9137_v57  ;;  %vm9143_vm10 = vcmp.lt.s32.totalorder %v5730_v0, 4  ;;  %v5862_v54 = vmul.f32 %v2845_v22, %v2843_v4  ;;  %v3026_v32 = vmul.u32 %v3019_v5, %v3010_v27 }
 0x14c   :  { %9384 = vst [vmem:[#allocation148_spill] sm:$0xff] %v5855_v46  ;;  %v5866_v48 = vmul.f32 %v4764_v39, %v5776_v2  ;;  %v1600_v50 = vsel %vm1517_vm6, %v1599_v20, %v5750_v16  ;;  %v1486_v47 = vor.u32 %v1485_v23, %v1484_v61  ;;  %v1489_v30 = vshll.u32 %v1488_v41, 23 }
 0x14d   :  { %v1631_v45 = vsel %vm1630_vm11, %v1629_v14, 0  ;;  %v2736_v34 = vadd.s32 127, %v2735_v36  ;;  %v1791_v59 = vclz %v4099_v15  ;;  %v5871_v38 = vadd.s32 %v3030_v11, %v3026_v32 }
 0x14e   :  { %9385 = vst [vmem:[#allocation149_spill] sm:$0xff] %v5866_v48  ;;  %v9136_v31 = vand.u32 2147483647, %v5788_v1  ;;  %v5879_v39 = vsel %vm9143_vm10, %v5855_v46, 920167782  ;;  %v1633_v16 = vand.u32 31, %v1631_v45  ;;  %v5885_v61 = vsel %vm5834_vm1, %v5175_v55, %v1600_v50 }
 0x14f   :  { %9386 = vst [vmem:[#allocation150_spill] sm:$0xff] %v5879_v39  ;;  %v2715_v29 = vadd.s32 %v5631_v3, %v5642_v42  ;;  %v2870_v8 = vand.u32 2139095040, %v5866_v48  ;;  %v1490_v26 = vor.u32 4788187, %v1489_v30  ;;  %v1493_v20 = vcvt.s32.f32 %v1486_v47 }
 0x150   :  { %v2731_v4 = vsub.s32 32, %v5840_v18  ;;  %v1634_v23 = vsub.s32 32, %v1633_v16  ;;  %v2737_v41 = vshll.u32 %v2736_v34, 23  ;;  %v4100_v27 = vadd.s32 4294967294, %v1791_v59 }
 0x151   :  { %v3032_v14 = vadd.s32 536870912, %v5871_v38  ;;  %v1626_v22 = vand.u32 8388607, %v9136_v31  ;;  %v1636_v36 = vshll.u32 %v9344_v49, %v1633_v16  ;;  %v1639_v3 = vshll.u32 %v9345_v56, %v1633_v16 }
 0x152   :  { %v1637_v15 = vshrl.u32 %v9345_v56, %v1634_v23  ;;  %v1640_v42 = vshrl.u32 %v9346_v33, %v1634_v23  ;;  %v5899_v11 = vshrl.u32 %v1631_v45, 5  ;;  %v1642_v32 = vshll.u32 %v9346_v33, %v1633_v16 }
 0x153   :  { %v1643_v50 = vshrl.u32 %v9273_v10, %v1634_v23  ;;  %v2871_v47 = vshrl.u32 %v2870_v8, 23  ;;  %v1645_v59 = vshll.u32 %v9273_v10, %v1633_v16  ;;  %v1646_v31 = vshrl.u32 %v9277_v9, %v1634_v23 }
 0x154   :  { %v1638_v30 = vor.u32 %v1637_v15, %v1636_v36  ;;  %v1641_v34 = vor.u32 %v1640_v42, %v1639_v3  ;;  %v1491_v57 = vand.u32 2147483647, %v1490_v26  ;;  %v2732_v63 = vshll.u32 %v5719_v40, %v5840_v18 }
 0x155   :  { %vm4101_vm8 = vcmp.lt.s32.totalorder %v4100_v27, 0  ;;  %v5907_v2 = vshrl.u32 %v3032_v14, 30  ;;  %v1644_v45 = vor.u32 %v1643_v50, %v1642_v32  ;;  %v1647_v5 = vor.u32 %v1646_v31, %v1645_v59 }
 0x156   :  { %v1648_v46 = vshll.u32 %v9277_v9, %v1633_v16  ;;  %v1649_v39 = vshrl.u32 %v9278_v21, %v1634_v23  ;;  %v2733_v8 = vshrl.u32 %v2715_v29, %v2731_v4  ;;  %v2738_v36 = vor.u32 4788187, %v2737_v41 }
 0x157   :  { %v1627_v15 = vor.u32 8388608, %v1626_v22  ;;  %vm1651_vm13 = vcmp.lt.s32.totalorder %v5899_v11, 1  ;;  %vm2765_vm9 = vcmp.lt.s32.totalorder %v5228_v51, 0  ;;  %vm1654_vm11 = vcmp.lt.s32.totalorder %v5899_v11, 4 }
 0x158   :  { %v1650_v26 = vor.u32 %v1649_v39, %v1648_v46  ;;  %v1659_v40 = vsel %vm1651_vm13, %v1638_v30, %v1641_v34  ;;  %v4142_v18 = vadd.s32 4294967169, %v2871_v47  ;;  %v5916_v14 = vsel %vm4101_vm8, 0, %v4100_v27 }
 0x159   :  { %v3034_v31 = vshll.u32 %v5907_v2, 30  ;;  %vm1653_vm3 = vcmp.lt.s32.totalorder %v5899_v11, 3  ;;  %v1660_v16 = vsel %vm1654_vm11, %v1647_v5, 920167782  ;;  %v1494_v29 = vmul.f32 %v1493_v20, %v1491_v57 }
 0x15a   :  { %vm1652_vm0 = vcmp.lt.s32.totalorder %v5899_v11, 2  ;;  %v1661_v46 = vsel %vm1653_vm3, %v1644_v45, %v1660_v16  ;;  %v1663_v39 = vsel %vm1651_vm13, %v1641_v34, %v1644_v45  ;;  %v9387_v4 = vand.u32 2147483647, %v5228_v51 }
 0x15b   :  { %v9388_v41 = vmov 0  ;;  %vm1413_vm5 = vcmp.lt.s32.totalorder %v5291_v58, 0  ;;  %v2734_v27 = vor.u32 %v2733_v8, %v2732_v63  ;;  %v2739_v22 = vand.u32 2147483647, %v2738_v36 }
 0x15c   :  { %vm5929_vm8 = vcmp.le.f32.partialorder %v9387_v4, 0.7853982  ;;  %v1662_v57 = vsel %vm1652_vm0, %v1659_v40, %v1661_v46  ;;  %v1664_v20 = vsel %vm1654_vm11, %v1650_v26, 1326507024  ;;  %v1799_v3 = vsub.s32 4294967266, %v5916_v14 }
 0x15d   :  { %v9389_v41 = vsel %vm5929_vm8, 4294967295, %v9388_v41  ;;  %v1665_v42 = vsel %vm1653_vm3, %v1647_v5, %v1664_v20  ;;  %v1667_v32 = vshll.u32 %v1627_v15, 8  ;;  %v2877_v50 = vadd.s32 1, %v4142_v18 }
 0x15e   :  { %9390 = vst [vmem:[#allocation151_spill] sm:$0xff] %v9389_v41  ;;  %v5942_v47 = vsub.s32 %v5871_v38, %v3034_v31  ;;  %v1635_v59 = vshrl.u32 %v9344_v49, %v1634_v23  ;;  %v1656_v63 = vsel %vm1654_vm11, %v1644_v45, 2102212464  ;;  %v1666_v8 = vsel %vm1652_vm0, %v1663_v39, %v1665_v42 }
 0x15f   :  { %v5949_v36 = vmul.u32.u64.low %v1667_v32, %v1666_v8  ;;  %v5950_v26 = vmul.u32.u64.high %v1667_v32, %v1666_v8, %v5949_v36  ;;  %v5952_v40 = vmul.u32.u64.low %v1667_v32, %v1662_v57  ;;  %v5953_v16 = vmul.u32.u64.high %v1667_v32, %v1662_v57, %v5952_v40 }
 0x160   :  { %v9391_v5 = vor.u32 %v5845_v6, %v5744_v62  ;;  %v9393_v23 = vsub.s32 4, %v5397_v60  ;;  %v9394_v15 = vand.u32 2147483647, %v5291_v58  ;;  %v2741_v31 = vcvt.s32.f32 %v2734_v27 }
 0x161   :  { %4549 = vcosq.f32 %v5885_v61  ;;  %v1495_v62 = vxor.u32 2147483648, %v1494_v29  ;;  %v1655_v6 = vsel %vm1651_vm13, %v1635_v59, %v1638_v30  ;;  %v1657_v46 = vsel %vm1653_vm3, %v1641_v34, %v1656_v63 }
 0x162   :  { %v5961_v38 = vsel %vm9143_vm10, %v9391_v5, 1326507024  ;;  %v5968_v45 = vsel %vm1517_vm6, %v9393_v23, %v5397_v60  ;;  %vm5972_vm11 = vcmp.le.f32.partialorder %v9394_v15, 0.7853982  ;;  %v9397_v60 = vxor.u32 2147483648, %v5862_v54 }
 0x163   :  { %9392 = vst [vmem:[#allocation152_spill] sm:$0xff] %v5961_v38  ;;  %vm2661_vm6 = vcmp.lt.s32.totalorder %v5449_v19, 0  ;;  %v2742_v4 = vmul.f32 %v2741_v31, %v2739_v22  ;;  %v1795_v27 = vsub.s32 32, %v5916_v14  ;;  %vm2878_vm10 = vcmp.gt.s32.totalorder %v2877_v50, 0  ;;  %v9411_v38 = vld [vmem:[#allocation51_spill] sm:$0xff] }
 0x164   :  { %v2848_v39 = vsel %vm2765_vm9, %v9397_v60, %v5862_v54  ;;  %v1800_v57 = vadd.s32 127, %v1799_v3  ;;  %v3037_v20 = vsub.s32 0, %v5942_v47  ;;  %vm1676_vm13 = vc.u32 %v5950_v26, %v5952_v40 }
 0x165   :  { %v1677_v30 = vadd.s32 1, %v5953_v16  ;;  %4551 = vsinq.f32 %v5885_v61  ;;  %v2849_v34 = vsub.s32 4, %v5508_v24  ;;  %vm1725_vm3 = vcmp.lt.s32.totalorder %v5604_v35, 0 }
 0x166   :  { %v1658_v54 = vsel %vm1652_vm0, %v1655_v6, %v1657_v46  ;;  %v2851_v22 = vsel %vm5929_vm8, %v5228_v51, %v2848_v39  ;;  %v1496_v3 = vsel %vm1413_vm5, %v1495_v62, %v1494_v29  ;;  %v9398_v42 = vand.u32 2147483647, %v5449_v19 }
 0x167   :  { %v9399_v59 = vmov 0  ;;  %v1779_v61 = vadd.s32 %v5723_v44, %v5728_v13  ;;  %v2879_v63 = vsel %vm2878_vm10, %v2877_v50, 0  ;;  %v2743_v8 = vxor.u32 2147483648, %v2742_v4 }
 0x168   :  { %vm6004_vm12 = vcmp.le.f32.partialorder %v9398_v42, 0.7853982  ;;  %v1809_v11 = vsub.s32 4, %v5783_v53  ;;  %v1678_v36 = vsel %vm1676_vm13, %v1677_v30, %v5953_v16  ;;  %v9145_v5 = vand.u32 2147483647, %v5866_v48 }
 0x169   :  { %v9400_v59 = vsel %vm6004_vm12, 4294967295, %v9399_v59  ;;  %v1797_v23 = vshrl.u32 %v1779_v61, %v1795_v27  ;;  %v1801_v15 = vshll.u32 %v1800_v57, 23  ;;  %v4147_v29 = vmin.u32 %v3037_v20, %v5942_v47 }
 0x16a   :  { %9401 = vst [vmem:[#allocation153_spill] sm:$0xff] %v9400_v59  ;;  %v1674_v31 = vmul.u32 %v1667_v32, %v1658_v54  ;;  %4553 = vcosq.f32 %v2851_v22  ;;  %v1497_v62 = vsub.s32 4, %v5668_v17  ;;  %v2881_v6 = vand.u32 31, %v2879_v63 }
 0x16b   :  { %v9146_v46 = vand.u32 2147483647, %v4794_v7  ;;  %v1499_v13 = vsel %vm5972_vm11, %v5291_v58, %v1496_v3  ;;  %v2745_v44 = vsub.s32 4, %v5697_v12  ;;  %v1796_v50 = vshll.u32 %v5807_v25, %v5916_v14  ;;  %v6038_v27 = vpop.eup %4549 }
 0x16c   :  { %v6022_v16 = vadd.s32 %v1678_v36, %v1674_v31  ;;  %v6027_v32 = vsel %vm2765_vm9, %v2849_v34, %v5508_v24  ;;  %4555 = vsinq.f32 %v2851_v22  ;;  %v6032_v60 = vsel %vm1725_vm3, %v1809_v11, %v5783_v53 }
 0x16d   :  { %9402 = vst [vmem:[#allocation154_spill] sm:$0xff] %v6027_v32  ;;  %v6036_v39 = vand.u32 8388607, %v9145_v5  ;;  %v2744_v25 = vsel %vm2661_vm6, %v2743_v8, %v2742_v4  ;;  %v6042_v14 = vor.u32 %v1797_v23, %v1796_v50  ;;  %v6044_v57 = vor.u32 4788187, %v1801_v15  ;;  %v9407_v8 = vld [vmem:[#allocation48_spill] sm:$0xff] }
 0x16e   :  { %v3039_v24 = vclz %v4147_v29  ;;  %4557 = vcosq.f32 %v1499_v13  ;;  %v9403_v20 = vand.u32 2147483647, %v5604_v35  ;;  %v6052_v30 = vsub.s32 32, %v2881_v6 }
 0x16f   :  { %v170_v34 = vand.u32 8388607, %v9146_v46  ;;  %v6059_v4 = vsel %vm1413_vm5, %v1497_v62, %v5668_v17  ;;  %4559 = vsinq.f32 %v1499_v13  ;;  %v6064_v54 = vsel %vm2661_vm6, %v2745_v44, %v5697_v12  ;;  %v6067_v3 = vpop.eup %4551  ;;  %v9408_v13 = vld [vmem:[#allocation41_spill] sm:$0xff] }
 0x170   :  { %vm6048_vm0 = vcmp.le.f32.partialorder %v9403_v20, 0.7853982  ;;  %9406 = vst [vmem:[#allocation155_spill] sm:$0xff] %v6064_v54  ;;  %v1680_v22 = vadd.s32 536870912, %v6022_v16  ;;  %v6072_v42 = vsel %vm6004_vm12, %v5449_v19, %v2744_v25  ;;  %v181_v11 = vshrl.u32 %v9345_v56, %v9407_v8 }
 0x171   :  { %v1803_v12 = vand.u32 2147483647, %v6044_v57  ;;  %v1805_v36 = vcvt.s32.f32 %v6042_v14  ;;  %v6082_v23 = vadd.s32 4294967294, %v3039_v24  ;;  %v6084_v15 = vshrl.u32 %v2879_v63, 5 }
 0x172   :  { %v2885_v29 = vshrl.u32 %v9345_v56, %v6052_v30  ;;  %v171_v31 = vor.u32 8388608, %v170_v34  ;;  %v179_v62 = vshrl.u32 %v9344_v49, %v9407_v8  ;;  %v180_v44 = vshll.u32 %v9344_v49, %v9408_v13 }
 0x173   :  { %v6092_v50 = vshrl.u32 %v1680_v22, 30  ;;  %v2884_v25 = vshll.u32 %v9344_v49, %v2881_v6  ;;  %v2888_v14 = vshrl.u32 %v9346_v33, %v6052_v30  ;;  %v2894_v63 = vshrl.u32 %v9277_v9, %v6052_v30 }
 0x174   :  { %v6099_v57 = vpop.eup %4553  ;;  %v2891_v24 = vshrl.u32 %v9273_v10, %v6052_v30  ;;  %v2893_v20 = vshll.u32 %v9273_v10, %v2881_v6  ;;  %v2897_v34 = vshrl.u32 %v9278_v21, %v6052_v30  ;;  %v182_v22 = vor.u32 %v181_v11, %v180_v44 }
 0x175   :  { %9409 = vst [vmem:[#allocation48_spill] sm:$0xff] %v6099_v57  ;;  %vm4149_vm5 = vcmp.lt.s32.totalorder %v6082_v23, 0  ;;  %v183_v5 = vshll.u32 %v9345_v56, %v9408_v13  ;;  %v184_v46 = vshrl.u32 %v9346_v33, %v9407_v8  ;;  %v186_v61 = vshll.u32 %v9346_v33, %v9408_v13 }
 0x176   :  { %v187_v17 = vshrl.u32 %v9273_v10, %v9407_v8  ;;  %v6115_v51 = vpop.eup %4555  ;;  %v6117_v19 = vor.u32 %v2885_v29, %v2884_v25  ;;  %v2887_v21 = vshll.u32 %v9345_v56, %v2881_v6  ;;  %v2890_v11 = vshll.u32 %v9346_v33, %v2881_v6 }
 0x177   :  { %9410 = vst [vmem:[#allocation41_spill] sm:$0xff] %v6115_v51  ;;  %v2896_v44 = vshll.u32 %v9277_v9, %v2881_v6  ;;  %v1682_v57 = vshll.u32 %v6092_v50, 30  ;;  %v2895_v41 = vor.u32 %v2894_v63, %v2893_v20  ;;  %v185_v32 = vor.u32 %v184_v46, %v183_v5  ;;  %v9412_v5 = vld [vmem:[#allocation70_spill] sm:$0xff] }
 0x178   :  { %v188_v59 = vor.u32 %v187_v17, %v186_v61  ;;  %v6123_v54 = vpop.eup %4557  ;;  %v6125_v13 = vor.u32 %v2888_v14, %v2887_v21  ;;  %vm195_vm10 = vcmp.lt.s32.totalorder %v9411_v38, 1  ;;  %vm197_vm9 = vcmp.lt.s32.totalorder %v9411_v38, 3  ;;  %v9413_v61 = vld [vmem:[#allocation71_spill] sm:$0xff] }
 0x179   :  { %v2898_v8 = vor.u32 %v2897_v34, %v2896_v44  ;;  %v6129_v29 = vpop.eup %4559  ;;  %v6131_v25 = vor.u32 %v2891_v24, %v2890_v11  ;;  %vm196_vm6 = vcmp.lt.s32.totalorder %v9411_v38, 2  ;;  %v203_v9 = vsel %vm195_vm10, %v182_v22, %v185_v32  ;;  %v9414_v14 = vld [vmem:[#allocation59_spill] sm:$0xff] }
 0x17a   :  { %v205_v6 = vsel %vm197_vm9, %v188_v59, %v9412_v5  ;;  %vm2902_vm13 = vcmp.lt.s32.totalorder %v6084_v15, 4  ;;  %v200_v46 = vsel %vm198_vm14, %v188_v59, 2102212464  ;;  %v209_v63 = vsel %vm197_vm9, %v9414_v14, %v9413_v61 }
 0x17b   :  { %v206_v17 = vsel %vm196_vm6, %v203_v9, %v205_v6  ;;  %v6149_v24 = vsub.s32 %v6022_v16, %v1682_v57  ;;  %v2908_v20 = vsel %vm2902_vm13, %v2895_v41, 920167782  ;;  %v207_v34 = vsel %vm195_vm10, %v185_v32, %v188_v59 }
 0x17c   :  { %v211_v21 = vshll.u32 %v171_v31, 8  ;;  %vm9177_vm14 = vcmp.lt.s32.totalorder %v5646_v37, 0  ;;  %vm2899_vm2 = vcmp.lt.s32.totalorder %v6084_v15, 1  ;;  %vm2901_vm15 = vcmp.lt.s32.totalorder %v6084_v15, 3 }
 0x17d   :  { %v2912_v11 = vsel %vm2902_vm13, %v2898_v8, 1326507024  ;;  %v199_v16 = vsel %vm195_vm10, %v179_v62, %v182_v22  ;;  %v201_v57 = vsel %vm197_vm9, %v185_v32, %v200_v46  ;;  %v210_v44 = vsel %vm196_vm6, %v207_v34, %v209_v63 }
 0x17e   :  { %v6166_v59 = vmul.u32.u64.low %v211_v21, %v206_v17  ;;  %v6167_v31 = vmul.u32.u64.high %v211_v21, %v206_v17, %v6166_v59  ;;  %v1806_v9 = vmul.f32 %v1805_v36, %v1803_v12  ;;  %v2907_v5 = vsel %vm2899_vm2, %v6117_v19, %v6125_v13 }
 0x17f   :  { %v2909_v62 = vsel %vm2901_vm15, %v6131_v25, %v2908_v20  ;;  %v2911_v32 = vsel %vm2899_vm2, %v6125_v13, %v6131_v25  ;;  %v1685_v22 = vsub.s32 0, %v6149_v24  ;;  %v2913_v8 = vsel %vm2901_vm15, %v2895_v41, %v2912_v11 }
 0x180   :  { %v6184_v12 = vmul.u32.u64.low %v211_v21, %v210_v44  ;;  %v6185_v36 = vmul.u32.u64.high %v211_v21, %v210_v44, %v6184_v12  ;;  %v9415_v6 = vsel %vm6048_vm0, 0, %v6032_v60  ;;  %v9416_v17 = vand.u32 2147483647, %v5646_v37 }
 0x181   :  { %v6191_v46 = vadd.s32 3, %v9415_v6  ;;  %v9417_v61 = vmov 0  ;;  %v6202_v14 = vsel %vm4149_vm5, 0, %v6082_v23  ;;  %vm2900_vm9 = vcmp.lt.s32.totalorder %v6084_v15, 2 }
 0x182   :  { %vm6195_vm10 = vcmp.le.f32.partialorder %v9416_v17, 0.7853982  ;;  %v202_v41 = vsel %vm196_vm6, %v199_v16, %v201_v57  ;;  %4561 = vcosq.f32 %v6072_v42  ;;  %v3057_v60 = vsub.s32 4, %v5907_v2  ;;  %v9425_v17 = vld [vmem:[#allocation121_spill] sm:$0xff] }
 0x183   :  { %v9418_v61 = vsel %vm6195_vm10, 4294967295, %v9417_v61  ;;  %v2910_v63 = vsel %vm2900_vm9, %v2907_v5, %v2909_v62  ;;  %v221_v20 = vadd.s32 1, %v6167_v31  ;;  %4563 = vsinq.f32 %v6072_v42 }
 0x184   :  { %9419 = vst [vmem:[#allocation51_spill] sm:$0xff] %v9418_v61  ;;  %v1807_v34 = vxor.u32 2147483648, %v1806_v9  ;;  %v2914_v23 = vsel %vm2900_vm9, %v2911_v32, %v2913_v8  ;;  %v9420_v11 = vor.u32 8388608, %v6036_v39  ;;  %v3047_v38 = vsub.s32 4294967266, %v6202_v14  ;;  %v9422_v32 = vld [vmem:[#allocation81_spill] sm:$0xff] }
 0x185   :  { %v4095_v16 = vmin.u32 %v1685_v22, %v6149_v24  ;;  %v218_v57 = vmul.u32 %v211_v21, %v202_v41  ;;  %vm220_vm5 = vc.u32 %v6185_v36, %v6166_v59  ;;  %v9154_v8 = vand.u32 2147483647, %v9422_v32 }
 0x186   :  { %v6217_v44 = vshll.u32 %v9420_v11, 8  ;;  %v222_v42 = vsel %vm220_vm5, %v221_v20, %v6167_v31  ;;  %v6233_v39 = vsel %vm9177_vm14, %v3057_v60, %v5907_v2  ;;  %v1808_v6 = vsel %vm1725_vm3, %v1807_v34, %v1806_v9 }
 0x187   :  { %9423 = vst [vmem:[#allocation71_spill] sm:$0xff] %v6233_v39  ;;  %v223_v12 = vadd.s32 %v222_v42, %v218_v57  ;;  %v285_v41 = vshrl.u32 %v9345_v56, %v9425_v17  ;;  %v288_v31 = vshrl.u32 %v9346_v33, %v9425_v17  ;;  %v3043_v2 = vsub.s32 32, %v6202_v14  ;;  %v9426_v57 = vld [vmem:[#allocation117_spill] sm:$0xff] }
 0x188   :  { %v6224_v5 = vmul.u32.u64.low %v6217_v44, %v2910_v63  ;;  %v6225_v62 = vmul.u32.u64.high %v6217_v44, %v2910_v63, %v6224_v5  ;;  %v6236_v22 = vmul.u32.u64.low %v6217_v44, %v2914_v23  ;;  %v6237_v21 = vmul.u32.u64.high %v6217_v44, %v2914_v23, %v6236_v22 }
 0x189   :  { %v291_v63 = vshrl.u32 %v9273_v10, %v9425_v17  ;;  %v3048_v60 = vadd.s32 127, %v3047_v38  ;;  %v1687_v20 = vclz %v4095_v16  ;;  %v224_v11 = vadd.s32 536870912, %v223_v12 }
 0x18a   :  { %9421 = vst [vmem:[#allocation70_spill] sm:$0xff] %v6224_v5  ;;  %9424 = vst [vmem:[#allocation59_spill] sm:$0xff] %v6237_v21  ;;  %v274_v23 = vand.u32 8388607, %v9154_v8  ;;  %v284_v9 = vshll.u32 %v9344_v49, %v9426_v57  ;;  %v287_v34 = vshll.u32 %v9345_v56, %v9426_v57  ;;  %v290_v42 = vshll.u32 %v9346_v33, %v9426_v57 }
 0x18b   :  { %v3027_v22 = vadd.s32 %v5815_v43, %v5823_v28  ;;  %v2883_v16 = vshrl.u32 %v9344_v49, %v6052_v30  ;;  %v6263_v8 = vshrl.u32 %v224_v11, 30  ;;  %v2904_v51 = vsel %vm2902_vm13, %v6131_v25, 2102212464 }
 0x18c   :  { %v286_v0 = vor.u32 %v285_v41, %v284_v9  ;;  %v289_v48 = vor.u32 %v288_v31, %v287_v34  ;;  %v292_v37 = vor.u32 %v291_v63, %v290_v42  ;;  %v6268_v57 = vpop.eup %4561  ;;  %v1811_v43 = vsel %vm6048_vm0, %v5604_v35, %v1808_v6  ;;  %v9429_v31 = vld [vmem:[#allocation120_spill] sm:$0xff] }
 0x18d   :  { %9427 = vst [vmem:[#allocation81_spill] sm:$0xff] %v6268_v57  ;;  %v3044_v28 = vshll.u32 %v5942_v47, %v6202_v14  ;;  %v3045_v38 = vshrl.u32 %v3027_v22, %v3043_v2  ;;  %v226_v30 = vshll.u32 %v6263_v8, 30  ;;  %v6276_v11 = vpop.eup %4563  ;;  %v3049_v39 = vshll.u32 %v3048_v60, 23  ;;  %v9432_v2 = vld [vmem:[#allocation125_spill] sm:$0xff] }
 0x18e   :  { %9428 = vst [vmem:[#allocation121_spill] sm:$0xff] %v6276_v11  ;;  %v4096_v61 = vadd.s32 4294967294, %v1687_v20  ;;  %v2903_v25 = vsel %vm2899_vm2, %v2883_v16, %v6117_v19  ;;  %v275_v41 = vor.u32 8388608, %v274_v23  ;;  %v2905_v53 = vsel %vm2901_vm15, %v6125_v13, %v2904_v51  ;;  %v9430_v19 = vld [vmem:[#allocation132_spill] sm:$0xff] }
 0x18f   :  { %v6284_v6 = vsub.s32 %v223_v12, %v226_v30  ;;  %vm299_vm3 = vcmp.lt.s32.totalorder %v9429_v31, 1  ;;  %vm301_vm0 = vcmp.lt.s32.totalorder %v9429_v31, 3  ;;  %vm2924_vm6 = vc.u32 %v6237_v21, %v6224_v5  ;;  %v9431_v12 = vld [vmem:[#allocation133_spill] sm:$0xff] }
 0x190   :  { %v2925_v47 = vadd.s32 1, %v6225_v62  ;;  %v307_v14 = vsel %vm299_vm3, %v286_v0, %v289_v48  ;;  %v309_v63 = vsel %vm301_vm0, %v292_v37, %v9430_v19  ;;  %vm300_vm2 = vcmp.lt.s32.totalorder %v9429_v31, 2  ;;  %v9437_v31 = vld [vmem:[#allocation16_spill] sm:$0xff] }
 0x191   :  { %v229_v51 = vsub.s32 0, %v6284_v6  ;;  %v311_v13 = vsel %vm299_vm3, %v289_v48, %v292_v37  ;;  %v313_v60 = vsel %vm301_vm0, %v9432_v2, %v9431_v12  ;;  %vm4097_vm15 = vcmp.lt.s32.totalorder %v4096_v61, 0 }
 0x192   :  { %v304_v20 = vsel %vm302_vm7, %v292_v37, 2102212464  ;;  %v314_v23 = vsel %vm300_vm2, %v311_v13, %v313_v60  ;;  %v315_v9 = vshll.u32 %v275_v41, 8  ;;  %v2906_v34 = vsel %vm2900_vm9, %v2903_v25, %v2905_v53  ;;  %v9438_v60 = vld [vmem:[#allocation19_spill] sm:$0xff] }
 0x193   :  { %v4039_v42 = vmin.u32 %v229_v51, %v6284_v6  ;;  %v283_v22 = vshrl.u32 %v9344_v49, %v9425_v17  ;;  %v310_v16 = vsel %vm300_vm2, %v307_v14, %v309_v63  ;;  %v6315_v30 = vor.u32 %v3045_v38, %v3044_v28 }
 0x194   :  { %v2926_v37 = vsel %vm2924_vm6, %v2925_v47, %v6225_v62  ;;  %v6321_v19 = vmul.u32.u64.low %v315_v9, %v314_v23  ;;  %v6322_v41 = vmul.u32.u64.high %v315_v9, %v314_v23, %v6321_v19  ;;  %v6324_v15 = vsel %vm4097_vm15, 0, %v4096_v61 }
 0x195   :  { %v231_v25 = vclz %v4039_v42  ;;  %v303_v53 = vsel %vm299_vm3, %v283_v22, %v286_v0  ;;  %v305_v17 = vsel %vm301_vm0, %v289_v48, %v304_v20  ;;  %4565 = vcosq.f32 %v1811_v43 }
 0x196   :  { %v2922_v38 = vmul.u32 %v6217_v44, %v2906_v34  ;;  %vm165_vm7 = vcmp.lt.s32.totalorder %v4794_v7, 0  ;;  %v6332_v28 = vmul.u32.u64.low %v315_v9, %v310_v16  ;;  %v6333_v14 = vmul.u32.u64.high %v315_v9, %v310_v16, %v6332_v28 }
 0x197   :  { %4567 = vsinq.f32 %v1811_v43  ;;  %v6336_v62 = vor.u32 4788187, %v3049_v39  ;;  %v6340_v61 = vadd.s32 %v5952_v40, %v5950_v26  ;;  %v4040_v0 = vadd.s32 4294967294, %v231_v25  ;;  %v9436_v40 = vld [vmem:[#allocation12_spill] sm:$0xff]  ;;  %v9450_v43 = vld [vmem:[#allocation33_spill] sm:$0xff] }
 0x198   :  { %v6344_v63 = vadd.s32 %v2926_v37, %v2922_v38  ;;  %v306_v44 = vsel %vm300_vm2, %v303_v53, %v305_v17  ;;  %v9433_v51 = vand.u32 2147483647, %v4794_v7  ;;  %v219_v26 = vadd.s32 %v6166_v59, %v6185_v36 }
 0x199   :  { %vm4041_vm9 = vcmp.lt.s32.totalorder %v4040_v0, 0  ;;  %vm324_vm5 = vc.u32 %v6322_v41, %v6332_v28  ;;  %v9165_v39 = vand.u32 2147483647, %v9436_v40  ;;  %v325_v12 = vadd.s32 1, %v6333_v14 }
 0x19a   :  { %vm6350_vm13 = vcmp.le.f32.partialorder %v9433_v51, 0.7853982  ;;  %v234_v13 = vsel %vm4041_vm9, 0, %v4040_v0  ;;  %v388_v2 = vshll.u32 %v9344_v49, %v9437_v31  ;;  %v389_v20 = vshrl.u32 %v9345_v56, %v9438_v60 }
 0x19b   :  { %v235_v23 = vsub.s32 32, %v234_v13  ;;  %v239_v34 = vsub.s32 4294967266, %v234_v13  ;;  %v249_v42 = vsub.s32 4, %v6263_v8  ;;  %v322_v59 = vmul.u32 %v315_v9, %v306_v44 }
 0x19c   :  { %v236_v36 = vshll.u32 %v6284_v6, %v234_v13  ;;  %v326_v22 = vsel %vm324_vm5, %v325_v12, %v6333_v14  ;;  %v391_v16 = vshll.u32 %v9345_v56, %v9437_v31  ;;  %v392_v37 = vshrl.u32 %v9346_v33, %v9438_v60 }
 0x19d   :  { %v237_v19 = vshrl.u32 %v219_v26, %v235_v23  ;;  %v240_v25 = vadd.s32 127, %v239_v34  ;;  %v327_v53 = vadd.s32 %v326_v22, %v322_v59  ;;  %v394_v17 = vshll.u32 %v9346_v33, %v9437_v31 }
 0x19e   :  { %v378_v38 = vand.u32 8388607, %v9165_v39  ;;  %v390_v9 = vor.u32 %v389_v20, %v388_v2  ;;  %v393_v0 = vor.u32 %v392_v37, %v391_v16  ;;  %v395_v6 = vshrl.u32 %v9273_v10, %v9438_v60  ;;  %v9442_v16 = vld [vmem:[#allocation36_spill] sm:$0xff] }
 0x19f   :  { %v238_v14 = vor.u32 %v237_v19, %v236_v36  ;;  %v241_v44 = vshll.u32 %v240_v25, 23  ;;  %v250_v51 = vsel %vm165_vm7, %v249_v42, %v6263_v8  ;;  %v328_v26 = vadd.s32 536870912, %v327_v53  ;;  %v6380_v13 = vpop.eup %4565  ;;  %v9441_v36 = vld [vmem:[#allocation22_spill] sm:$0xff] }
 0x1a0   :  { %9439 = vst [vmem:[#allocation117_spill] sm:$0xff] %v6380_v13  ;;  %v1695_v31 = vsub.s32 4294967266, %v6324_v15  ;;  %v2928_v2 = vadd.s32 536870912, %v6344_v63  ;;  %v396_v20 = vor.u32 %v395_v6, %v394_v17  ;;  %vm403_vm3 = vcmp.lt.s32.totalorder %v9441_v36, 1 }
 0x1a1   :  { %v6386_v23 = vpop.eup %4567  ;;  %v242_v34 = vor.u32 4788187, %v241_v44  ;;  %v329_v59 = vshrl.u32 %v328_v26, 30  ;;  %vm405_vm0 = vcmp.lt.s32.totalorder %v9441_v36, 3  ;;  %v252_v8 = vsel %vm6350_vm13, 0, %v250_v51  ;;  %v9443_v51 = vld [vmem:[#allocation37_spill] sm:$0xff] }
 0x1a2   :  { %9440 = vst [vmem:[#allocation120_spill] sm:$0xff] %v6386_v23  ;;  %v379_v42 = vor.u32 8388608, %v378_v38  ;;  %v411_v22 = vsel %vm403_vm3, %v390_v9, %v393_v0  ;;  %v413_v37 = vsel %vm405_vm0, %v396_v20, %v9442_v16  ;;  %v245_v25 = vcvt.s32.f32 %v238_v14  ;;  %v9444_v26 = vld [vmem:[#allocation31_spill] sm:$0xff] }
 0x1a3   :  { %v243_v19 = vand.u32 2147483647, %v242_v34  ;;  %v330_v17 = vshll.u32 %v329_v59, 30  ;;  %v387_v6 = vshrl.u32 %v9344_v49, %v9438_v60  ;;  %vm404_vm6 = vcmp.lt.s32.totalorder %v9441_v36, 2  ;;  %v9451_v36 = vld [vmem:[#allocation79_spill] sm:$0xff] }
 0x1a4   :  { %v408_v44 = vsel %vm406_vm4, %v396_v20, 2102212464  ;;  %v415_v38 = vsel %vm403_vm3, %v393_v0, %v396_v20  ;;  %v417_v47 = vsel %vm405_vm0, %v9444_v26, %v9443_v51  ;;  %v414_v14 = vsel %vm404_vm6, %v411_v22, %v413_v37 }
 0x1a5   :  { %v246_v16 = vmul.f32 %v245_v25, %v243_v19  ;;  %v6408_v34 = vsub.s32 %v327_v53, %v330_v17  ;;  %v418_v60 = vsel %vm404_vm6, %v415_v38, %v417_v47  ;;  %v6414_v12 = vadd.s32 127, %v1695_v31 }
 0x1a6   :  { %v6416_v39 = vshrl.u32 %v2928_v2, 30  ;;  %v256_v48 = vadd.s32 3, %v252_v8  ;;  %v419_v20 = vshll.u32 %v379_v42, 8  ;;  %v407_v19 = vsel %vm403_vm3, %v387_v6, %v390_v9 }
 0x1a7   :  { %v247_v57 = vxor.u32 2147483648, %v246_v16  ;;  %v333_v11 = vsub.s32 0, %v6408_v34  ;;  %v409_v53 = vsel %vm405_vm0, %v393_v0, %v408_v44  ;;  %v9446_v31 = vsub.s32 32, %v6324_v15 }
 0x1a8   :  { %9445 = vst [vmem:[#allocation132_spill] sm:$0xff] %v6416_v39  ;;  %v6423_v25 = vmul.u32.u64.low %v419_v20, %v418_v60  ;;  %v6424_v22 = vmul.u32.u64.high %v419_v20, %v418_v60, %v6423_v25  ;;  %v6426_v37 = vmul.u32.u64.low %v419_v20, %v414_v14  ;;  %v6427_v47 = vmul.u32.u64.high %v419_v20, %v414_v14, %v6426_v37 }
 0x1a9   :  { %v6433_v2 = vshrl.u32 %v6340_v61, %v9446_v31  ;;  %v248_v8 = vsel %vm165_vm7, %v247_v57, %v246_v16  ;;  %v4043_v9 = vmin.u32 %v333_v11, %v6408_v34  ;;  %v353_v42 = vsub.s32 4, %v329_v59 }
 0x1aa   :  { %v251_v6 = vsel %vm6350_vm13, %v4794_v7, %v248_v8  ;;  %vm269_vm4 = vcmp.lt.s32.totalorder %v9422_v32, 0  ;;  %v9447_v61 = vand.u32 2147483647, %v9422_v32  ;;  %v410_v11 = vsel %vm404_vm6, %v407_v19, %v409_v53 }
 0x1ab   :  { %4569 = vcosq.f32 %v251_v6  ;;  %v335_v57 = vclz %v4043_v9  ;;  %v257_v38 = vand.u32 3, %v256_v48  ;;  %vm428_vm15 = vc.u32 %v6424_v22, %v6426_v37  ;;  %v9452_v48 = vld [vmem:[#allocation69_spill] sm:$0xff] }
 0x1ac   :  { %vm6446_vm2 = vcmp.le.f32.partialorder %v9447_v61, 0.7853982  ;;  %4571 = vsinq.f32 %v251_v6  ;;  %v9168_v51 = vand.u32 2147483647, %v9450_v43  ;;  %v323_v26 = vadd.s32 %v6332_v28, %v6322_v41 }
 0x1ad   :  { %v4044_v16 = vadd.s32 4294967294, %v335_v57  ;;  %v6459_v14 = vsel %vm269_vm4, %v353_v42, %v329_v59  ;;  %v429_v60 = vadd.s32 1, %v6427_v47  ;;  %v426_v25 = vmul.u32 %v419_v20, %v410_v11 }
 0x1ae   :  { %v493_v19 = vshrl.u32 %v9345_v56, %v9451_v36  ;;  %v495_v53 = vshll.u32 %v9345_v56, %v9452_v48  ;;  %v496_v31 = vshrl.u32 %v9346_v33, %v9451_v36  ;;  %v498_v28 = vshll.u32 %v9346_v33, %v9452_v48 }
 0x1af   :  { %vm4045_vm7 = vcmp.lt.s32.totalorder %v4044_v16, 0  ;;  %v430_v41 = vsel %vm428_vm15, %v429_v60, %v6427_v47  ;;  %v499_v59 = vshrl.u32 %v9273_v10, %v9451_v36  ;;  %v482_v9 = vand.u32 8388607, %v9168_v51 }
 0x1b0   :  { %v338_v8 = vsel %vm4045_vm7, 0, %v4044_v16  ;;  %v431_v20 = vadd.s32 %v430_v41, %v426_v25  ;;  %v492_v42 = vshll.u32 %v9344_v49, %v9452_v48  ;;  %vm258_vm13 = vcmp.lt.s32.totalorder %v257_v38, 2 }
 0x1b1   :  { %v339_v6 = vsub.s32 32, %v338_v8  ;;  %v343_v61 = vsub.s32 4294967266, %v338_v8  ;;  %v497_v57 = vor.u32 %v496_v31, %v495_v53  ;;  %v500_v11 = vor.u32 %v499_v59, %v498_v28  ;;  %v9453_v31 = vld [vmem:[#allocation87_spill] sm:$0xff] }
 0x1b2   :  { %vm255_vm9 = vweird.f32 %v4794_v7  ;;  %vm259_vm5 = vcmp.eq.s32.totalorder %v257_v38, 0  ;;  %vm262_vm3 = vcmp.eq.s32.totalorder %v257_v38, 2  ;;  %v356_v47 = vsel %vm6446_vm2, 0, %v6459_v14 }
 0x1b3   :  { %v432_v16 = vadd.s32 536870912, %v431_v20  ;;  %v340_v60 = vshll.u32 %v6408_v34, %v338_v8  ;;  %v341_v25 = vshrl.u32 %v323_v26, %v339_v6  ;;  %v344_v41 = vadd.s32 127, %v343_v61  ;;  %v9455_v8 = vld [vmem:[#allocation89_spill] sm:$0xff]  ;;  %v9456_v61 = vld [vmem:[#allocation98_spill] sm:$0xff] }
 0x1b4   :  { %v494_v51 = vor.u32 %v493_v19, %v492_v42  ;;  %v483_v17 = vor.u32 8388608, %v482_v9  ;;  %v491_v53 = vshrl.u32 %v9344_v49, %v9451_v36  ;;  %vm507_vm0 = vcmp.lt.s32.totalorder %v9453_v31, 1  ;;  %v9454_v19 = vld [vmem:[#allocation99_spill] sm:$0xff] }
 0x1b5   :  { %v433_v48 = vshrl.u32 %v432_v16, 30  ;;  %v4570_v28 = vpop.eup %4569  ;;  %v342_v59 = vor.u32 %v341_v25, %v340_v60  ;;  %v345_v0 = vshll.u32 %v344_v41, 23  ;;  %vm509_vm6 = vcmp.lt.s32.totalorder %v9453_v31, 3 }
 0x1b6   :  { %v519_v14 = vsel %vm507_vm0, %v497_v57, %v500_v11  ;;  %v4572_v5 = vpop.eup %4571  ;;  %v263_v34 = vxor.u32 2147483648, %v4570_v28  ;;  %vm508_vm15 = vcmp.lt.s32.totalorder %v9453_v31, 2  ;;  %v521_v36 = vsel %vm509_vm6, %v9455_v8, %v9454_v19 }
 0x1b7   :  { %v434_v26 = vshll.u32 %v433_v48, 30  ;;  %v260_v9 = vxor.u32 2147483648, %v4572_v5  ;;  %v346_v42 = vor.u32 4788187, %v345_v0  ;;  %v515_v6 = vsel %vm507_vm0, %v494_v51, %v497_v57 }
 0x1b8   :  { %v517_v16 = vsel %vm509_vm6, %v500_v11, %v9456_v61  ;;  %v264_v60 = vsel %vm262_vm3, %v263_v34, %v4572_v5  ;;  %vm9457_vm7 = vcmp.lt.s32.totalorder %v9453_v31, 4  ;;  %v522_v21 = vsel %vm508_vm15, %v519_v14, %v521_v36 }
 0x1b9   :  { %v6499_v25 = vsub.s32 %v431_v20, %v434_v26  ;;  %v512_v41 = vsel %vm9457_vm7, %v500_v11, 2102212464  ;;  %v261_v19 = vsel %vm259_vm5, %v4570_v28, %v260_v9  ;;  %v347_v0 = vand.u32 2147483647, %v346_v42 }
 0x1ba   :  { %v349_v8 = vcvt.s32.f32 %v342_v59  ;;  %v523_v35 = vshll.u32 %v483_v17, 8  ;;  %v265_v13 = vsel %vm258_vm13, %v261_v19, %v264_v60  ;;  %v457_v61 = vsub.s32 4, %v433_v48 }
 0x1bb   :  { %v437_v23 = vsub.s32 0, %v6499_v25  ;;  %v518_v5 = vsel %vm508_vm15, %v515_v6, %v517_v16  ;;  %v266_v20 = vsel %vm255_vm9, nan, %v265_v13  ;;  %v511_v17 = vsel %vm507_vm0, %v491_v53, %v494_v51  ;;  %v9461_v53 = vld [vmem:[#allocation15_spill] sm:$0xff] }
 0x1bc   :  { %v350_v11 = vmul.f32 %v349_v8, %v347_v0  ;;  %v6512_v34 = vmul.u32.u64.low %v523_v35, %v522_v21  ;;  %v6513_v26 = vmul.u32.u64.high %v523_v35, %v522_v21, %v6512_v34  ;;  %v6515_v14 = vmul.f32 %v266_v20, %v266_v20  ;;  %v9463_v20 = vld [vmem:[#allocation55_spill] sm:$0xff] }
 0x1bd   :  { %v4047_v28 = vmin.u32 %v437_v23, %v6499_v25  ;;  %v513_v38 = vsel %vm509_vm6, %v497_v57, %v512_v41  ;;  %v360_v36 = vadd.s32 3, %v356_v47  ;;  %v9458_v21 = vand.u32 2147483647, %v9436_v40 }
 0x1be   :  { %v351_v59 = vxor.u32 2147483648, %v350_v11  ;;  %v6522_v9 = vmul.u32.u64.low %v523_v35, %v518_v5  ;;  %v6523_v42 = vmul.u32.u64.high %v523_v35, %v518_v5, %v6522_v9  ;;  %v9175_v7 = vand.u32 4294901760, %v6515_v14 }
 0x1bf   :  { %vm6529_vm13 = vcmp.le.f32.partialorder %v9458_v21, 0.7853982  ;;  %vm373_vm9 = vcmp.lt.s32.totalorder %v9436_v40, 0  ;;  %v439_v23 = vclz %v4047_v28  ;;  %v514_v47 = vsel %vm508_vm15, %v511_v17, %v513_v38 }
 0x1c0   :  { %v352_v51 = vsel %vm269_vm4, %v351_v59, %v350_v11  ;;  %v458_v57 = vsel %vm373_vm9, %v457_v61, %v433_v48  ;;  %v9174_v6 = vand.u32 2147483647, %v9461_v53  ;;  %v6547_v60 = vsub.f32 %v6515_v14, %v9175_v7 }
 0x1c1   :  { %v355_v16 = vsel %vm6446_vm2, %v9422_v32, %v352_v51  ;;  %v4048_v41 = vadd.s32 4294967294, %v439_v23  ;;  %vm532_vm4 = vc.u32 %v6513_v26, %v6522_v9  ;;  %v6551_v48 = vand.u32 3, %v360_v36 }
 0x1c2   :  { %9462 = vst [vmem:[#allocation133_spill] sm:$0xff] %v6547_v60  ;;  %4573 = vcosq.f32 %v355_v16  ;;  %v427_v31 = vadd.s32 %v6426_v37, %v6424_v22  ;;  %v533_v19 = vadd.s32 1, %v6523_v42  ;;  %v460_v44 = vsel %vm6529_vm13, 0, %v458_v57  ;;  %v9464_v37 = vld [vmem:[#allocation52_spill] sm:$0xff] }
 0x1c3   :  { %4575 = vsinq.f32 %v355_v16  ;;  %vm4049_vm5 = vcmp.lt.s32.totalorder %v4048_v41, 0  ;;  %v530_v0 = vmul.u32 %v523_v35, %v514_v47  ;;  %v586_v5 = vand.u32 8388607, %v9174_v6 }
 0x1c4   :  { %v442_v8 = vsel %vm4049_vm5, 0, %v4048_v41  ;;  %v534_v61 = vsel %vm532_vm4, %v533_v19, %v6523_v42  ;;  %v597_v11 = vshrl.u32 %v9345_v56, %v9463_v20  ;;  %v596_v17 = vshll.u32 %v9344_v49, %v9464_v37 }
 0x1c5   :  { %v443_v34 = vsub.s32 32, %v442_v8  ;;  %v447_v28 = vsub.s32 4294967266, %v442_v8  ;;  %v535_v22 = vadd.s32 %v534_v61, %v530_v0  ;;  %v599_v38 = vshll.u32 %v9345_v56, %v9464_v37 }
 0x1c6   :  { %v600_v35 = vshrl.u32 %v9346_v33, %v9463_v20  ;;  %v602_v59 = vshll.u32 %v9346_v33, %v9464_v37  ;;  %v603_v36 = vshrl.u32 %v9273_v10, %v9463_v20  ;;  %v444_v42 = vshll.u32 %v6499_v25, %v442_v8  ;;  %v9465_v8 = vld [vmem:[#allocation54_spill] sm:$0xff] }
 0x1c7   :  { %v445_v21 = vshrl.u32 %v427_v31, %v443_v34  ;;  %v448_v23 = vadd.s32 127, %v447_v28  ;;  %v536_v51 = vadd.s32 536870912, %v535_v22  ;;  %vm362_vm2 = vcmp.lt.s32.totalorder %v6551_v48, 2 }
 0x1c8   :  { %vm363_vm3 = vcmp.eq.s32.totalorder %v6551_v48, 0  ;;  %v598_v57 = vor.u32 %v597_v11, %v596_v17  ;;  %v601_v47 = vor.u32 %v600_v35, %v599_v38  ;;  %v604_v16 = vor.u32 %v603_v36, %v602_v59  ;;  %v9467_v17 = vld [vmem:[#allocation73_spill] sm:$0xff]  ;;  %v9468_v38 = vld [vmem:[#allocation64_spill] sm:$0xff] }
 0x1c9   :  { %vm359_vm0 = vweird.f32 %v9422_v32  ;;  %vm366_vm6 = vcmp.eq.s32.totalorder %v6551_v48, 2  ;;  %v446_v41 = vor.u32 %v445_v21, %v444_v42  ;;  %v449_v19 = vshll.u32 %v448_v23, 23 }
 0x1ca   :  { %v6578_v0 = vshrl.u32 %v536_v51, 30  ;;  %v464_v61 = vadd.s32 3, %v460_v44  ;;  %v587_v25 = vor.u32 8388608, %v586_v5  ;;  %v595_v31 = vshrl.u32 %v9344_v49, %v9463_v20  ;;  %v9466_v5 = vld [vmem:[#allocation72_spill] sm:$0xff] }
 0x1cb   :  { %vm611_vm15 = vcmp.lt.s32.totalorder %v9465_v8, 1  ;;  %v450_v34 = vor.u32 4788187, %v449_v19  ;;  %vm613_vm7 = vcmp.lt.s32.totalorder %v9465_v8, 3  ;;  %vm612_vm4 = vcmp.lt.s32.totalorder %v9465_v8, 2 }
 0x1cc   :  { %v538_v11 = vshll.u32 %v6578_v0, 30  ;;  %v623_v28 = vsel %vm611_vm15, %v601_v47, %v604_v16  ;;  %v4574_v37 = vpop.eup %4573  ;;  %v619_v44 = vsel %vm611_vm15, %v598_v57, %v601_v47  ;;  %v621_v20 = vsel %vm613_vm7, %v604_v16, %v9466_v5 }
 0x1cd   :  { %v625_v35 = vsel %vm613_vm7, %v9468_v38, %v9467_v17  ;;  %v4576_v59 = vpop.eup %4575  ;;  %v367_v36 = vxor.u32 2147483648, %v4574_v37  ;;  %v451_v42 = vand.u32 2147483647, %v450_v34  ;;  %v453_v21 = vcvt.s32.f32 %v446_v41 }
 0x1ce   :  { %v6597_v23 = vsub.s32 %v535_v22, %v538_v11  ;;  %v364_v51 = vxor.u32 2147483648, %v4576_v59  ;;  %vm9469_vm5 = vcmp.lt.s32.totalorder %v9465_v8, 4  ;;  %v626_v6 = vsel %vm612_vm4, %v623_v28, %v625_v35 }
 0x1cf   :  { %v616_v19 = vsel %vm9469_vm5, %v604_v16, 2102212464  ;;  %v627_v7 = vshll.u32 %v587_v25, 8  ;;  %v368_v5 = vsel %vm366_vm6, %v367_v36, %v4576_v59  ;;  %v454_v60 = vmul.f32 %v453_v21, %v451_v42 }
 0x1d0   :  { %v541_v17 = vsub.s32 0, %v6597_v23  ;;  %v622_v34 = vsel %vm612_vm4, %v619_v44, %v621_v20  ;;  %v365_v22 = vsel %vm363_vm3, %v4574_v37, %v364_v51  ;;  %v615_v41 = vsel %vm611_vm15, %v595_v31, %v598_v57  ;;  %v9473_v51 = vld [vmem:[#allocation95_spill] sm:$0xff] }
 0x1d1   :  { %v6612_v16 = vmul.u32.u64.low %v627_v7, %v626_v6  ;;  %v6613_v11 = vmul.u32.u64.high %v627_v7, %v626_v6, %v6612_v16  ;;  %v369_v25 = vsel %vm362_vm2, %v365_v22, %v368_v5  ;;  %v455_v28 = vxor.u32 2147483648, %v454_v60 }
 0x1d2   :  { %v4051_v38 = vmin.u32 %v541_v17, %v6597_v23  ;;  %v617_v35 = vsel %vm613_vm7, %v601_v47, %v616_v19  ;;  %v9470_v44 = vshll.u32 %v6149_v24, %v6324_v15  ;;  %v370_v57 = vsel %vm359_vm0, nan, %v369_v25 }
 0x1d3   :  { %v6628_v6 = vmul.u32.u64.low %v627_v7, %v622_v34  ;;  %v6629_v31 = vmul.u32.u64.high %v627_v7, %v622_v34, %v6628_v6  ;;  %v9471_v48 = vshll.u32 %v6414_v12, 23  ;;  %v3076_v59 = vmul.f32 %v370_v57, %v370_v57  ;;  %v9481_v57 = vld [vmem:[#allocation123_spill] sm:$0xff] }
 0x1d4   :  { %v6624_v37 = vor.u32 %v6433_v2, %v9470_v44  ;;  %v456_v47 = vsel %vm373_vm9, %v455_v28, %v454_v60  ;;  %v543_v36 = vclz %v4051_v38  ;;  %v9472_v24 = vshll.u32 %v6416_v39, 30 }
 0x1d5   :  { %v6634_v20 = vor.u32 4788187, %v9471_v48  ;;  %v459_v32 = vsel %vm6529_vm13, %v9436_v40, %v456_v47  ;;  %v6646_v2 = vand.u32 3, %v464_v61  ;;  %v618_v12 = vsel %vm612_vm4, %v615_v41, %v617_v35 }
 0x1d6   :  { %v6641_v15 = vsub.s32 %v6344_v63, %v9472_v24  ;;  %v3114_v42 = vand.u32 4294901760, %v3076_v59  ;;  %4577 = vcosq.f32 %v459_v32  ;;  %v4052_v21 = vadd.s32 4294967294, %v543_v36 }
 0x1d7   :  { %vm636_vm9 = vc.u32 %v6613_v11, %v6628_v6  ;;  %4579 = vsinq.f32 %v459_v32  ;;  %v561_v60 = vsub.s32 4, %v6578_v0  ;;  %v637_v63 = vadd.s32 1, %v6629_v31 }
 0x1d8   :  { %v9178_v19 = vand.u32 2147483647, %v9473_v51  ;;  %v9474_v13 = vand.u32 4294901760, %v6515_v14  ;;  %v6659_v5 = vsub.f32 %v3076_v59, %v3114_v42  ;;  %vm4053_vm13 = vcmp.lt.s32.totalorder %v4052_v21, 0  ;;  %v9482_v59 = vld [vmem:[#allocation119_spill] sm:$0xff] }
 0x1d9   :  { %v634_v8 = vmul.u32 %v627_v7, %v618_v12  ;;  %v9477_v17 = vand.u32 2147483647, %v9450_v43  ;;  %vm477_vm3 = vcmp.lt.s32.totalorder %v9450_v43, 0  ;;  %v546_v22 = vsel %vm4053_vm13, 0, %v4052_v21 }
 0x1da   :  { %v6657_v61 = vpack.c.bf16 %v3114_v42, %v9474_v13  ;;  %9476 = vst [vmem:[#allocation12_spill] sm:$0xff] %v6659_v5  ;;  %v638_v41 = vsel %vm636_vm9, %v637_v63, %v6629_v31  ;;  %vm470_vm0 = vcmp.eq.s32.totalorder %v6646_v2, 2  ;;  %v531_v14 = vadd.s32 %v6522_v9, %v6513_v26 }
 0x1db   :  { %vm6663_vm2 = vcmp.le.f32.partialorder %v9477_v17, 0.7853982  ;;  %v547_v7 = vsub.s32 32, %v546_v22  ;;  %v551_v16 = vsub.s32 4294967266, %v546_v22  ;;  %v639_v25 = vadd.s32 %v638_v41, %v634_v8 }
 0x1dc   :  { %9475 = vst [vmem:[#allocation125_spill] sm:$0xff] %v6657_v61  ;;  %4152 = vmatpush1.bf16.msra.mxu1 %v6657_v61  ;;  %4278 = vmatpush1.bf16.msra.mxu0 %v6657_v61  ;;  %v9480_v28 = vmov 0.0|0.0   ;;  %vm467_vm6 = vcmp.eq.s32.totalorder %v6646_v2, 0  ;;  %v548_v38 = vshll.u32 %v6597_v23, %v546_v22  ;;  %v562_v35 = vsel %vm477_vm3, %v561_v60, %v6578_v0  ;;  %v9495_v61 = vld [vmem:[#allocation25_spill] sm:$0xff] }
 0x1dd   :  { %4153 = vmatprep.subr.bf16.mxu1 %v9480_v28  ;;  %4279 = vmatprep.subr.bf16.mxu0 %v9480_v28  ;;  %v690_v44 = vand.u32 8388607, %v9178_v19  ;;  %v701_v26 = vshrl.u32 %v9345_v56, %v9481_v57  ;;  %vm466_vm15 = vcmp.lt.s32.totalorder %v6646_v2, 2  ;;  %v549_v9 = vshrl.u32 %v531_v14, %v547_v7  ;;  %v9483_v7 = vld [vmem:[#allocation122_spill] sm:$0xff] }
 0x1de   :  { %v552_v31 = vadd.s32 127, %v551_v16  ;;  %vm581_vm7 = vcmp.lt.s32.totalorder %v9461_v53, 0  ;;  %v640_v48 = vadd.s32 536870912, %v639_v25  ;;  %v704_v23 = vshrl.u32 %v9346_v33, %v9481_v57 }
 0x1df   :  { %vm463_vm4 = vweird.f32 %v9436_v40  ;;  %v700_v0 = vshll.u32 %v9344_v49, %v9482_v59  ;;  %v703_v47 = vshll.u32 %v9345_v56, %v9482_v59  ;;  %v706_v36 = vshll.u32 %v9346_v33, %v9482_v59 }
 0x1e0   :  { %v707_v24 = vshrl.u32 %v9273_v10, %v9481_v57  ;;  %v550_v32 = vor.u32 %v549_v9, %v548_v38  ;;  %v553_v12 = vshll.u32 %v552_v31, 23  ;;  %v564_v42 = vsel %vm6663_vm2, 0, %v562_v35  ;;  %v4578_v17 = vpop.eup %4577 }
 0x1e1   :  { %v641_v21 = vshrl.u32 %v640_v48, 30  ;;  %v699_v60 = vshrl.u32 %v9344_v49, %v9481_v57  ;;  %v702_v63 = vor.u32 %v701_v26, %v700_v0  ;;  %v705_v13 = vor.u32 %v704_v23, %v703_v47  ;;  %v4580_v16 = vpop.eup %4579 }
 0x1e2   :  { %v708_v8 = vor.u32 %v707_v24, %v706_v36  ;;  %v554_v22 = vor.u32 4788187, %v553_v12  ;;  %v691_v14 = vor.u32 8388608, %v690_v44  ;;  %vm715_vm5 = vcmp.lt.s32.totalorder %v9483_v7, 1 }
 0x1e3   :  { %v642_v41 = vshll.u32 %v641_v21, 30  ;;  %v471_v59 = vxor.u32 2147483648, %v4578_v17  ;;  %v665_v38 = vsub.s32 4, %v641_v21  ;;  %vm716_vm9 = vcmp.lt.s32.totalorder %v9483_v7, 2 }
 0x1e4   :  { %vm717_vm13 = vcmp.lt.s32.totalorder %v9483_v7, 3  ;;  %v468_v35 = vxor.u32 2147483648, %v4580_v16  ;;  %v555_v9 = vand.u32 2147483647, %v554_v22  ;;  %v557_v31 = vcvt.s32.f32 %v550_v32  ;;  %v9487_v22 = vld [vmem:[#allocation127_spill] sm:$0xff] }
 0x1e5   :  { %v6705_v57 = vsub.s32 %v639_v25, %v642_v41  ;;  %v472_v26 = vsel %vm470_vm0, %v471_v59, %v4580_v16  ;;  %v719_v44 = vsel %vm715_vm5, %v699_v60, %v702_v63  ;;  %vm9484_vm14 = vcmp.lt.s32.totalorder %v9483_v7, 4  ;;  %v9485_v25 = vld [vmem:[#allocation135_spill] sm:$0xff] }
 0x1e6   :  { %v720_v48 = vsel %vm9484_vm14, %v708_v8, 2102212464  ;;  %v723_v23 = vsel %vm715_vm5, %v702_v63, %v705_v13  ;;  %v469_v0 = vsel %vm467_vm6, %v4578_v17, %v468_v35  ;;  %v558_v47 = vmul.f32 %v557_v31, %v555_v9  ;;  %v9486_v63 = vld [vmem:[#allocation136_spill] sm:$0xff] }
 0x1e7   :  { %v645_v36 = vsub.s32 0, %v6705_v57  ;;  %v725_v24 = vsel %vm717_vm13, %v708_v8, %v9485_v25  ;;  %v473_v32 = vsel %vm466_vm15, %v469_v0, %v472_v26  ;;  %v666_v12 = vsel %vm581_vm7, %v665_v38, %v641_v21 }
 0x1e8   :  { %v727_v60 = vsel %vm715_vm5, %v705_v13, %v708_v8  ;;  %v729_v17 = vsel %vm717_vm13, %v9487_v22, %v9486_v63  ;;  %v474_v41 = vsel %vm463_vm4, nan, %v473_v32  ;;  %v559_v16 = vxor.u32 2147483648, %v558_v47 }
 0x1e9   :  { %v4055_v59 = vmin.u32 %v645_v36, %v6705_v57  ;;  %v721_v2 = vsel %vm717_vm13, %v705_v13, %v720_v48  ;;  %v568_v35 = vadd.s32 3, %v564_v42  ;;  %v6736_v9 = vmul.f32 %v474_v41, %v474_v41 }
 0x1ea   :  { %v9488_v21 = vand.u32 2147483647, %v9461_v53  ;;  %v730_v38 = vsel %vm716_vm9, %v727_v60, %v729_v17  ;;  %v560_v40 = vsel %vm477_vm3, %v559_v16, %v558_v47  ;;  %v726_v26 = vsel %vm716_vm9, %v723_v23, %v725_v24 }
 0x1eb   :  { %v647_v31 = vclz %v4055_v59  ;;  %v731_v13 = vshll.u32 %v691_v14, 8  ;;  %v563_v42 = vsel %vm6663_vm2, %v9450_v43, %v560_v40  ;;  %v9179_v48 = vand.u32 4294901760, %v6736_v9  ;;  %v9492_v59 = vld [vmem:[#allocation13_spill] sm:$0xff] }
 0x1ec   :  { %vm6740_vm14 = vcmp.le.f32.partialorder %v9488_v21, 0.7853982  ;;  %v722_v36 = vsel %vm716_vm9, %v719_v44, %v721_v2  ;;  %4581 = vcosq.f32 %v563_v42  ;;  %v635_v60 = vadd.s32 %v6628_v6, %v6613_v11 }
 0x1ed   :  { %v668_v0 = vsel %vm6740_vm14, 0, %v666_v12  ;;  %v4056_v25 = vadd.s32 4294967294, %v647_v31  ;;  %v6758_v47 = vmul.u32.u64.low %v731_v13, %v730_v38  ;;  %v6759_v32 = vmul.u32.u64.high %v731_v13, %v730_v38, %v6758_v47  ;;  %v9493_v38 = vld [vmem:[#allocation17_spill] sm:$0xff] }
 0x1ee   :  { %4583 = vsinq.f32 %v563_v42  ;;  %v6764_v14 = vsub.f32 %v6736_v9, %v9179_v48  ;;  %v6766_v34 = vmul.u32.u64.low %v731_v13, %v726_v26  ;;  %v6767_v23 = vmul.u32.u64.high %v731_v13, %v726_v26, %v6766_v34  ;;  %v9494_v26 = vld [vmem:[#allocation21_spill] sm:$0xff] }
 0x1ef   :  { %vm4057_vm2 = vcmp.lt.s32.totalorder %v4056_v25, 0  ;;  %v569_v12 = vand.u32 3, %v568_v35  ;;  %v672_v22 = vadd.s32 3, %v668_v0  ;;  %v738_v16 = vmul.u32 %v731_v13, %v722_v36 }
 0x1f0   :  { %9491 = vst [vmem:[#allocation16_spill] sm:$0xff] %v6764_v14  ;;  %v650_v63 = vsel %vm4057_vm2, 0, %v4056_v25  ;;  %v9180_v2 = vand.u32 2147483647, %v9492_v59  ;;  %vm740_vm3 = vc.u32 %v6759_v32, %v6766_v34  ;;  %v741_v21 = vadd.s32 1, %v6767_v23 }
 0x1f1   :  { %v651_v17 = vsub.s32 32, %v650_v63  ;;  %v655_v41 = vsub.s32 4294967266, %v650_v63  ;;  %v804_v40 = vshll.u32 %v9344_v49, %v9493_v38  ;;  %v807_v35 = vshll.u32 %v9345_v56, %v9493_v38 }
 0x1f2   :  { %v652_v11 = vshll.u32 %v6705_v57, %v650_v63  ;;  %v808_v13 = vshrl.u32 %v9346_v33, %v9494_v26  ;;  %v742_v42 = vsel %vm740_vm3, %v741_v21, %v6767_v23  ;;  %v805_v0 = vshrl.u32 %v9345_v56, %v9494_v26 }
 0x1f3   :  { %v653_v6 = vshrl.u32 %v635_v60, %v651_v17  ;;  %v656_v31 = vadd.s32 127, %v655_v41  ;;  %v810_v36 = vshll.u32 %v9346_v33, %v9493_v38  ;;  %v811_v25 = vshrl.u32 %v9273_v10, %v9494_v26 }
 0x1f4   :  { %vm567_vm0 = vweird.f32 %v9450_v43  ;;  %v743_v60 = vadd.s32 %v742_v42, %v738_v16  ;;  %vm570_vm6 = vcmp.lt.s32.totalorder %v569_v12, 2  ;;  %vm571_vm15 = vcmp.eq.s32.totalorder %v569_v12, 0 }
 0x1f5   :  { %v654_v47 = vor.u32 %v653_v6, %v652_v11  ;;  %v657_v57 = vshll.u32 %v656_v31, 23  ;;  %vm574_vm4 = vcmp.eq.s32.totalorder %v569_v12, 2  ;;  %v794_v23 = vand.u32 8388607, %v9180_v2 }
 0x1f6   :  { %v4582_v63 = vpop.eup %4581  ;;  %v744_v41 = vadd.s32 536870912, %v743_v60  ;;  %v809_v21 = vor.u32 %v808_v13, %v807_v35  ;;  %v812_v19 = vor.u32 %v811_v25, %v810_v36  ;;  %v6796_v7 = vand.u32 3, %v672_v22 }
 0x1f7   :  { %v658_v17 = vor.u32 4788187, %v657_v57  ;;  %v575_v44 = vxor.u32 2147483648, %v4582_v63  ;;  %v803_v11 = vshrl.u32 %v9344_v49, %v9494_v26  ;;  %v806_v6 = vor.u32 %v805_v0, %v804_v40  ;;  %v9498_v0 = vld [vmem:[#allocation32_spill] sm:$0xff] }
 0x1f8   :  { %v4584_v38 = vpop.eup %4583  ;;  %v661_v42 = vcvt.s32.f32 %v654_v47  ;;  %v745_v24 = vshrl.u32 %v744_v41, 30  ;;  %v795_v2 = vor.u32 8388608, %v794_v23  ;;  %vm819_vm5 = vcmp.lt.s32.totalorder %v9495_v61, 1 }
 0x1f9   :  { %v572_v16 = vxor.u32 2147483648, %v4584_v38  ;;  %v659_v31 = vand.u32 2147483647, %v658_v17  ;;  %v576_v48 = vsel %vm574_vm4, %v575_v44, %v4584_v38  ;;  %vm821_vm9 = vcmp.lt.s32.totalorder %v9495_v61, 3  ;;  %v9497_v44 = vld [vmem:[#allocation42_spill] sm:$0xff] }
 0x1fa   :  { %v746_v22 = vshll.u32 %v745_v24, 30  ;;  %v831_v36 = vsel %vm819_vm5, %v809_v21, %v812_v19  ;;  %vm820_vm13 = vcmp.lt.s32.totalorder %v9495_v61, 2  ;;  %vm9496_vm2 = vcmp.lt.s32.totalorder %v9495_v61, 4 }
 0x1fb   :  { %v573_v35 = vsel %vm571_vm15, %v4582_v63, %v572_v16  ;;  %v662_v13 = vmul.f32 %v661_v42, %v659_v31  ;;  %v824_v26 = vsel %vm9496_vm2, %v812_v19, 2102212464  ;;  %v833_v25 = vsel %vm821_vm9, %v9498_v0, %v9497_v44  ;;  %v9499_v63 = vld [vmem:[#allocation38_spill] sm:$0xff] }
 0x1fc   :  { %v577_v40 = vsel %vm570_vm6, %v573_v35, %v576_v48  ;;  %v6816_v23 = vsub.s32 %v743_v60, %v746_v22  ;;  %v827_v12 = vsel %vm819_vm5, %v806_v6, %v809_v21  ;;  %v829_v17 = vsel %vm821_vm9, %v812_v19, %v9499_v63 }
 0x1fd   :  { %v578_v47 = vsel %vm567_vm0, nan, %v577_v40  ;;  %v663_v57 = vxor.u32 2147483648, %v662_v13  ;;  %v834_v41 = vsel %vm820_vm13, %v831_v36, %v833_v25  ;;  %v835_v38 = vshll.u32 %v795_v2, 8  ;;  %v9503_v40 = vld [vmem:[#allocation35_spill] sm:$0xff] }
 0x1fe   :  { %v3078_v48 = vmul.f32 %v578_v47, %v578_v47  ;;  %v749_v43 = vsub.s32 0, %v6816_v23  ;;  %v823_v60 = vsel %vm819_vm5, %v803_v11, %v806_v6  ;;  %v825_v31 = vsel %vm821_vm9, %v809_v21, %v824_v26 }
 0x1ff   :  { %v664_v16 = vsel %vm581_vm7, %v663_v57, %v662_v13  ;;  %v6835_v35 = vmul.u32.u64.low %v835_v38, %v834_v41  ;;  %v6836_v22 = vmul.u32.u64.high %v835_v38, %v834_v41, %v6835_v35  ;;  %v769_v13 = vsub.s32 4, %v745_v24  ;;  %v9510_v41 = vld [vmem:[#allocation82_spill] sm:$0xff] }
 0x200   :  { %v3120_v42 = vand.u32 4294901760, %v3078_v48  ;;  %v667_v19 = vsel %vm6740_vm14, %v9461_v53, %v664_v16  ;;  %v4059_v2 = vmin.u32 %v749_v43, %v6816_v23  ;;  %v830_v36 = vsel %vm820_vm13, %v827_v12, %v829_v17 }
 0x201   :  { %4585 = vcosq.f32 %v667_v19  ;;  %v9500_v11 = vand.u32 4294901760, %v6736_v9  ;;  %v9182_v8 = vand.u32 2147483647, %v9503_v40  ;;  %v9504_v26 = vand.u32 2147483647, %v6634_v20 }
 0x202   :  { %v6845_v21 = vsub.f32 %v3078_v48, %v3120_v42  ;;  %4587 = vsinq.f32 %v667_v19  ;;  %v9505_v44 = vcvt.s32.f32 %v6624_v37  ;;  %v9506_v47 = vsub.s32 0, %v6641_v15 }
 0x203   :  { %v6843_v6 = vpack.c.bf16 %v3120_v42, %v9500_v11  ;;  %v751_v9 = vclz %v4059_v2  ;;  %vm685_vm7 = vcmp.lt.s32.totalorder %v9473_v51, 0  ;;  %v739_v20 = vadd.s32 %v6766_v34, %v6759_v32  ;;  %v9511_v42 = vld [vmem:[#allocation77_spill] sm:$0xff] }
 0x204   :  { %9502 = vst [vmem:[#allocation22_spill] sm:$0xff] %v6845_v21  ;;  %v6852_v0 = vmul.f32 %v9505_v44, %v9504_v26  ;;  %v6858_v57 = vmin.u32 %v9506_v47, %v6641_v15  ;;  %v6865_v37 = vmul.u32.u64.low %v835_v38, %v830_v36  ;;  %v6866_v12 = vmul.u32.u64.high %v835_v38, %v830_v36, %v6865_v37 }
 0x205   :  { %9501 = vst [vmem:[#allocation19_spill] sm:$0xff] %v6843_v6  ;;  %4155 = vmatpush1.bf16.msra.mxu1 %v6843_v6  ;;  %4281 = vmatpush1.bf16.msra.mxu0 %v6843_v6  ;;  %vm678_vm14 = vcmp.eq.s32.totalorder %v6796_v7, 2  ;;  %v9507_v48 = vand.u32 2147483647, %v9473_v51  ;;  %v4060_v17 = vadd.s32 4294967294, %v751_v9  ;;  %v6880_v32 = vsel %vm685_vm7, %v769_v13, %v745_v24 }
 0x206   :  { %4156 = vmatprep.subr.bf16.mxu1 %v9480_v28  ;;  %4282 = vmatprep.subr.bf16.mxu0 %v9480_v28  ;;  %v826_v34 = vsel %vm820_vm13, %v823_v60, %v825_v31  ;;  %v909_v16 = vshrl.u32 %v9345_v56, %v9510_v41  ;;  %vm675_vm0 = vcmp.eq.s32.totalorder %v6796_v7, 0  ;;  %v898_v43 = vand.u32 8388607, %v9182_v8 }
 0x207   :  { %vm6874_vm3 = vcmp.le.f32.partialorder %v9507_v48, 0.7853982  ;;  %v908_v19 = vshll.u32 %v9344_v49, %v9511_v42  ;;  %v911_v35 = vshll.u32 %v9345_v56, %v9511_v42  ;;  %v912_v24 = vshrl.u32 %v9346_v33, %v9510_v41 }
 0x208   :  { %vm674_vm6 = vcmp.lt.s32.totalorder %v6796_v7, 2  ;;  %vm4061_vm15 = vcmp.lt.s32.totalorder %v4060_v17, 0  ;;  %vm844_vm4 = vc.u32 %v6836_v22, %v6865_v37  ;;  %v914_v61 = vshll.u32 %v9346_v33, %v9511_v42  ;;  %v9512_v42 = vld [vmem:[#allocation90_spill] sm:$0xff] }
 0x209   :  { %v915_v60 = vshrl.u32 %v9273_v10, %v9510_v41  ;;  %vm671_vm5 = vweird.f32 %v9461_v53  ;;  %v754_v31 = vsel %vm4061_vm15, 0, %v4060_v17  ;;  %v845_v2 = vadd.s32 1, %v6866_v12 }
 0x20a   :  { %v910_v13 = vor.u32 %v909_v16, %v908_v19  ;;  %v913_v36 = vor.u32 %v912_v24, %v911_v35  ;;  %v755_v11 = vsub.s32 32, %v754_v31  ;;  %v759_v26 = vsub.s32 4294967266, %v754_v31 }
 0x20b   :  { %v842_v44 = vmul.u32 %v835_v38, %v826_v34  ;;  %v916_v47 = vor.u32 %v915_v60, %v914_v61  ;;  %v756_v9 = vshll.u32 %v6816_v23, %v754_v31  ;;  %v846_v48 = vsel %vm844_vm4, %v845_v2, %v6866_v12  ;;  %v4586_v25 = vpop.eup %4585  ;;  %v9513_v34 = vld [vmem:[#allocation101_spill] sm:$0xff] }
 0x20c   :  { %v899_v8 = vor.u32 8388608, %v898_v43  ;;  %vm923_vm9 = vcmp.lt.s32.totalorder %v9512_v42, 1  ;;  %v757_v6 = vshrl.u32 %v739_v20, %v755_v11  ;;  %v760_v21 = vadd.s32 127, %v759_v26  ;;  %v4588_v17 = vpop.eup %4587  ;;  %v9515_v26 = vld [vmem:[#allocation104_spill] sm:$0xff] }
 0x20d   :  { %v847_v14 = vadd.s32 %v846_v48, %v842_v44  ;;  %vm925_vm13 = vcmp.lt.s32.totalorder %v9512_v42, 3  ;;  %v679_v16 = vxor.u32 2147483648, %v4586_v25  ;;  %vm924_vm2 = vcmp.lt.s32.totalorder %v9512_v42, 2  ;;  %v9516_v44 = vld [vmem:[#allocation97_spill] sm:$0xff] }
 0x20e   :  { %v931_v38 = vsel %vm923_vm9, %v910_v13, %v913_v36  ;;  %v933_v23 = vsel %vm925_vm13, %v916_v47, %v9513_v34  ;;  %v676_v12 = vxor.u32 2147483648, %v4588_v17  ;;  %v758_v43 = vor.u32 %v757_v6, %v756_v9 }
 0x20f   :  { %v761_v19 = vshll.u32 %v760_v21, 23  ;;  %v848_v35 = vadd.s32 536870912, %v847_v14  ;;  %vm1621_vm15 = vcmp.lt.s32.totalorder %v5788_v1, 0  ;;  %v680_v20 = vsel %vm678_vm14, %v679_v16, %v4588_v17 }
 0x210   :  { %v772_v24 = vsel %vm6874_vm3, 0, %v6880_v32  ;;  %v907_v61 = vshrl.u32 %v9344_v49, %v9510_v41  ;;  %v934_v60 = vsel %vm924_vm2, %v931_v38, %v933_v23  ;;  %v677_v6 = vsel %vm675_vm0, %v4586_v25, %v676_v12 }
 0x211   :  { %v762_v21 = vor.u32 4788187, %v761_v19  ;;  %v849_v31 = vshrl.u32 %v848_v35, 30  ;;  %v935_v2 = vsel %vm923_vm9, %v913_v36, %v916_v47  ;;  %v681_v11 = vsel %vm674_vm6, %v677_v6, %v680_v20 }
 0x212   :  { %vm9514_vm14 = vcmp.lt.s32.totalorder %v9512_v42, 4  ;;  %v937_v41 = vsel %vm925_vm13, %v9516_v44, %v9515_v26  ;;  %v939_v9 = vshll.u32 %v899_v8, 8  ;;  %v682_v25 = vsel %vm671_vm5, nan, %v681_v11 }
 0x213   :  { %v928_v32 = vsel %vm9514_vm14, %v916_v47, 2102212464  ;;  %v763_v48 = vand.u32 2147483647, %v762_v21  ;;  %v765_v17 = vcvt.s32.f32 %v758_v43  ;;  %v850_v16 = vshll.u32 %v849_v31, 30 }
 0x214   :  { %v6938_v38 = vmul.f32 %v682_v25, %v682_v25  ;;  %v938_v7 = vsel %vm924_vm2, %v935_v2, %v937_v41  ;;  %v6942_v34 = vmul.u32.u64.low %v939_v9, %v934_v60  ;;  %v6943_v23 = vmul.u32.u64.high %v939_v9, %v934_v60, %v6942_v34  ;;  %v9530_v60 = vld [vmem:[#allocation67_spill] sm:$0xff] }
 0x215   :  { %v766_v47 = vmul.f32 %v765_v17, %v763_v48  ;;  %v6946_v12 = vsub.s32 %v847_v14, %v850_v16  ;;  %v927_v8 = vsel %vm923_vm9, %v907_v61, %v910_v13  ;;  %v929_v53 = vsel %vm925_vm13, %v913_v36, %v928_v32  ;;  %v9519_v48 = vld [vmem:[#allocation10_spill] sm:$0xff] }
 0x216   :  { %v1703_v43 = vxor.u32 2147483648, %v6852_v0  ;;  %v9187_v19 = vand.u32 4294901760, %v6938_v38  ;;  %v6954_v35 = vmul.u32.u64.low %v939_v9, %v938_v7  ;;  %v6955_v20 = vmul.u32.u64.high %v939_v9, %v938_v7, %v6954_v35 }
 0x217   :  { %v767_v6 = vxor.u32 2147483648, %v766_v47  ;;  %v776_v21 = vadd.s32 3, %v772_v24  ;;  %v853_v14 = vsub.s32 0, %v6946_v12  ;;  %v873_v61 = vsub.s32 4, %v849_v31  ;;  %v9524_v35 = vld [vmem:[#allocation53_spill] sm:$0xff] }
 0x218   :  { %v6962_v13 = vsub.f32 %v6938_v38, %v9187_v19  ;;  %v930_v36 = vsel %vm924_vm2, %v927_v8, %v929_v53  ;;  %v949_v2 = vadd.s32 1, %v6943_v23  ;;  %v9518_v11 = vsub.s32 4, %v6092_v50 }
 0x219   :  { %v768_v26 = vsel %vm685_vm7, %v767_v6, %v766_v47  ;;  %v4063_v44 = vmin.u32 %v853_v14, %v6946_v12  ;;  %v6981_v42 = vsel %vm1621_vm15, %v1703_v43, %v6852_v0  ;;  %vm789_vm0 = vcmp.lt.s32.totalorder %v9492_v59, 0  ;;  %v9523_v43 = vld [vmem:[#allocation56_spill] sm:$0xff] }
 0x21a   :  { %9517 = vst [vmem:[#allocation36_spill] sm:$0xff] %v6962_v13  ;;  %v6972_v32 = vsel %vm1621_vm15, %v9518_v11, %v6092_v50  ;;  %v771_v41 = vsel %vm6874_vm3, %v9473_v51, %v768_v26  ;;  %vm948_vm6 = vc.u32 %v6955_v20, %v6942_v34  ;;  %v946_v25 = vmul.u32 %v939_v9, %v930_v36 }
 0x21b   :  { %4589 = vcosq.f32 %v771_v41  ;;  %v855_v50 = vclz %v4063_v44  ;;  %v9186_v17 = vand.u32 2147483647, %v9519_v48  ;;  %v6990_v16 = vand.u32 3, %v776_v21 }
 0x21c   :  { %4591 = vsinq.f32 %v771_v41  ;;  %v874_v0 = vsel %vm789_vm0, %v873_v61, %v849_v31  ;;  %v950_v7 = vsel %vm948_vm6, %v949_v2, %v6943_v23  ;;  %v9520_v63 = vand.u32 2147483647, %v9492_v59 }
 0x21d   :  { %v4064_v8 = vadd.s32 4294967294, %v855_v50  ;;  %v951_v53 = vadd.s32 %v950_v7, %v946_v25  ;;  %v1013_v9 = vshrl.u32 %v9345_v56, %v9523_v43  ;;  %v1015_v6 = vshll.u32 %v9345_v56, %v9524_v35 }
 0x21e   :  { %vm6997_vm7 = vcmp.le.f32.partialorder %v9520_v63, 0.7853982  ;;  %v1016_v21 = vshrl.u32 %v9346_v33, %v9523_v43  ;;  %v1018_v31 = vshll.u32 %v9346_v33, %v9524_v35  ;;  %v1019_v23 = vshrl.u32 %v9273_v10, %v9523_v43 }
 0x21f   :  { %vm4065_vm3 = vcmp.lt.s32.totalorder %v4064_v8, 0  ;;  %v876_v14 = vsel %vm6997_vm7, 0, %v874_v0  ;;  %v952_v61 = vadd.s32 536870912, %v951_v53  ;;  %v1002_v36 = vand.u32 8388607, %v9186_v17 }
 0x220   :  { %vm779_vm4 = vcmp.eq.s32.totalorder %v6990_v16, 0  ;;  %v858_v2 = vsel %vm4065_vm3, 0, %v4064_v8  ;;  %v1012_v11 = vshll.u32 %v9344_v49, %v9524_v35  ;;  %v1017_v26 = vor.u32 %v1016_v21, %v1015_v6  ;;  %v9528_v6 = vld [vmem:[#allocation58_spill] sm:$0xff] }
 0x221   :  { %v1020_v44 = vor.u32 %v1019_v23, %v1018_v31  ;;  %vm778_vm5 = vcmp.lt.s32.totalorder %v6990_v16, 2  ;;  %v843_v41 = vadd.s32 %v6865_v37, %v6836_v22  ;;  %v859_v50 = vsub.s32 32, %v858_v2 }
 0x222   :  { %v863_v25 = vsub.s32 4294967266, %v858_v2  ;;  %v953_v0 = vshrl.u32 %v952_v61, 30  ;;  %v9525_v7 = vand.u32 2147483647, %v5788_v1  ;;  %vm775_vm13 = vweird.f32 %v9473_v51 }
 0x223   :  { %vm782_vm2 = vcmp.eq.s32.totalorder %v6990_v16, 2  ;;  %v880_v8 = vadd.s32 3, %v876_v14  ;;  %v1014_v35 = vor.u32 %v1013_v9, %v1012_v11  ;;  %vm1027_vm15 = vcmp.lt.s32.totalorder %v9528_v6, 1  ;;  %v9529_v11 = vld [vmem:[#allocation78_spill] sm:$0xff] }
 0x224   :  { %vm7023_vm9 = vcmp.le.f32.partialorder %v9525_v7, 0.7853982  ;;  %v860_v21 = vshll.u32 %v6946_v12, %v858_v2  ;;  %v861_v22 = vshrl.u32 %v843_v41, %v859_v50  ;;  %v864_v37 = vadd.s32 127, %v863_v25 }
 0x225   :  { %v954_v31 = vshll.u32 %v953_v0, 30  ;;  %v1003_v23 = vor.u32 8388608, %v1002_v36  ;;  %v1011_v61 = vshrl.u32 %v9344_v49, %v9523_v43  ;;  %vm1029_vm14 = vcmp.lt.s32.totalorder %v9528_v6, 3  ;;  %v4590_v17 = vpop.eup %4589 }
 0x226   :  { %v1039_v7 = vsel %vm1027_vm15, %v1017_v26, %v1020_v44  ;;  %v862_v24 = vor.u32 %v861_v22, %v860_v21  ;;  %v865_v14 = vshll.u32 %v864_v37, 23  ;;  %v1041_v12 = vsel %vm1029_vm14, %v9530_v60, %v9529_v11  ;;  %v4592_v2 = vpop.eup %4591  ;;  %v9532_v21 = vld [vmem:[#allocation75_spill] sm:$0xff] }
 0x227   :  { %v7036_v9 = vsub.s32 %v951_v53, %v954_v31  ;;  %v783_v36 = vxor.u32 2147483648, %v4590_v17  ;;  %vm1028_vm6 = vcmp.lt.s32.totalorder %v9528_v6, 2  ;;  %vm9531_vm3 = vcmp.lt.s32.totalorder %v9528_v6, 4 }
 0x228   :  { %v1032_v43 = vsel %vm9531_vm3, %v1020_v44, 2102212464  ;;  %v1035_v41 = vsel %vm1027_vm15, %v1014_v35, %v1017_v26  ;;  %v780_v50 = vxor.u32 2147483648, %v4592_v2  ;;  %v866_v25 = vor.u32 4788187, %v865_v14 }
 0x229   :  { %v957_v53 = vsub.s32 0, %v7036_v9  ;;  %v1037_v22 = vsel %vm1029_vm14, %v1020_v44, %v9532_v21  ;;  %v784_v60 = vsel %vm782_vm2, %v783_v36, %v4592_v2  ;;  %v977_v37 = vsub.s32 4, %v953_v0 }
 0x22a   :  { %v1042_v31 = vsel %vm1028_vm6, %v1039_v7, %v1041_v12  ;;  %v1043_v11 = vshll.u32 %v1003_v23, 8  ;;  %v781_v19 = vsel %vm779_vm4, %v4590_v17, %v780_v50  ;;  %v867_v13 = vand.u32 2147483647, %v866_v25 }
 0x22b   :  { %v869_v5 = vcvt.s32.f32 %v862_v24  ;;  %v4067_v14 = vmin.u32 %v957_v53, %v7036_v9  ;;  %v785_v39 = vsel %vm778_vm5, %v781_v19, %v784_v60  ;;  %v1038_v44 = vsel %vm1028_vm6, %v1035_v41, %v1037_v22 }
 0x22c   :  { %v7062_v21 = vmul.u32.u64.low %v1043_v11, %v1042_v31  ;;  %v7063_v2 = vmul.u32.u64.high %v1043_v11, %v1042_v31, %v7062_v21  ;;  %v7069_v23 = vsel %vm7023_vm9, %v5788_v1, %v6981_v42  ;;  %v786_v24 = vsel %vm775_vm13, nan, %v785_v39 }
 0x22d   :  { %v870_v17 = vmul.f32 %v869_v5, %v867_v13  ;;  %v959_v7 = vclz %v4067_v14  ;;  %v3080_v12 = vmul.f32 %v786_v24, %v786_v24  ;;  %vm893_vm4 = vcmp.lt.s32.totalorder %v9503_v40, 0  ;;  %v9536_v14 = vld [vmem:[#allocation130_spill] sm:$0xff] }
 0x22e   :  { %v1031_v19 = vsel %vm1027_vm15, %v1011_v61, %v1014_v35  ;;  %v1033_v16 = vsel %vm1029_vm14, %v1017_v26, %v1032_v43  ;;  %v7078_v50 = vmul.u32.u64.low %v1043_v11, %v1038_v44  ;;  %v7079_v25 = vmul.u32.u64.high %v1043_v11, %v1038_v44, %v7078_v50  ;;  %v9533_v35 = vld [vmem:[#allocation60_spill] sm:$0xff]  ;;  %v9537_v24 = vld [vmem:[#allocation126_spill] sm:$0xff] }
 0x22f   :  { %v871_v36 = vxor.u32 2147483648, %v870_v17  ;;  %v4068_v41 = vadd.s32 4294967294, %v959_v7  ;;  %v3126_v42 = vand.u32 4294901760, %v3080_v12  ;;  %v7082_v51 = vand.u32 3, %v880_v8 }
 0x230   :  { %v947_v39 = vadd.s32 %v6942_v34, %v6955_v20  ;;  %v978_v5 = vsel %vm893_vm4, %v977_v37, %v953_v0  ;;  %v1034_v26 = vsel %vm1028_vm6, %v1031_v19, %v1033_v16  ;;  %v9194_v61 = vand.u32 2147483647, %v9533_v35 }
 0x231   :  { %v872_v13 = vsel %vm789_vm0, %v871_v36, %v870_v17  ;;  %vm4069_vm5 = vcmp.lt.s32.totalorder %v4068_v41, 0  ;;  %v9534_v43 = vand.u32 4294901760, %v6938_v38  ;;  %v7097_v8 = vsub.f32 %v3080_v12, %v3126_v42 }
 0x232   :  { %v875_v34 = vsel %vm6997_vm7, %v9492_v59, %v872_v13  ;;  %v962_v20 = vsel %vm4069_vm5, 0, %v4068_v41  ;;  %vm1052_vm0 = vc.u32 %v7063_v2, %v7078_v50  ;;  %v1050_v6 = vmul.u32 %v1043_v11, %v1034_v26 }
 0x233   :  { %v7095_v53 = vpack.c.bf16 %v3126_v42, %v9534_v43  ;;  %4593 = vcosq.f32 %v875_v34  ;;  %v963_v0 = vsub.s32 32, %v962_v20  ;;  %v967_v22 = vsub.s32 4294967266, %v962_v20 }
 0x234   :  { %4595 = vsinq.f32 %v875_v34  ;;  %v964_v38 = vshll.u32 %v7036_v9, %v962_v20  ;;  %v1053_v60 = vadd.s32 1, %v7079_v25  ;;  %v1106_v31 = vand.u32 8388607, %v9194_v61 }
 0x235   :  { %9535 = vst [vmem:[#allocation37_spill] sm:$0xff] %v7095_v53  ;;  %4158 = vmatpush1.bf16.msra.mxu1 %v7095_v53  ;;  %4284 = vmatpush1.bf16.msra.mxu0 %v7095_v53  ;;  %v965_v47 = vshrl.u32 %v947_v39, %v963_v0  ;;  %v968_v37 = vadd.s32 127, %v967_v22  ;;  %v1117_v44 = vshrl.u32 %v9345_v56, %v9536_v14  ;;  %v9538_v7 = vand.u32 2147483647, %v9503_v40  ;;  %v9541_v0 = vld [vmem:[#allocation128_spill] sm:$0xff] }
 0x236   :  { %4159 = vmatprep.subr.bf16.mxu1 %v9480_v28  ;;  %4285 = vmatprep.subr.bf16.mxu0 %v9480_v28  ;;  %v1054_v21 = vsel %vm1052_vm0, %v1053_v60, %v7079_v25  ;;  %v1116_v9 = vshll.u32 %v9344_v49, %v9537_v24  ;;  %v1119_v11 = vshll.u32 %v9345_v56, %v9537_v24  ;;  %vm883_vm13 = vcmp.eq.s32.totalorder %v7082_v51, 0  ;;  %v9542_v60 = vld [vmem:[#allocation142_spill] sm:$0xff] }
 0x237   :  { %v1120_v17 = vshrl.u32 %v9346_v33, %v9536_v14  ;;  %vm7123_vm7 = vcmp.le.f32.partialorder %v9538_v7, 0.7853982  ;;  %v966_v19 = vor.u32 %v965_v47, %v964_v38  ;;  %v969_v16 = vshll.u32 %v968_v37, 23  ;;  %v9543_v47 = vld [vmem:[#allocation137_spill] sm:$0xff] }
 0x238   :  { %v1055_v36 = vadd.s32 %v1054_v21, %v1050_v6  ;;  %v1118_v41 = vor.u32 %v1117_v44, %v1116_v9  ;;  %v1122_v42 = vshll.u32 %v9346_v33, %v9537_v24  ;;  %v1123_v39 = vshrl.u32 %v9273_v10, %v9536_v14  ;;  %v9544_v21 = vld [vmem:[#allocation140_spill] sm:$0xff] }
 0x239   :  { %v1121_v25 = vor.u32 %v1120_v17, %v1119_v11  ;;  %vm882_vm2 = vcmp.lt.s32.totalorder %v7082_v51, 2  ;;  %vm886_vm15 = vcmp.eq.s32.totalorder %v7082_v51, 2  ;;  %v970_v13 = vor.u32 4788187, %v969_v16 }
 0x23a   :  { %v980_v26 = vsel %vm7123_vm7, 0, %v978_v5  ;;  %v1056_v43 = vadd.s32 536870912, %v1055_v36  ;;  %vm879_vm14 = vweird.f32 %v9492_v59  ;;  %v1107_v34 = vor.u32 8388608, %v1106_v31 }
 0x23b   :  { %v1124_v20 = vor.u32 %v1123_v39, %v1122_v42  ;;  %vm1131_vm6 = vcmp.lt.s32.totalorder %v9541_v0, 1  ;;  %vm1133_vm3 = vcmp.lt.s32.totalorder %v9541_v0, 3  ;;  %v971_v22 = vand.u32 2147483647, %v970_v13 }
 0x23c   :  { %v973_v38 = vcvt.s32.f32 %v966_v19  ;;  %v7139_v6 = vshrl.u32 %v1056_v43, 30  ;;  %v1145_v37 = vsel %vm1133_vm3, %v9543_v47, %v9542_v60  ;;  %v984_v44 = vadd.s32 3, %v980_v26 }
 0x23d   :  { %v1139_v5 = vsel %vm1131_vm6, %v1118_v41, %v1121_v25  ;;  %v1141_v31 = vsel %vm1133_vm3, %v1124_v20, %v9544_v21  ;;  %v1143_v24 = vsel %vm1131_vm6, %v1121_v25, %v1124_v20  ;;  %v4594_v9 = vpop.eup %4593  ;;  %v1115_v7 = vshrl.u32 %v9344_v49, %v9536_v14 }
 0x23e   :  { %v974_v11 = vmul.f32 %v973_v38, %v971_v22  ;;  %v1058_v17 = vshll.u32 %v7139_v6, 30  ;;  %vm1132_vm5 = vcmp.lt.s32.totalorder %v9541_v0, 2  ;;  %v4596_v19 = vpop.eup %4595  ;;  %v887_v16 = vxor.u32 2147483648, %v4594_v9 }
 0x23f   :  { %vm9545_vm0 = vcmp.lt.s32.totalorder %v9541_v0, 4  ;;  %v1146_v39 = vsel %vm1132_vm5, %v1143_v24, %v1145_v37  ;;  %v1147_v13 = vshll.u32 %v1107_v34, 8  ;;  %v884_v26 = vxor.u32 2147483648, %v4596_v19 }
 0x240   :  { %v1136_v42 = vsel %vm9545_vm0, %v1124_v20, 2102212464  ;;  %v975_v43 = vxor.u32 2147483648, %v974_v11  ;;  %v7160_v60 = vsub.s32 %v1055_v36, %v1058_v17  ;;  %v1142_v22 = vsel %vm1132_vm5, %v1139_v5, %v1141_v31 }
 0x241   :  { %v888_v14 = vsel %vm886_vm15, %v887_v16, %v4596_v19  ;;  %v1135_v38 = vsel %vm1131_vm6, %v1115_v7, %v1118_v41  ;;  %v7168_v47 = vmul.u32.u64.low %v1147_v13, %v1146_v39  ;;  %v7169_v21 = vmul.u32.u64.high %v1147_v13, %v1146_v39, %v7168_v47 }
 0x242   :  { %v885_v20 = vsel %vm883_vm13, %v4594_v9, %v884_v26  ;;  %v976_v34 = vsel %vm893_vm4, %v975_v43, %v974_v11  ;;  %v1061_v36 = vsub.s32 0, %v7160_v60  ;;  %v1137_v37 = vsel %vm1133_vm3, %v1121_v25, %v1136_v42 }
 0x243   :  { %v889_v5 = vsel %vm882_vm2, %v885_v20, %v888_v14  ;;  %v979_v41 = vsel %vm7123_vm7, %v9503_v40, %v976_v34  ;;  %v7183_v31 = vmul.u32.u64.low %v1147_v13, %v1142_v22  ;;  %v7184_v24 = vmul.u32.u64.high %v1147_v13, %v1142_v22, %v7183_v31  ;;  %v9549_v22 = vld [vmem:[#allocation8_spill] sm:$0xff] }
 0x244   :  { %v9546_v9 = vand.u32 2147483647, %v6336_v62  ;;  %v9547_v11 = vcvt.s32.f32 %v6315_v30  ;;  %v890_v25 = vsel %vm879_vm14, nan, %v889_v5  ;;  %4597 = vcosq.f32 %v979_v41 }
 0x245   :  { %v4071_v51 = vmin.u32 %v1061_v36, %v7160_v60  ;;  %4599 = vsinq.f32 %v979_v41  ;;  %v7199_v7 = vmul.f32 %v890_v25, %v890_v25  ;;  %v1138_v62 = vsel %vm1132_vm5, %v1135_v38, %v1137_v37  ;;  %v9554_v36 = vld [vmem:[#allocation18_spill] sm:$0xff] }
 0x246   :  { %v7191_v17 = vmul.f32 %v9547_v11, %v9546_v9  ;;  %4601 = vcosq.f32 %v7069_v23  ;;  %v9548_v30 = vclz %v6858_v57  ;;  %v985_v59 = vand.u32 3, %v984_v44 }
 0x247   :  { %v1063_v16 = vclz %v4071_v51  ;;  %v9193_v42 = vand.u32 4294901760, %v7199_v7  ;;  %v1081_v39 = vsub.s32 4, %v7139_v6  ;;  %vm1156_vm4 = vc.u32 %v7169_v21, %v7183_v31 }
 0x248   :  { %v7206_v19 = vadd.s32 4294967294, %v9548_v30  ;;  %v1157_v26 = vadd.s32 1, %v7184_v24  ;;  %4603 = vsinq.f32 %v7069_v23  ;;  %v1154_v43 = vmul.u32 %v1147_v13, %v1138_v62 }
 0x249   :  { %v4072_v0 = vadd.s32 4294967294, %v1063_v16  ;;  %v9192_v14 = vand.u32 2147483647, %v9549_v22  ;;  %v7218_v57 = vsub.f32 %v7199_v7, %v9193_v42  ;;  %v9551_v44 = vand.u32 2147483647, %v9519_v48 }
 0x24a   :  { %vm997_vm13 = vcmp.lt.s32.totalorder %v9519_v48, 0  ;;  %v1158_v47 = vsel %vm1156_vm4, %v1157_v26, %v7184_v24  ;;  %vm986_vm2 = vcmp.lt.s32.totalorder %v985_v59, 2  ;;  %vm987_vm15 = vcmp.eq.s32.totalorder %v985_v59, 0 }
 0x24b   :  { %9550 = vst [vmem:[#allocation31_spill] sm:$0xff] %v7218_v57  ;;  %vm7222_vm7 = vcmp.le.f32.partialorder %v9551_v44, 0.7853982  ;;  %v1051_v23 = vadd.s32 %v7078_v50, %v7063_v2  ;;  %vm4073_vm14 = vcmp.lt.s32.totalorder %v4072_v0, 0  ;;  %v1159_v13 = vadd.s32 %v1158_v47, %v1154_v43  ;;  %v9555_v50 = vld [vmem:[#allocation23_spill] sm:$0xff] }
 0x24c   :  { %vm983_vm6 = vweird.f32 %v9503_v40  ;;  %v1066_v20 = vsel %vm4073_vm14, 0, %v4072_v0  ;;  %v1082_v34 = vsel %vm997_vm13, %v1081_v39, %v7139_v6  ;;  %v1220_v37 = vshll.u32 %v9344_v49, %v9554_v36 }
 0x24d   :  { %v1226_v5 = vshll.u32 %v9346_v33, %v9554_v36  ;;  %v1067_v41 = vsub.s32 32, %v1066_v20  ;;  %v1071_v24 = vsub.s32 4294967266, %v1066_v20  ;;  %v1160_v9 = vadd.s32 536870912, %v1159_v13 }
 0x24e   :  { %v1210_v2 = vand.u32 8388607, %v9192_v14  ;;  %v1221_v11 = vshrl.u32 %v9345_v56, %v9555_v50  ;;  %v1223_v25 = vshll.u32 %v9345_v56, %v9554_v36  ;;  %v1224_v6 = vshrl.u32 %v9346_v33, %v9555_v50  ;;  %v4598_v62 = vpop.eup %4597 }
 0x24f   :  { %v1227_v51 = vshrl.u32 %v9273_v10, %v9555_v50  ;;  %v1068_v30 = vshll.u32 %v7160_v60, %v1066_v20  ;;  %v1069_v16 = vshrl.u32 %v1051_v23, %v1067_v41  ;;  %v1072_v39 = vadd.s32 127, %v1071_v24  ;;  %v4600_v0 = vpop.eup %4599 }
 0x250   :  { %v1161_v26 = vshrl.u32 %v1160_v9, 30  ;;  %vm990_vm3 = vcmp.eq.s32.totalorder %v985_v59, 2  ;;  %v991_v43 = vxor.u32 2147483648, %v4598_v62  ;;  %v1084_v44 = vsel %vm7222_vm7, 0, %v1082_v34  ;;  %v7251_v36 = vpop.eup %4601 }
 0x251   :  { %v1228_v47 = vor.u32 %v1227_v51, %v1226_v5  ;;  %v988_v14 = vxor.u32 2147483648, %v4600_v0  ;;  %v1070_v12 = vor.u32 %v1069_v16, %v1068_v30  ;;  %v1073_v42 = vshll.u32 %v1072_v39, 23  ;;  %v9556_v30 = vld [vmem:[#allocation26_spill] sm:$0xff] }
 0x252   :  { %v1162_v61 = vshll.u32 %v1161_v26, 30  ;;  %v992_v53 = vsel %vm990_vm3, %v991_v43, %v4600_v0  ;;  %vm1101_vm5 = vcmp.lt.s32.totalorder %v9533_v35, 0  ;;  %v1219_v60 = vshrl.u32 %v9344_v49, %v9555_v50  ;;  %v7256_v41 = vpop.eup %4603  ;;  %v9563_v39 = vld [vmem:[#allocation34_spill] sm:$0xff] }
 0x253   :  { %v1222_v23 = vor.u32 %v1221_v11, %v1220_v37  ;;  %v1225_v20 = vor.u32 %v1224_v6, %v1223_v25  ;;  %v989_v24 = vsel %vm987_vm15, %v4598_v62, %v988_v14  ;;  %v1074_v34 = vor.u32 4788187, %v1073_v42  ;;  %v9562_v62 = vld [vmem:[#allocation44_spill] sm:$0xff] }
 0x254   :  { %v7259_v5 = vsub.s32 %v1159_v13, %v1162_v61  ;;  %v1211_v9 = vor.u32 8388608, %v1210_v2  ;;  %v993_v51 = vsel %vm986_vm2, %v989_v24, %v992_v53  ;;  %vm1235_vm0 = vcmp.lt.s32.totalorder %v9556_v30, 1  ;;  %v9561_v2 = vld [vmem:[#allocation43_spill] sm:$0xff] }
 0x255   :  { %vm1237_vm4 = vcmp.lt.s32.totalorder %v9556_v30, 3  ;;  %vm9557_vm14 = vcmp.lt.s32.totalorder %v9556_v30, 4  ;;  %v994_v37 = vsel %vm983_vm6, nan, %v993_v51  ;;  %v1075_v50 = vand.u32 2147483647, %v1074_v34 }
 0x256   :  { %v1240_v16 = vsel %vm9557_vm14, %v1228_v47, 2102212464  ;;  %v1077_v11 = vcvt.s32.f32 %v1070_v12  ;;  %v1165_v14 = vsub.s32 0, %v7259_v5  ;;  %v3082_v42 = vmul.f32 %v994_v37, %v994_v37 }
 0x257   :  { %v9558_v61 = vand.u32 2147483647, %v9533_v35  ;;  %v1185_v53 = vsub.s32 4, %v1161_v26  ;;  %v1243_v13 = vsel %vm1235_vm0, %v1222_v23, %v1225_v20  ;;  %v1245_v40 = vsel %vm1237_vm4, %v1228_v47, %v9561_v2 }
 0x258   :  { %v1078_v25 = vmul.f32 %v1077_v11, %v1075_v50  ;;  %v4075_v12 = vmin.u32 %v1165_v14, %v7259_v5  ;;  %v1247_v6 = vsel %vm1235_vm0, %v1225_v20, %v1228_v47  ;;  %v1249_v0 = vsel %vm1237_vm4, %v9563_v39, %v9562_v62 }
 0x259   :  { %vm7271_vm15 = vcmp.le.f32.partialorder %v9558_v61, 0.7853982  ;;  %v3132_v43 = vand.u32 4294901760, %v3082_v42  ;;  %vm1236_vm2 = vcmp.lt.s32.totalorder %v9556_v30, 2  ;;  %v1239_v24 = vsel %vm1235_vm0, %v1219_v60, %v1222_v23 }
 0x25a   :  { %v1241_v34 = vsel %vm1237_vm4, %v1225_v20, %v1240_v16  ;;  %v1079_v51 = vxor.u32 2147483648, %v1078_v25  ;;  %v1088_v37 = vadd.s32 3, %v1084_v44  ;;  %v1167_v50 = vclz %v4075_v12 }
 0x25b   :  { %v1250_v11 = vsel %vm1236_vm2, %v1247_v6, %v1249_v0  ;;  %v9564_v47 = vand.u32 4294901760, %v7199_v7  ;;  %v7296_v61 = vsub.f32 %v3082_v42, %v3132_v43  ;;  %v1246_v2 = vsel %vm1236_vm2, %v1243_v13, %v1245_v40 }
 0x25c   :  { %v1251_v62 = vshll.u32 %v1211_v9, 8  ;;  %v1080_v39 = vsel %vm997_vm13, %v1079_v51, %v1078_v25  ;;  %v4076_v57 = vadd.s32 4294967294, %v1167_v50  ;;  %v1186_v60 = vsel %vm1101_vm5, %v1185_v53, %v1161_v26  ;;  %v9566_v9 = vld [vmem:[#allocation28_spill] sm:$0xff] }
 0x25d   :  { %v7294_v14 = vpack.c.bf16 %v3132_v43, %v9564_v47  ;;  %v1242_v23 = vsel %vm1236_vm2, %v1239_v24, %v1241_v34  ;;  %v1083_v7 = vsel %vm7222_vm7, %v9519_v48, %v1080_v39  ;;  %v9197_v30 = vand.u32 2147483647, %v9566_v9  ;;  %v9567_v43 = vld [vmem:[#allocation84_spill] sm:$0xff] }
 0x25e   :  { %v7307_v44 = vmul.u32.u64.low %v1251_v62, %v1250_v11  ;;  %v7308_v20 = vmul.u32.u64.high %v1251_v62, %v1250_v11, %v7307_v44  ;;  %4605 = vcosq.f32 %v1083_v7  ;;  %vm4077_vm13 = vcmp.lt.s32.totalorder %v4076_v57, 0 }
 0x25f   :  { %9565 = vst [vmem:[#allocation33_spill] sm:$0xff] %v7294_v14  ;;  %4161 = vmatpush1.bf16.msra.mxu1 %v7294_v14  ;;  %4287 = vmatpush1.bf16.msra.mxu0 %v7294_v14  ;;  %v7313_v26 = vmul.u32.u64.low %v1251_v62, %v1246_v2  ;;  %v7314_v16 = vmul.u32.u64.high %v1251_v62, %v1246_v2, %v7313_v26  ;;  %4607 = vsinq.f32 %v1083_v7  ;;  %v7317_v42 = vand.u32 3, %v1088_v37 }
 0x260   :  { %4162 = vmatprep.subr.bf16.mxu1 %v9480_v28  ;;  %4288 = vmatprep.subr.bf16.mxu0 %v9480_v28  ;;  %v1155_v38 = vadd.s32 %v7183_v31, %v7169_v21  ;;  %v1170_v53 = vsel %vm4077_vm13, 0, %v4076_v57  ;;  %v1188_v25 = vsel %vm7271_vm15, 0, %v1186_v60  ;;  %v1258_v12 = vmul.u32 %v1251_v62, %v1242_v23  ;;  %v9568_v57 = vld [vmem:[#allocation91_spill] sm:$0xff] }
 0x261   :  { %v1171_v13 = vsub.s32 32, %v1170_v53  ;;  %v1175_v40 = vsub.s32 4294967266, %v1170_v53  ;;  %v1172_v6 = vshll.u32 %v7259_v5, %v1170_v53  ;;  %vm1260_vm7 = vc.u32 %v7308_v20, %v7313_v26 }
 0x262   :  { %v1314_v0 = vand.u32 8388607, %v9197_v30  ;;  %v1324_v24 = vshll.u32 %v9344_v49, %v9567_v43  ;;  %v1261_v31 = vadd.s32 1, %v7314_v16  ;;  %v1325_v51 = vshrl.u32 %v9345_v56, %v9568_v57 }
 0x263   :  { %v1173_v34 = vshrl.u32 %v1155_v38, %v1171_v13  ;;  %v1176_v21 = vadd.s32 127, %v1175_v40  ;;  %v1327_v37 = vshll.u32 %v9345_v56, %v9567_v43  ;;  %v1328_v5 = vshrl.u32 %v9346_v33, %v9568_v57 }
 0x264   :  { %v1330_v50 = vshll.u32 %v9346_v33, %v9567_v43  ;;  %v1331_v11 = vshrl.u32 %v9273_v10, %v9568_v57  ;;  %vm1090_vm6 = vcmp.lt.s32.totalorder %v7317_v42, 2  ;;  %vm1091_vm3 = vcmp.eq.s32.totalorder %v7317_v42, 0 }
 0x265   :  { %v1174_v47 = vor.u32 %v1173_v34, %v1172_v6  ;;  %v1177_v2 = vshll.u32 %v1176_v21, 23  ;;  %v1262_v62 = vsel %vm1260_vm7, %v1261_v31, %v7314_v16  ;;  %v1326_v60 = vor.u32 %v1325_v51, %v1324_v24  ;;  %v9569_v6 = vld [vmem:[#allocation100_spill] sm:$0xff]  ;;  %v9570_v31 = vld [vmem:[#allocation110_spill] sm:$0xff] }
 0x266   :  { %v1263_v39 = vadd.s32 %v1262_v62, %v1258_v12  ;;  %v1329_v23 = vor.u32 %v1328_v5, %v1327_v37  ;;  %v1332_v7 = vor.u32 %v1331_v11, %v1330_v50  ;;  %vm1094_vm0 = vcmp.eq.s32.totalorder %v7317_v42, 2  ;;  %v9571_v5 = vld [vmem:[#allocation111_spill] sm:$0xff]  ;;  %v9572_v50 = vld [vmem:[#allocation105_spill] sm:$0xff] }
 0x267   :  { %v1178_v44 = vor.u32 4788187, %v1177_v2  ;;  %v1192_v38 = vadd.s32 3, %v1188_v25  ;;  %v1315_v53 = vor.u32 8388608, %v1314_v0  ;;  %v1181_v13 = vcvt.s32.f32 %v1174_v47 }
 0x268   :  { %v1264_v40 = vadd.s32 536870912, %v1263_v39  ;;  %v1323_v43 = vshrl.u32 %v9344_v49, %v9568_v57  ;;  %vm1339_vm14 = vcmp.lt.s32.totalorder %v9569_v6, 1  ;;  %v4606_v34 = vpop.eup %4605  ;;  %vm1340_vm2 = vcmp.lt.s32.totalorder %v9569_v6, 2 }
 0x269   :  { %v1179_v16 = vand.u32 2147483647, %v1178_v44  ;;  %vm1341_vm13 = vcmp.lt.s32.totalorder %v9569_v6, 3  ;;  %v1351_v12 = vsel %vm1339_vm14, %v1329_v23, %v1332_v7  ;;  %v4608_v25 = vpop.eup %4607  ;;  %v1095_v0 = vxor.u32 2147483648, %v4606_v34 }
 0x26a   :  { %v1265_v24 = vshrl.u32 %v1264_v40, 30  ;;  %v1347_v21 = vsel %vm1339_vm14, %v1326_v60, %v1329_v23  ;;  %v1349_v57 = vsel %vm1341_vm13, %v1332_v7, %v9570_v31  ;;  %v1092_v51 = vxor.u32 2147483648, %v4608_v25 }
 0x26b   :  { %v1182_v37 = vmul.f32 %v1181_v13, %v1179_v16  ;;  %v1353_v11 = vsel %vm1341_vm13, %v9572_v50, %v9571_v5  ;;  %v1355_v47 = vshll.u32 %v1315_v53, 8  ;;  %v1096_v2 = vsel %vm1094_vm0, %v1095_v0, %v4608_v25 }
 0x26c   :  { %v1266_v62 = vshll.u32 %v1265_v24, 30  ;;  %vm9573_vm7 = vcmp.lt.s32.totalorder %v9569_v6, 4  ;;  %v1354_v40 = vsel %vm1340_vm2, %v1351_v12, %v1353_v11  ;;  %v1093_v31 = vsel %vm1091_vm3, %v4606_v34, %v1092_v51 }
 0x26d   :  { %v1344_v44 = vsel %vm9573_vm7, %v1332_v7, 2102212464  ;;  %v1183_v13 = vxor.u32 2147483648, %v1182_v37  ;;  %v7370_v16 = vmul.u32.u64.low %v1355_v47, %v1354_v40  ;;  %v7371_v30 = vmul.u32.u64.high %v1355_v47, %v1354_v40, %v7370_v16 }
 0x26e   :  { %vm1087_vm4 = vweird.f32 %v9519_v48  ;;  %v1097_v53 = vsel %vm1090_vm6, %v1093_v31, %v1096_v2  ;;  %v7376_v25 = vsub.s32 %v1263_v39, %v1266_v62  ;;  %v1350_v7 = vsel %vm1340_vm2, %v1347_v21, %v1349_v57 }
 0x26f   :  { %v1098_v0 = vsel %vm1087_vm4, nan, %v1097_v53  ;;  %v1184_v12 = vsel %vm1101_vm5, %v1183_v13, %v1182_v37  ;;  %v7382_v5 = vand.u32 3, %v1192_v38  ;;  %v1343_v34 = vsel %vm1339_vm14, %v1323_v43, %v1326_v60 }
 0x270   :  { %v1187_v48 = vsel %vm7271_vm15, %v9533_v35, %v1184_v12  ;;  %v7389_v42 = vmul.f32 %v1098_v0, %v1098_v0  ;;  %v1269_v39 = vsub.s32 0, %v7376_v25  ;;  %v1345_v21 = vsel %vm1341_vm13, %v1329_v23, %v1344_v44 }
 0x271   :  { %4609 = vcosq.f32 %v1187_v48  ;;  %v7394_v57 = vmul.u32.u64.low %v1355_v47, %v1350_v7  ;;  %v7395_v51 = vmul.u32.u64.high %v1355_v47, %v1350_v7, %v7394_v57  ;;  %v1500_v60 = vsel %vm5972_vm11, 0, %v6059_v4 }
 0x272   :  { %v9574_v59 = vsel %vm7023_vm9, 0, %v6972_v32  ;;  %4611 = vsinq.f32 %v1187_v48  ;;  %v3135_v43 = vand.u32 4294901760, %v7389_v42  ;;  %v4079_v23 = vmin.u32 %v1269_v39, %v7376_v25 }
 0x273   :  { %v7405_v38 = vadd.s32 3, %v9574_v59  ;;  %vm9575_vm5 = vcmp.lt.s32.totalorder %v7206_v19, 0  ;;  %v1289_v50 = vsub.s32 4, %v1265_v24  ;;  %v1346_v18 = vsel %vm1340_vm2, %v1343_v34, %v1345_v21 }
 0x274   :  { %v7412_v37 = vsel %vm9575_vm5, 0, %v7206_v19  ;;  %v1504_v4 = vadd.s32 3, %v1500_v60  ;;  %v7419_v32 = vsub.f32 %v7389_v42, %v3135_v43  ;;  %vm1205_vm11 = vcmp.lt.s32.totalorder %v9549_v22, 0 }
 0x275   :  { %v1271_v63 = vclz %v4079_v23  ;;  %vm1364_vm9 = vc.u32 %v7371_v30, %v7394_v57  ;;  %vm1198_vm15 = vcmp.eq.s32.totalorder %v7382_v5, 2  ;;  %v1259_v19 = vadd.s32 %v7313_v26, %v7308_v20 }
 0x276   :  { %v1365_v6 = vadd.s32 1, %v7395_v51  ;;  %v1505_v11 = vand.u32 3, %v1504_v4  ;;  %v1508_v2 = vxor.u32 2147483648, %v6129_v29  ;;  %vm1195_vm6 = vcmp.eq.s32.totalorder %v7382_v5, 0 }
 0x277   :  { %v9576_v62 = vand.u32 2147483647, %v9549_v22  ;;  %v4080_v40 = vadd.s32 4294967294, %v1271_v63  ;;  %v1362_v31 = vmul.u32 %v1355_v47, %v1346_v18  ;;  %v1511_v13 = vxor.u32 2147483648, %v6123_v54 }
 0x278   :  { %v1604_v20 = vsel %vm5834_vm1, 0, %v5968_v45  ;;  %vm1194_vm0 = vcmp.lt.s32.totalorder %v7382_v5, 2  ;;  %v1290_v26 = vsel %vm1205_vm11, %v1289_v50, %v1265_v24  ;;  %v1366_v16 = vsel %vm1364_vm9, %v1365_v6, %v7395_v51 }
 0x279   :  { %vm7432_vm3 = vcmp.le.f32.partialorder %v9576_v62, 0.7853982  ;;  %vm1507_vm4 = vcmp.eq.s32.totalorder %v1505_v11, 0  ;;  %vm1510_vm14 = vcmp.eq.s32.totalorder %v1505_v11, 2  ;;  %vm1191_vm2 = vweird.f32 %v9533_v35 }
 0x27a   :  { %vm4081_vm13 = vcmp.lt.s32.totalorder %v4080_v40, 0  ;;  %v1367_v53 = vadd.s32 %v1366_v16, %v1362_v31  ;;  %v1509_v47 = vsel %vm1507_vm4, %v6123_v54, %v1508_v2  ;;  %v1512_v7 = vsel %vm1510_vm14, %v1511_v13, %v6129_v29 }
 0x27b   :  { %v1274_v0 = vsel %vm4081_vm13, 0, %v4080_v40  ;;  %vm1503_vm1 = vweird.f32 %v5291_v58  ;;  %vm1506_vm7 = vcmp.lt.s32.totalorder %v1505_v11, 2  ;;  %v1608_v52 = vadd.s32 3, %v1604_v20  ;;  %v4610_v48 = vpop.eup %4609 }
 0x27c   :  { %v1275_v45 = vsub.s32 32, %v1274_v0  ;;  %v1279_v12 = vsub.s32 4294967266, %v1274_v0  ;;  %v1368_v24 = vadd.s32 536870912, %v1367_v53  ;;  %v1513_v34 = vsel %vm1506_vm7, %v1509_v47, %v1512_v7  ;;  %v4612_v54 = vpop.eup %4611 }
 0x27d   :  { %v1276_v39 = vshll.u32 %v7376_v25, %v1274_v0  ;;  %v1609_v21 = vand.u32 3, %v1608_v52  ;;  %v1612_v51 = vxor.u32 2147483648, %v6067_v3  ;;  %v1615_v60 = vxor.u32 2147483648, %v6038_v27 }
 0x27e   :  { %v1199_v59 = vxor.u32 2147483648, %v4610_v48  ;;  %v1277_v29 = vshrl.u32 %v1259_v19, %v1275_v45  ;;  %v1280_v23 = vadd.s32 127, %v1279_v12  ;;  %v7451_v50 = vshrl.u32 %v1368_v24, 30 }
 0x27f   :  { %v1196_v18 = vxor.u32 2147483648, %v4612_v54  ;;  %v1514_v4 = vsel %vm1503_vm1, nan, %v1513_v34  ;;  %vm1611_vm5 = vcmp.eq.s32.totalorder %v1609_v21, 0  ;;  %vm1614_vm9 = vcmp.eq.s32.totalorder %v1609_v21, 2 }
 0x280   :  { %v1200_v25 = vsel %vm1198_vm15, %v1199_v59, %v4612_v54  ;;  %v1278_v63 = vor.u32 %v1277_v29, %v1276_v39  ;;  %v1281_v6 = vshll.u32 %v1280_v23, 23  ;;  %v1370_v11 = vshll.u32 %v7451_v50, 30 }
 0x281   :  { %v1197_v2 = vsel %vm1195_vm6, %v4610_v48, %v1196_v18  ;;  %v1292_v19 = vsel %vm7432_vm3, 0, %v1290_v26  ;;  %v1613_v62 = vsel %vm1611_vm5, %v6038_v27, %v1612_v51  ;;  %v1616_v58 = vsel %vm1614_vm9, %v1615_v60, %v6067_v3 }
 0x282   :  { %v1201_v40 = vsel %vm1194_vm0, %v1197_v2, %v1200_v25  ;;  %v1282_v31 = vor.u32 4788187, %v1281_v6  ;;  %v7466_v13 = vsub.s32 %v1367_v53, %v1370_v11  ;;  %vm1610_vm15 = vcmp.lt.s32.totalorder %v1609_v21, 2 }
 0x283   :  { %v1202_v20 = vsel %vm1191_vm2, nan, %v1201_v40  ;;  %vm1607_vm4 = vweird.f32 %v5175_v55  ;;  %v1617_v16 = vsel %vm1610_vm15, %v1613_v62, %v1616_v58  ;;  %v7471_v47 = vmul.f32 %v1514_v4, %v1514_v4 }
 0x284   :  { %v3084_v26 = vmul.f32 %v1202_v20, %v1202_v20  ;;  %v1283_v7 = vand.u32 2147483647, %v1282_v31  ;;  %v1285_v27 = vcvt.s32.f32 %v1278_v63  ;;  %v1373_v3 = vsub.s32 0, %v7466_v13  ;;  %v9583_v31 = vld [vmem:[#allocation120_spill] sm:$0xff] }
 0x285   :  { %v1296_v0 = vadd.s32 3, %v1292_v19  ;;  %v1618_v5 = vsel %vm1607_vm4, nan, %v1617_v16  ;;  %v3147_v52 = vand.u32 4294901760, %v7471_v47  ;;  %v1713_v53 = vand.u32 3, %v7405_v38 }
 0x286   :  { %v3138_v45 = vand.u32 4294901760, %v3084_v26  ;;  %v1286_v12 = vmul.f32 %v1285_v27, %v1283_v7  ;;  %v4083_v35 = vmin.u32 %v1373_v3, %v7466_v13  ;;  %v7477_v24 = vmul.f32 %v1618_v5, %v1618_v5  ;;  %v9585_v7 = vld [vmem:[#allocation20_spill] sm:$0xff] }
 0x287   :  { %v2939_v55 = vsub.s32 32, %v7412_v37  ;;  %v2943_v34 = vsub.s32 4294967266, %v7412_v37  ;;  %vm1309_vm6 = vcmp.lt.s32.totalorder %v9566_v9, 0  ;;  %v7485_v48 = vsub.f32 %v7471_v47, %v3147_v52 }
 0x288   :  { %v7489_v38 = vpack.c.bf16 %v3138_v45, %v3135_v43  ;;  %v7491_v39 = vsub.f32 %v3084_v26, %v3138_v45  ;;  %v1287_v21 = vxor.u32 2147483648, %v1286_v12  ;;  %v1375_v51 = vclz %v4083_v35 }
 0x289   :  { %v7493_v60 = vand.u32 3, %v1296_v0  ;;  %v1363_v54 = vadd.s32 %v7394_v57, %v7371_v30  ;;  %v1393_v59 = vsub.s32 4, %v7451_v50  ;;  %v3150_v29 = vand.u32 4294901760, %v7477_v24 }
 0x28a   :  { %9579 = vst [vmem:[#allocation79_spill] sm:$0xff] %v7489_v38  ;;  %4164 = vmatpush1.bf16.msra.mxu1 %v7489_v38  ;;  %4290 = vmatpush1.bf16.msra.mxu0 %v7489_v38  ;;  %v1288_v42 = vsel %vm1205_vm11, %v1287_v21, %v1286_v12  ;;  %v9580_v43 = vand.u32 2147483647, %v9566_v9  ;;  %v4084_v18 = vadd.s32 4294967294, %v1375_v51  ;;  %vm1714_vm14 = vcmp.lt.s32.totalorder %v1713_v53, 2 }
 0x28b   :  { %v1716_v30 = vxor.u32 2147483648, %v7256_v41  ;;  %4165 = vmatprep.subr.bf16.mxu1 %v9480_v28  ;;  %4291 = vmatprep.subr.bf16.mxu0 %v9480_v28  ;;  %v1291_v57 = vsel %vm7432_vm3, %v9549_v22, %v1288_v42  ;;  %v7518_v4 = vsub.f32 %v7477_v24, %v3150_v29  ;;  %vm1715_vm11 = vcmp.eq.s32.totalorder %v1713_v53, 0 }
 0x28c   :  { %vm7505_vm0 = vcmp.le.f32.partialorder %v9580_v43, 0.7853982  ;;  %v1719_v25 = vxor.u32 2147483648, %v7251_v36  ;;  %4613 = vcosq.f32 %v1291_v57  ;;  %vm4085_vm2 = vcmp.lt.s32.totalorder %v4084_v18, 0  ;;  %v9587_v43 = vld [vmem:[#allocation61_spill] sm:$0xff] }
 0x28d   :  { %v1717_v63 = vsel %vm1715_vm11, %v7251_v36, %v1716_v30  ;;  %vm1718_vm13 = vcmp.eq.s32.totalorder %v1713_v53, 2  ;;  %4615 = vsinq.f32 %v1291_v57  ;;  %v1378_v6 = vsel %vm4085_vm2, 0, %v4084_v18  ;;  %v9586_v53 = vld [vmem:[#allocation138_spill] sm:$0xff]  ;;  %v9588_v30 = vld [vmem:[#allocation68_spill] sm:$0xff] }
 0x28e   :  { %v1720_v11 = vsel %vm1718_vm13, %v1719_v25, %v7256_v41  ;;  %v1817_v44 = vand.u32 3, %v6191_v46  ;;  %v1379_v2 = vsub.s32 32, %v1378_v6  ;;  %v1383_v19 = vsub.s32 4294967266, %v1378_v6  ;;  %v9584_v46 = vld [vmem:[#allocation117_spill] sm:$0xff] }
 0x28f   :  { %vm1711_vm3 = vweird.f32 %v5788_v1  ;;  %v1721_v62 = vsel %vm1714_vm14, %v1717_v63, %v1720_v11  ;;  %v1380_v58 = vshll.u32 %v7466_v13, %v1378_v6  ;;  %v1394_v40 = vsel %vm1309_vm6, %v1393_v59, %v7451_v50 }
 0x290   :  { %v1722_v36 = vsel %vm1711_vm3, nan, %v1721_v62  ;;  %v1820_v20 = vxor.u32 2147483648, %v9583_v31  ;;  %vm1302_vm1 = vcmp.eq.s32.totalorder %v7493_v60, 2  ;;  %v1381_v41 = vshrl.u32 %v1363_v54, %v1379_v2 }
 0x291   :  { %v1384_v16 = vadd.s32 127, %v1383_v19  ;;  %vm1819_vm7 = vcmp.eq.s32.totalorder %v1817_v44, 0  ;;  %v1823_v26 = vxor.u32 2147483648, %v9584_v46  ;;  %vm1299_vm5 = vcmp.eq.s32.totalorder %v7493_v60, 0 }
 0x292   :  { %v1821_v1 = vsel %vm1819_vm7, %v9584_v46, %v1820_v20  ;;  %vm1822_vm9 = vcmp.eq.s32.totalorder %v1817_v44, 2  ;;  %v7535_v13 = vmul.f32 %v1722_v36, %v1722_v36  ;;  %v1827_v27 = vand.u32 2147483647, %v9585_v7 }
 0x293   :  { %vm1298_vm15 = vcmp.lt.s32.totalorder %v7493_v60, 2  ;;  %v1382_v50 = vor.u32 %v1381_v41, %v1380_v58  ;;  %v1385_v3 = vshll.u32 %v1384_v16, 23  ;;  %vm1818_vm4 = vcmp.lt.s32.totalorder %v1817_v44, 2 }
 0x294   :  { %v1824_v0 = vsel %vm1822_vm9, %v1823_v26, %v9583_v31  ;;  %vm1295_vm14 = vweird.f32 %v9549_v22  ;;  %v1396_v5 = vsel %vm7505_vm0, 0, %v1394_v40  ;;  %vm1815_vm11 = vweird.f32 %v9586_v53  ;;  %v9589_v53 = vld [vmem:[#allocation76_spill] sm:$0xff] }
 0x295   :  { %v1825_v45 = vsel %vm1818_vm4, %v1821_v1, %v1824_v0  ;;  %v3153_v12 = vand.u32 4294901760, %v7535_v13  ;;  %v1386_v35 = vor.u32 4788187, %v1385_v3  ;;  %v1389_v21 = vcvt.s32.f32 %v1382_v50 }
 0x296   :  { %v1826_v51 = vsel %vm1815_vm11, nan, %v1825_v45  ;;  %v1834_v54 = vand.u32 8388607, %v1827_v27  ;;  %v1844_v18 = vshll.u32 %v9344_v49, %v9587_v43  ;;  %v1845_v57 = vshrl.u32 %v9345_v56, %v9588_v30  ;;  %v4614_v25 = vpop.eup %4613 }
 0x297   :  { %v7547_v59 = vmul.f32 %v1826_v51, %v1826_v51  ;;  %v7552_v42 = vsub.f32 %v7535_v13, %v3153_v12  ;;  %v1387_v63 = vand.u32 2147483647, %v1386_v35  ;;  %v1847_v6 = vshll.u32 %v9345_v56, %v9587_v43  ;;  %v4616_v2 = vpop.eup %4615 }
 0x298   :  { %v1848_v11 = vshrl.u32 %v9346_v33, %v9588_v30  ;;  %v1850_v44 = vshll.u32 %v9346_v33, %v9587_v43  ;;  %v1303_v19 = vxor.u32 2147483648, %v4614_v25  ;;  %v1846_v58 = vor.u32 %v1845_v57, %v1844_v18 }
 0x299   :  { %v3156_v62 = vand.u32 4294901760, %v7547_v59  ;;  %v1851_v40 = vshrl.u32 %v9273_v10, %v9588_v30  ;;  %v1300_v36 = vxor.u32 2147483648, %v4616_v2  ;;  %v1390_v31 = vmul.f32 %v1389_v21, %v1387_v63  ;;  %v9593_v63 = vld [vmem:[#allocation83_spill] sm:$0xff] }
 0x29a   :  { %v1400_v20 = vadd.s32 3, %v1396_v5  ;;  %v1849_v41 = vor.u32 %v1848_v11, %v1847_v6  ;;  %v1304_v16 = vsel %vm1302_vm1, %v1303_v19, %v4616_v2  ;;  %v1843_v26 = vshrl.u32 %v9344_v49, %v9588_v30 }
 0x29b   :  { %v7572_v46 = vsub.f32 %v7547_v59, %v3156_v62  ;;  %v1852_v1 = vor.u32 %v1851_v40, %v1850_v44  ;;  %v1301_v50 = vsel %vm1299_vm5, %v4614_v25, %v1300_v36  ;;  %v1391_v3 = vxor.u32 2147483648, %v1390_v31  ;;  %v9592_v25 = vld [vmem:[#allocation92_spill] sm:$0xff] }
 0x29c   :  { %v1835_v0 = vor.u32 8388608, %v1834_v54  ;;  %vm1859_vm2 = vcmp.lt.s32.totalorder %v9589_v53, 1  ;;  %v1305_v5 = vsel %vm1298_vm15, %v1301_v50, %v1304_v16  ;;  %vm1860_vm13 = vcmp.lt.s32.totalorder %v9589_v53, 2  ;;  %v9591_v54 = vld [vmem:[#allocation88_spill] sm:$0xff]  ;;  %v9595_v16 = vld [vmem:[#allocation70_spill] sm:$0xff] }
 0x29d   :  { %vm1861_vm3 = vcmp.lt.s32.totalorder %v9589_v53, 3  ;;  %v1867_v45 = vsel %vm1859_vm2, %v1846_v58, %v1849_v41  ;;  %v1306_v35 = vsel %vm1295_vm14, nan, %v1305_v5  ;;  %v1392_v21 = vsel %vm1309_vm6, %v1391_v3, %v1390_v31  ;;  %v9594_v31 = vld [vmem:[#allocation59_spill] sm:$0xff]  ;;  %v9596_v50 = vld [vmem:[#allocation108_spill] sm:$0xff] }
 0x29e   :  { %vm9590_vm1 = vcmp.lt.s32.totalorder %v9589_v53, 4  ;;  %v1869_v43 = vsel %vm1861_vm3, %v1852_v1, %v9591_v54  ;;  %v1395_v60 = vsel %vm7505_vm0, %v9566_v9, %v1392_v21  ;;  %v7595_v18 = vmul.f32 %v1306_v35, %v1306_v35  ;;  %v9598_v21 = vld [vmem:[#allocation134_spill] sm:$0xff] }
 0x29f   :  { %v1864_v51 = vsel %vm9590_vm1, %v1852_v1, 2102212464  ;;  %v1863_v30 = vsel %vm1859_vm2, %v1843_v26, %v1846_v58  ;;  %v1870_v22 = vsel %vm1860_vm13, %v1867_v45, %v1869_v43  ;;  %4617 = vcosq.f32 %v1395_v60  ;;  %v9597_v45 = vld [vmem:[#allocation129_spill] sm:$0xff] }
 0x2a0   :  { %v1871_v57 = vsel %vm1859_vm2, %v1849_v41, %v1852_v1  ;;  %v1873_v6 = vsel %vm1861_vm3, %v9593_v63, %v9592_v25  ;;  %v1875_v11 = vshll.u32 %v1835_v0, 8  ;;  %4619 = vsinq.f32 %v1395_v60 }
 0x2a1   :  { %v3141_v44 = vand.u32 4294901760, %v7595_v18  ;;  %v1865_v23 = vsel %vm1861_vm3, %v1849_v41, %v1864_v51  ;;  %v1874_v2 = vsel %vm1860_vm13, %v1871_v57, %v1873_v6  ;;  %v2923_v26 = vadd.s32 %v9595_v16, %v9594_v31  ;;  %v9600_v31 = vld [vmem:[#allocation144_spill] sm:$0xff]  ;;  %v9601_v16 = vld [vmem:[#allocation141_spill] sm:$0xff] }
 0x2a2   :  { %v7608_v19 = vmul.u32.u64.low %v1875_v11, %v1874_v2  ;;  %v7609_v58 = vmul.u32.u64.high %v1875_v11, %v1874_v2, %v7608_v19  ;;  %v7611_v40 = vmul.u32.u64.low %v1875_v11, %v1870_v22  ;;  %v7612_v36 = vmul.u32.u64.high %v1875_v11, %v1870_v22, %v7611_v40 }
 0x2a3   :  { %v2940_v1 = vshll.u32 %v6641_v15, %v7412_v37  ;;  %v7622_v41 = vsub.f32 %v7595_v18, %v3141_v44  ;;  %v9198_v3 = vand.u32 2147483647, %v9596_v50  ;;  %v1401_v0 = vand.u32 3, %v1400_v20 }
 0x2a4   :  { %v1866_v5 = vsel %vm1860_vm13, %v1863_v30, %v1865_v23  ;;  %v1948_v35 = vshll.u32 %v9344_v49, %v9597_v45  ;;  %v1949_v51 = vshrl.u32 %v9345_v56, %v9598_v21  ;;  %v2941_v15 = vshrl.u32 %v2923_v26, %v2939_v55  ;;  %v9599_v23 = vld [vmem:[#allocation131_spill] sm:$0xff] }
 0x2a5   :  { %v1938_v54 = vand.u32 8388607, %v9198_v3  ;;  %v1951_v43 = vshll.u32 %v9345_v56, %v9597_v45  ;;  %v1952_v20 = vshrl.u32 %v9346_v33, %v9598_v21  ;;  %v7641_v53 = vadd.s32 127, %v2943_v34 }
 0x2a6   :  { %vm1884_vm6 = vc.u32 %v7609_v58, %v7611_v40  ;;  %v1885_v60 = vadd.s32 1, %v7612_v36  ;;  %v1950_v30 = vor.u32 %v1949_v51, %v1948_v35  ;;  %v1882_v55 = vmul.u32 %v1875_v11, %v1866_v5  ;;  %v9602_v35 = vld [vmem:[#allocation143_spill] sm:$0xff] }
 0x2a7   :  { %v1953_v22 = vor.u32 %v1952_v20, %v1951_v43  ;;  %v1954_v57 = vshll.u32 %v9346_v33, %v9597_v45  ;;  %v1955_v25 = vshrl.u32 %v9273_v10, %v9598_v21  ;;  %vm1399_vm0 = vweird.f32 %v9566_v9 }
 0x2a8   :  { %vm1403_vm7 = vcmp.eq.s32.totalorder %v1401_v0, 0  ;;  %v1886_v37 = vsel %vm1884_vm6, %v1885_v60, %v7612_v36  ;;  %v1939_v34 = vor.u32 8388608, %v1938_v54  ;;  %vm1963_vm5 = vcmp.lt.s32.totalorder %v9599_v23, 1 }
 0x2a9   :  { %v1887_v63 = vadd.s32 %v1886_v37, %v1882_v55  ;;  %v1956_v6 = vor.u32 %v1955_v25, %v1954_v57  ;;  %vm1965_vm9 = vcmp.lt.s32.totalorder %v9599_v23, 3  ;;  %v4618_v11 = vpop.eup %4617  ;;  %vm1406_vm15 = vcmp.eq.s32.totalorder %v1401_v0, 2 }
 0x2aa   :  { %v1947_v2 = vshrl.u32 %v9344_v49, %v9598_v21  ;;  %v1971_v19 = vsel %vm1963_vm5, %v1950_v30, %v1953_v22  ;;  %v1977_v36 = vsel %vm1965_vm9, %v9601_v16, %v9600_v31  ;;  %v4620_v26 = vpop.eup %4619  ;;  %v1407_v5 = vxor.u32 2147483648, %v4618_v11 }
 0x2ab   :  { %v1888_v45 = vadd.s32 536870912, %v1887_v63  ;;  %vm1964_vm4 = vcmp.lt.s32.totalorder %v9599_v23, 2  ;;  %v1973_v51 = vsel %vm1965_vm9, %v1956_v6, %v9602_v35  ;;  %v1404_v54 = vxor.u32 2147483648, %v4620_v26 }
 0x2ac   :  { %vm9603_vm14 = vcmp.lt.s32.totalorder %v9599_v23, 4  ;;  %v1975_v43 = vsel %vm1963_vm5, %v1953_v22, %v1956_v6  ;;  %v1979_v20 = vshll.u32 %v1939_v34, 8  ;;  %v1408_v60 = vsel %vm1406_vm15, %v1407_v5, %v4620_v26 }
 0x2ad   :  { %v1968_v21 = vsel %vm9603_vm14, %v1956_v6, 2102212464  ;;  %v1889_v55 = vshrl.u32 %v1888_v45, 30  ;;  %v1974_v57 = vsel %vm1964_vm4, %v1971_v19, %v1973_v51  ;;  %v1978_v25 = vsel %vm1964_vm4, %v1975_v43, %v1977_v36  ;;  %v9605_v19 = vld [vmem:[#allocation71_spill] sm:$0xff] }
 0x2ae   :  { %vm1402_vm11 = vcmp.lt.s32.totalorder %v1401_v0, 2  ;;  %v1405_v37 = vsel %vm1403_vm7, %v4618_v11, %v1404_v54  ;;  %v7675_v31 = vmul.u32.u64.low %v1979_v20, %v1978_v25  ;;  %v7676_v16 = vmul.u32.u64.high %v1979_v20, %v1978_v25, %v7675_v31 }
 0x2af   :  { %v1409_v35 = vsel %vm1402_vm11, %v1405_v37, %v1408_v60  ;;  %v1890_v3 = vshll.u32 %v1889_v55, 30  ;;  %v1967_v6 = vsel %vm1963_vm5, %v1947_v2, %v1950_v30  ;;  %v1969_v34 = vsel %vm1965_vm9, %v1953_v22, %v1968_v21  ;;  %v9607_v60 = vld [vmem:[#allocation14_spill] sm:$0xff]  ;;  %v9608_v37 = vld [vmem:[#allocation24_spill] sm:$0xff] }
 0x2b0   :  { %v9606_v5 = vsel %vm6195_vm10, 0, %v9605_v19  ;;  %v1410_v0 = vsel %vm1399_vm0, nan, %v1409_v35  ;;  %v7690_v11 = vmul.u32.u64.low %v1979_v20, %v1974_v57  ;;  %v7691_v36 = vmul.u32.u64.high %v1979_v20, %v1974_v57, %v7690_v11 }
 0x2b1   :  { %v7686_v45 = vadd.s32 3, %v9606_v5  ;;  %v3055_v51 = vxor.u32 2147483648, %v7191_v17  ;;  %v7695_v54 = vor.u32 %v2941_v15, %v2940_v1  ;;  %v3086_v30 = vmul.f32 %v1410_v0, %v1410_v0  ;;  %v9609_v15 = vld [vmem:[#allocation30_spill] sm:$0xff] }
 0x2b2   :  { %v7697_v2 = vsub.s32 %v1887_v63, %v1890_v3  ;;  %v2945_v22 = vshll.u32 %v7641_v53, 23  ;;  %v1913_v21 = vsub.s32 4, %v1889_v55  ;;  %v1970_v43 = vsel %vm1964_vm4, %v1967_v6, %v1969_v34 }
 0x2b3   :  { %v2035_v9 = vand.u32 2147483647, %v9607_v60  ;;  %v3144_v25 = vand.u32 4294901760, %v3086_v30  ;;  %vm1988_vm2 = vc.u32 %v7676_v16, %v7690_v11  ;;  %v2052_v1 = vshll.u32 %v9344_v49, %v9608_v37 }
 0x2b4   :  { %v1893_v57 = vsub.s32 0, %v7697_v2  ;;  %v1989_v3 = vadd.s32 1, %v7691_v36  ;;  %v2053_v53 = vshrl.u32 %v9345_v56, %v9609_v15  ;;  %v2055_v63 = vshll.u32 %v9345_v56, %v9608_v37 }
 0x2b5   :  { %v2056_v23 = vshrl.u32 %v9346_v33, %v9609_v15  ;;  %v7717_v31 = vpack.c.bf16 %v3144_v25, %v3141_v44  ;;  %v7719_v35 = vsub.f32 %v3086_v30, %v3144_v25  ;;  %v7725_v6 = vpack.c.bf16 %v3150_v29, %v3147_v52 }
 0x2b6   :  { %v4103_v34 = vmin.u32 %v1893_v57, %v7697_v2  ;;  %vm1829_vm13 = vcmp.lt.s32.totalorder %v9585_v7, 0  ;;  %v1986_v19 = vmul.u32 %v1979_v20, %v1970_v43  ;;  %v1990_v5 = vsel %vm1988_vm2, %v1989_v3, %v7691_v36  ;;  %v9617_v3 = vld [vmem:[#allocation45_spill] sm:$0xff] }
 0x2b7   :  { %9610 = vst [vmem:[#allocation69_spill] sm:$0xff] %v7717_v31  ;;  %9611 = vst [vmem:[#allocation87_spill] sm:$0xff] %v7725_v6  ;;  %v2058_v18 = vshll.u32 %v9346_v33, %v9608_v37  ;;  %4167 = vmatpush1.bf16.msra.mxu1 %v7717_v31  ;;  %4293 = vmatpush1.bf16.msra.mxu0 %v7717_v31  ;;  %v1914_v47 = vsel %vm1829_vm13, %v1913_v21, %v1889_v55  ;;  %v2042_v52 = vand.u32 8388607, %v2035_v9 }
 0x2b8   :  { %v1895_v44 = vclz %v4103_v34  ;;  %v2054_v24 = vor.u32 %v2053_v53, %v2052_v1  ;;  %v7738_v29 = vor.u32 4788187, %v2945_v22  ;;  %4168 = vmatprep.subr.bf16.mxu1 %v9480_v28  ;;  %4294 = vmatprep.subr.bf16.mxu0 %v9480_v28  ;;  %v1991_v20 = vadd.s32 %v1990_v5, %v1986_v19  ;;  %v9618_v53 = vld [vmem:[#allocation50_spill] sm:$0xff] }
 0x2b9   :  { %v2057_v0 = vor.u32 %v2056_v23, %v2055_v63  ;;  %v2059_v36 = vshrl.u32 %v9273_v10, %v9609_v15  ;;  %v7748_v55 = vpack.c.bf16 %v3156_v62, %v3153_v12  ;;  %vm7752_vm3 = vcmp.le.f32.partialorder %v1827_v27, 0.7853982  ;;  %v9615_v12 = vld [vmem:[#allocation27_spill] sm:$0xff] }
 0x2ba   :  { %v1883_v22 = vadd.s32 %v7611_v40, %v7609_v58  ;;  %v4104_v21 = vadd.s32 4294967294, %v1895_v44  ;;  %v1916_v43 = vsel %vm7752_vm3, 0, %v1914_v47  ;;  %v1992_v25 = vadd.s32 536870912, %v1991_v20  ;;  %v9619_v63 = vld [vmem:[#allocation39_spill] sm:$0xff] }
 0x2bb   :  { %9612 = vst [vmem:[#allocation99_spill] sm:$0xff] %v7748_v55  ;;  %v2051_v13 = vshrl.u32 %v9344_v49, %v9609_v15  ;;  %v2060_v59 = vor.u32 %v2059_v36, %v2058_v18  ;;  %4170 = vmatpush1.bf16.msra.mxu1 %v7725_v6  ;;  %4296 = vmatpush1.bf16.msra.mxu0 %v7725_v6  ;;  %v2043_v27 = vor.u32 8388608, %v2042_v52  ;;  %vm2067_vm6 = vcmp.lt.s32.totalorder %v9615_v12, 1 }
 0x2bc   :  { %vm4105_vm1 = vcmp.lt.s32.totalorder %v4104_v21, 0  ;;  %vm2069_vm0 = vcmp.lt.s32.totalorder %v9615_v12, 3  ;;  %4171 = vmatprep.subr.bf16.mxu1 %v9480_v28  ;;  %4297 = vmatprep.subr.bf16.mxu0 %v9480_v28  ;;  %v1993_v58 = vshrl.u32 %v1992_v25, 30  ;;  %vm9616_vm7 = vcmp.lt.s32.totalorder %v9615_v12, 4 }
 0x2bd   :  { %v1898_v62 = vsel %vm4105_vm1, 0, %v4104_v21  ;;  %v2072_v40 = vsel %vm9616_vm7, %v2060_v59, 2102212464  ;;  %v2075_v57 = vsel %vm2067_vm6, %v2054_v24, %v2057_v0  ;;  %v2077_v15 = vsel %vm2069_vm0, %v2060_v59, %v9617_v3 }
 0x2be   :  { %v1899_v37 = vsub.s32 32, %v1898_v62  ;;  %v1903_v1 = vsub.s32 4294967266, %v1898_v62  ;;  %v2081_v23 = vsel %vm2069_vm0, %v9619_v63, %v9618_v53  ;;  %v1900_v34 = vshll.u32 %v7697_v2, %v1898_v62  ;;  %v9620_v62 = vld [vmem:[#allocation49_spill] sm:$0xff] }
 0x2bf   :  { %v1994_v19 = vshll.u32 %v1993_v58, 30  ;;  %vm2068_vm5 = vcmp.lt.s32.totalorder %v9615_v12, 2  ;;  %v2071_v5 = vsel %vm2067_vm6, %v2051_v13, %v2054_v24  ;;  %4173 = vmatpush1.bf16.msra.mxu1 %v7748_v55  ;;  %4299 = vmatpush1.bf16.msra.mxu0 %v7748_v55  ;;  %v2073_v47 = vsel %vm2069_vm0, %v2057_v0, %v2072_v40 }
 0x2c0   :  { %v1901_v18 = vshrl.u32 %v1883_v22, %v1899_v37  ;;  %v1904_v44 = vadd.s32 127, %v1903_v1  ;;  %v2079_v52 = vsel %vm2067_vm6, %v2057_v0, %v2060_v59  ;;  %4174 = vmatprep.subr.bf16.mxu1 %v9480_v28  ;;  %4300 = vmatprep.subr.bf16.mxu0 %v9480_v28  ;;  %v2078_v24 = vsel %vm2068_vm5, %v2075_v57, %v2077_v15 }
 0x2c1   :  { %v7791_v2 = vsub.s32 %v1991_v20, %v1994_v19  ;;  %v2082_v36 = vsel %vm2068_vm5, %v2079_v52, %v2081_v23  ;;  %v2083_v22 = vshll.u32 %v2043_v27, 8  ;;  %v1920_v13 = vadd.s32 3, %v1916_v43 }
 0x2c2   :  { %v1902_v21 = vor.u32 %v1901_v18, %v1900_v34  ;;  %v1905_v25 = vshll.u32 %v1904_v44, 23  ;;  %v9199_v40 = vand.u32 2147483647, %v9620_v62  ;;  %v2017_v59 = vsub.s32 4, %v1993_v58  ;;  %v9621_v44 = vld [vmem:[#allocation94_spill] sm:$0xff] }
 0x2c3   :  { %v1997_v0 = vsub.s32 0, %v7791_v2  ;;  %v7799_v37 = vmul.u32.u64.low %v2083_v22, %v2082_v36  ;;  %v7800_v1 = vmul.u32.u64.high %v2083_v22, %v2082_v36, %v7799_v37  ;;  %v2074_v3 = vsel %vm2068_vm5, %v2071_v5, %v2073_v47 }
 0x2c4   :  { %v1906_v20 = vor.u32 4788187, %v1905_v25  ;;  %v7804_v57 = vmul.u32.u64.low %v2083_v22, %v2078_v24  ;;  %v7805_v15 = vmul.u32.u64.high %v2083_v22, %v2078_v24, %v7804_v57  ;;  %vm1933_vm9 = vcmp.lt.s32.totalorder %v9596_v50, 0  ;;  %v9622_v25 = vld [vmem:[#allocation86_spill] sm:$0xff] }
 0x2c5   :  { %v4107_v53 = vmin.u32 %v1997_v0, %v7791_v2  ;;  %v1909_v23 = vcvt.s32.f32 %v1902_v21  ;;  %v7812_v34 = vand.u32 3, %v1920_v13  ;;  %v1987_v12 = vadd.s32 %v7690_v11, %v7676_v16 }
 0x2c6   :  { %v1907_v63 = vand.u32 2147483647, %v1906_v20  ;;  %v2090_v5 = vmul.u32 %v2083_v22, %v2074_v3  ;;  %v2146_v18 = vand.u32 8388607, %v9199_v40  ;;  %v2157_v47 = vshrl.u32 %v9345_v56, %v9621_v44 }
 0x2c7   :  { %v1999_v19 = vclz %v4107_v53  ;;  %v2018_v24 = vsel %vm1933_vm9, %v2017_v59, %v1993_v58  ;;  %vm2092_vm15 = vc.u32 %v7800_v1, %v7804_v57  ;;  %v2093_v36 = vadd.s32 1, %v7805_v15  ;;  %v9634_v58 = vld [vmem:[#allocation139_spill] sm:$0xff] }
 0x2c8   :  { %v1910_v52 = vmul.f32 %v1909_v23, %v1907_v63  ;;  %v2156_v16 = vshll.u32 %v9344_v49, %v9622_v25  ;;  %v2159_v11 = vshll.u32 %v9345_v56, %v9622_v25  ;;  %v2160_v22 = vshrl.u32 %v9346_v33, %v9621_v44 }
 0x2c9   :  { %v4108_v21 = vadd.s32 4294967294, %v1999_v19  ;;  %v9623_v0 = vand.u32 2147483647, %v9596_v50  ;;  %v2094_v59 = vsel %vm2092_vm15, %v2093_v36, %v7805_v15  ;;  %v2162_v37 = vshll.u32 %v9346_v33, %v9622_v25 }
 0x2ca   :  { %v1911_v13 = vxor.u32 2147483648, %v1910_v52  ;;  %v2163_v20 = vshrl.u32 %v9273_v10, %v9621_v44  ;;  %v2095_v3 = vadd.s32 %v2094_v59, %v2090_v5  ;;  %v2147_v53 = vor.u32 8388608, %v2146_v18  ;;  %v9626_v5 = vld [vmem:[#allocation103_spill] sm:$0xff]  ;;  %v9630_v59 = vld [vmem:[#allocation106_spill] sm:$0xff] }
 0x2cb   :  { %vm7833_vm4 = vcmp.le.f32.partialorder %v9623_v0, 0.7853982  ;;  %vm4109_vm14 = vcmp.lt.s32.totalorder %v4108_v21, 0  ;;  %v2158_v63 = vor.u32 %v2157_v47, %v2156_v16  ;;  %v2161_v0 = vor.u32 %v2160_v22, %v2159_v11  ;;  %v9627_v16 = vld [vmem:[#allocation113_spill] sm:$0xff] }
 0x2cc   :  { %v1912_v23 = vsel %vm1829_vm13, %v1911_v13, %v1910_v52  ;;  %v2002_v19 = vsel %vm4109_vm14, 0, %v4108_v21  ;;  %v2164_v40 = vor.u32 %v2163_v20, %v2162_v37  ;;  %v2155_v25 = vshrl.u32 %v9344_v49, %v9621_v44 }
 0x2cd   :  { %v1915_v15 = vsel %vm7752_vm3, %v9585_v7, %v1912_v23  ;;  %v2003_v36 = vsub.s32 32, %v2002_v19  ;;  %v2007_v43 = vsub.s32 4294967266, %v2002_v19  ;;  %v2096_v27 = vadd.s32 536870912, %v2095_v3 }
 0x2ce   :  { %4621 = vcosq.f32 %v1915_v15  ;;  %vm2171_vm11 = vcmp.lt.s32.totalorder %v9626_v5, 1  ;;  %vm2173_vm2 = vcmp.lt.s32.totalorder %v9626_v5, 3  ;;  %v2004_v18 = vshll.u32 %v7791_v2, %v2002_v19 }
 0x2cf   :  { %4623 = vsinq.f32 %v1915_v15  ;;  %v2005_v47 = vshrl.u32 %v1987_v12, %v2003_v36  ;;  %v2008_v52 = vadd.s32 127, %v2007_v43  ;;  %v2097_v21 = vshrl.u32 %v2096_v27, 30  ;;  %v9629_v43 = vld [vmem:[#allocation114_spill] sm:$0xff] }
 0x2d0   :  { %vm2172_vm13 = vcmp.lt.s32.totalorder %v9626_v5, 2  ;;  %v2179_v30 = vsel %vm2171_vm11, %v2158_v63, %v2161_v0  ;;  %v2181_v44 = vsel %vm2173_vm2, %v2164_v40, %v9627_v16  ;;  %vm9628_vm3 = vcmp.lt.s32.totalorder %v9626_v5, 4 }
 0x2d1   :  { %v2006_v11 = vor.u32 %v2005_v47, %v2004_v18  ;;  %v2009_v22 = vshll.u32 %v2008_v52, 23  ;;  %v2176_v13 = vsel %vm9628_vm3, %v2164_v40, 2102212464  ;;  %v2183_v2 = vsel %vm2171_vm11, %v2161_v0, %v2164_v40 }
 0x2d2   :  { %v2098_v12 = vshll.u32 %v2097_v21, 30  ;;  %v2182_v27 = vsel %vm2172_vm13, %v2179_v30, %v2181_v44  ;;  %v2185_v37 = vsel %vm2173_vm2, %v9630_v59, %v9629_v43  ;;  %v2187_v20 = vshll.u32 %v2147_v53, 8 }
 0x2d3   :  { %v2010_v23 = vor.u32 4788187, %v2009_v22  ;;  %v2020_v19 = vsel %vm7833_vm4, 0, %v2018_v24  ;;  %v2175_v15 = vsel %vm2171_vm11, %v2155_v25, %v2158_v63  ;;  %v2186_v40 = vsel %vm2172_vm13, %v2183_v2, %v2185_v37 }
 0x2d4   :  { %v7874_v36 = vsub.s32 %v2095_v3, %v2098_v12  ;;  %v2177_v18 = vsel %vm2173_vm2, %v2161_v0, %v2176_v13  ;;  %v7878_v47 = vmul.u32.u64.low %v2187_v20, %v2186_v40  ;;  %v7879_v52 = vmul.u32.u64.high %v2187_v20, %v2186_v40, %v7878_v47 }
 0x2d5   :  { %v2011_v30 = vand.u32 2147483647, %v2010_v23  ;;  %v2013_v53 = vcvt.s32.f32 %v2006_v11  ;;  %v7881_v16 = vmul.u32.u64.low %v2187_v20, %v2182_v27  ;;  %v7882_v44 = vmul.u32.u64.high %v2187_v20, %v2182_v27, %v7881_v16 }
 0x2d6   :  { %vm1919_vm1 = vweird.f32 %v9585_v7  ;;  %vm2037_vm6 = vcmp.lt.s32.totalorder %v9607_v60, 0  ;;  %v2101_v24 = vsub.s32 0, %v7874_v36  ;;  %v2121_v3 = vsub.s32 4, %v2097_v21 }
 0x2d7   :  { %v2014_v63 = vmul.f32 %v2013_v53, %v2011_v30  ;;  %v2024_v25 = vadd.s32 3, %v2020_v19  ;;  %vm7890_vm0 = vcmp.le.f32.partialorder %v2035_v9, 0.7853982  ;;  %v2178_v11 = vsel %vm2172_vm13, %v2175_v15, %v2177_v18 }
 0x2d8   :  { %v4622_v22 = vpop.eup %4621  ;;  %vm1922_vm7 = vcmp.lt.s32.totalorder %v7812_v34, 2  ;;  %vm1923_vm5 = vcmp.eq.s32.totalorder %v7812_v34, 0  ;;  %v4111_v13 = vmin.u32 %v2101_v24, %v7874_v36  ;;  %vm2196_vm15 = vc.u32 %v7879_v52, %v7881_v16  ;;  %v9633_v24 = vld [vmem:[#allocation11_spill] sm:$0xff] }
 0x2d9   :  { %v4624_v2 = vpop.eup %4623  ;;  %vm1926_vm14 = vcmp.eq.s32.totalorder %v7812_v34, 2  ;;  %v1927_v9 = vxor.u32 2147483648, %v4622_v22  ;;  %v2015_v12 = vxor.u32 2147483648, %v2014_v63  ;;  %v2197_v27 = vadd.s32 1, %v7882_v44 }
 0x2da   :  { %v1924_v43 = vxor.u32 2147483648, %v4624_v2  ;;  %v2103_v5 = vclz %v4111_v13  ;;  %v2122_v59 = vsel %vm2037_vm6, %v2121_v3, %v2097_v21  ;;  %v2194_v37 = vmul.u32 %v2187_v20, %v2178_v11 }
 0x2db   :  { %v1928_v23 = vsel %vm1926_vm14, %v1927_v9, %v4624_v2  ;;  %v2016_v19 = vsel %vm1933_vm9, %v2015_v12, %v2014_v63  ;;  %v7907_v15 = vand.u32 3, %v2024_v25  ;;  %v2198_v40 = vsel %vm2196_vm15, %v2197_v27, %v7882_v44 }
 0x2dc   :  { %v1925_v18 = vsel %vm1923_vm5, %v4622_v22, %v1924_v43  ;;  %v2019_v47 = vsel %vm7833_vm4, %v9596_v50, %v2016_v19  ;;  %v4112_v30 = vadd.s32 4294967294, %v2103_v5  ;;  %v2199_v53 = vadd.s32 %v2198_v40, %v2194_v37 }
 0x2dd   :  { %v1929_v21 = vsel %vm1922_vm7, %v1925_v18, %v1928_v23  ;;  %4625 = vcosq.f32 %v2019_v47  ;;  %v2124_v20 = vsel %vm7890_vm0, 0, %v2122_v59  ;;  %v9200_v3 = vand.u32 2147483647, %v9633_v24  ;;  %v9639_v23 = vld [vmem:[#allocation65_spill] sm:$0xff] }
 0x2de   :  { %v1930_v44 = vsel %vm1919_vm1, nan, %v1929_v21  ;;  %4627 = vsinq.f32 %v2019_v47  ;;  %vm4113_vm9 = vcmp.lt.s32.totalorder %v4112_v30, 0  ;;  %v2200_v63 = vadd.s32 536870912, %v2199_v53 }
 0x2df   :  { %vm9635_vm4 = vcmp.lt.s32.totalorder %v9634_v58, 0  ;;  %v9636_v34 = vand.u32 2147483647, %v7738_v29  ;;  %v9637_v11 = vcvt.s32.f32 %v7695_v54  ;;  %v7935_v13 = vmul.f32 %v1930_v44, %v1930_v44 }
 0x2e0   :  { %v7927_v25 = vsel %vm9635_vm4, %v3055_v51, %v7191_v17  ;;  %v2106_v7 = vsel %vm4113_vm9, 0, %v4112_v30  ;;  %v2091_v2 = vadd.s32 %v7804_v57, %v7800_v1  ;;  %vm2141_vm11 = vcmp.lt.s32.totalorder %v9620_v62, 0  ;;  %v9638_v57 = vld [vmem:[#allocation74_spill] sm:$0xff] }
 0x2e1   :  { %v7933_v22 = vmul.f32 %v9637_v11, %v9636_v34  ;;  %v2107_v9 = vsub.s32 32, %v2106_v7  ;;  %v2111_v12 = vsub.s32 4294967266, %v2106_v7  ;;  %v2201_v27 = vshrl.u32 %v2200_v63, 30 }
 0x2e2   :  { %vm2030_vm2 = vcmp.eq.s32.totalorder %v7907_v15, 2  ;;  %v9201_v17 = vand.u32 4294901760, %v7935_v13  ;;  %v2108_v51 = vshll.u32 %v7874_v36, %v2106_v7  ;;  %v2128_v54 = vadd.s32 3, %v2124_v20 }
 0x2e3   :  { %v2250_v29 = vand.u32 8388607, %v9200_v3  ;;  %vm2027_vm13 = vcmp.eq.s32.totalorder %v7907_v15, 0  ;;  %v2109_v43 = vshrl.u32 %v2091_v2, %v2107_v9  ;;  %v2112_v5 = vadd.s32 127, %v2111_v12 }
 0x2e4   :  { %v2202_v1 = vshll.u32 %v2201_v27, 30  ;;  %v2264_v59 = vshrl.u32 %v9346_v33, %v9638_v57  ;;  %vm2026_vm3 = vcmp.lt.s32.totalorder %v7907_v15, 2  ;;  %v7952_v37 = vsub.f32 %v7935_v13, %v9201_v17 }
 0x2e5   :  { %v2261_v36 = vshrl.u32 %v9345_v56, %v9638_v57  ;;  %v2263_v19 = vshll.u32 %v9345_v56, %v9639_v23  ;;  %v2267_v40 = vshrl.u32 %v9273_v10, %v9638_v57  ;;  %vm2023_vm1 = vweird.f32 %v9596_v50 }
 0x2e6   :  { %v2110_v18 = vor.u32 %v2109_v43, %v2108_v51  ;;  %v2113_v47 = vshll.u32 %v2112_v5, 23  ;;  %v7961_v30 = vsub.s32 %v2199_v53, %v2202_v1  ;;  %v2266_v21 = vshll.u32 %v9346_v33, %v9639_v23 }
 0x2e7   :  { %v7965_v20 = vand.u32 3, %v2128_v54  ;;  %v2225_v44 = vsub.s32 4, %v2201_v27  ;;  %v2259_v63 = vshrl.u32 %v9344_v49, %v9638_v57  ;;  %v2260_v34 = vshll.u32 %v9344_v49, %v9639_v23  ;;  %v4626_v12 = vpop.eup %4625  ;;  %v9640_v54 = vld [vmem:[#allocation80_spill] sm:$0xff] }
 0x2e8   :  { %v2114_v11 = vor.u32 4788187, %v2113_v47  ;;  %v2205_v7 = vsub.s32 0, %v7961_v30  ;;  %v2265_v2 = vor.u32 %v2264_v59, %v2263_v19  ;;  %v2268_v9 = vor.u32 %v2267_v40, %v2266_v21  ;;  %v4628_v5 = vpop.eup %4627  ;;  %v9641_v40 = vld [vmem:[#allocation93_spill] sm:$0xff] }
 0x2e9   :  { %v2195_v53 = vadd.s32 %v7881_v16, %v7879_v52  ;;  %v2251_v51 = vor.u32 8388608, %v2250_v29  ;;  %v2262_v43 = vor.u32 %v2261_v36, %v2260_v34  ;;  %vm2275_vm7 = vcmp.lt.s32.totalorder %v9640_v54, 1  ;;  %v9643_v34 = vld [vmem:[#allocation85_spill] sm:$0xff] }
 0x2ea   :  { %v2031_v1 = vxor.u32 2147483648, %v4626_v12  ;;  %v2115_v3 = vand.u32 2147483647, %v2114_v11  ;;  %v2117_v57 = vcvt.s32.f32 %v2110_v18  ;;  %v4115_v17 = vmin.u32 %v2205_v7, %v7961_v30 }
 0x2eb   :  { %v2028_v23 = vxor.u32 2147483648, %v4628_v5  ;;  %v7978_v47 = vsel %vm2141_vm11, %v2225_v44, %v2201_v27  ;;  %vm2276_vm5 = vcmp.lt.s32.totalorder %v9640_v54, 2  ;;  %vm2277_vm15 = vcmp.lt.s32.totalorder %v9640_v54, 3  ;;  %v9642_v44 = vld [vmem:[#allocation96_spill] sm:$0xff] }
 0x2ec   :  { %v2032_v52 = vsel %vm2030_vm2, %v2031_v1, %v4628_v5  ;;  %v2118_v16 = vmul.f32 %v2117_v57, %v2115_v3  ;;  %v2207_v29 = vclz %v4115_v17  ;;  %v2287_v59 = vsel %vm2275_vm7, %v2265_v2, %v2268_v9 }
 0x2ed   :  { %v2029_v36 = vsel %vm2027_vm13, %v4626_v12, %v2028_v23  ;;  %v2279_v19 = vsel %vm2275_vm7, %v2259_v63, %v2262_v43  ;;  %v2283_v27 = vsel %vm2275_vm7, %v2262_v43, %v2265_v2  ;;  %v2285_v18 = vsel %vm2277_vm15, %v2268_v9, %v9641_v40 }
 0x2ee   :  { %v2033_v3 = vsel %vm2026_vm3, %v2029_v36, %v2032_v52  ;;  %v2119_v17 = vxor.u32 2147483648, %v2118_v16  ;;  %v4116_v21 = vadd.s32 4294967294, %v2207_v29  ;;  %v2289_v11 = vsel %vm2277_vm15, %v9643_v34, %v9642_v44 }
 0x2ef   :  { %v2034_v63 = vsel %vm2023_vm1, nan, %v2033_v3  ;;  %vm9644_vm14 = vcmp.lt.s32.totalorder %v9640_v54, 4  ;;  %v2290_v12 = vsel %vm2276_vm5, %v2287_v59, %v2289_v11  ;;  %v2291_v43 = vshll.u32 %v2251_v51, 8  ;;  %v9648_v3 = vld [vmem:[#allocation62_spill] sm:$0xff] }
 0x2f0   :  { %v2280_v7 = vsel %vm9644_vm14, %v2268_v9, 2102212464  ;;  %v3092_v5 = vmul.f32 %v2034_v63, %v2034_v63  ;;  %v2120_v15 = vsel %vm2037_vm6, %v2119_v17, %v2118_v16  ;;  %vm4117_vm9 = vcmp.lt.s32.totalorder %v4116_v21, 0  ;;  %v9652_v63 = vld [vmem:[#allocation132_spill] sm:$0xff] }
 0x2f1   :  { %v2286_v1 = vsel %vm2276_vm5, %v2283_v27, %v2285_v18  ;;  %v2123_v50 = vsel %vm7890_vm0, %v9607_v60, %v2120_v15  ;;  %v2210_v57 = vsel %vm4117_vm9, 0, %v4116_v21  ;;  %v2281_v51 = vsel %vm2277_vm15, %v2265_v2, %v2280_v7 }
 0x2f2   :  { %v8014_v23 = vmul.u32.u64.low %v2291_v43, %v2290_v12  ;;  %v8015_v52 = vmul.u32.u64.high %v2291_v43, %v2290_v12, %v8014_v23  ;;  %v3162_v9 = vand.u32 4294901760, %v3092_v5  ;;  %4629 = vcosq.f32 %v2123_v50  ;;  %v9653_v12 = vld [vmem:[#allocation147_spill] sm:$0xff] }
 0x2f3   :  { %v2211_v29 = vsub.s32 32, %v2210_v57  ;;  %4631 = vsinq.f32 %v2123_v50  ;;  %v2215_v16 = vsub.s32 4294967266, %v2210_v57  ;;  %v9645_v27 = vand.u32 4294901760, %v7935_v13 }
 0x2f4   :  { %v8019_v59 = vmul.u32.u64.low %v2291_v43, %v2286_v1  ;;  %v8020_v36 = vmul.u32.u64.high %v2291_v43, %v2286_v1, %v8019_v59  ;;  %v8027_v40 = vsub.f32 %v3092_v5, %v3162_v9  ;;  %v9202_v17 = vand.u32 2147483647, %v9648_v3  ;;  %v9654_v1 = vld [vmem:[#allocation145_spill] sm:$0xff] }
 0x2f5   :  { %v8025_v0 = vpack.c.bf16 %v3162_v9, %v9645_v27  ;;  %v2213_v18 = vshrl.u32 %v2195_v53, %v2211_v29  ;;  %v9649_v21 = vand.u32 2147483647, %v9620_v62  ;;  %v2212_v2 = vshll.u32 %v7961_v30, %v2210_v57 }
 0x2f6   :  { %9647 = vst [vmem:[#allocation98_spill] sm:$0xff] %v8027_v40  ;;  %v2216_v34 = vadd.s32 127, %v2215_v16  ;;  %v2282_v11 = vsel %vm2276_vm5, %v2279_v19, %v2281_v51  ;;  %vm2300_vm0 = vc.u32 %v8015_v52, %v8019_v59  ;;  %vm2131_vm4 = vcmp.eq.s32.totalorder %v7965_v20, 0 }
 0x2f7   :  { %9646 = vst [vmem:[#allocation89_spill] sm:$0xff] %v8025_v0  ;;  %vm8032_vm6 = vcmp.le.f32.partialorder %v9649_v21, 0.7853982  ;;  %4176 = vmatpush1.bf16.msra.mxu1 %v8025_v0  ;;  %4302 = vmatpush1.bf16.msra.mxu0 %v8025_v0  ;;  %v2214_v30 = vor.u32 %v2213_v18, %v2212_v2  ;;  %v2301_v19 = vadd.s32 1, %v8020_v36  ;;  %v2365_v5 = vshrl.u32 %v9345_v56, %v9653_v12  ;;  %v9655_v18 = vld [vmem:[#allocation149_spill] sm:$0xff] }
 0x2f8   :  { %v2228_v53 = vsel %vm8032_vm6, 0, %v7978_v47  ;;  %4177 = vmatprep.subr.bf16.mxu1 %v9480_v28  ;;  %4303 = vmatprep.subr.bf16.mxu0 %v9480_v28  ;;  %v2217_v54 = vshll.u32 %v2216_v34, 23  ;;  %vm2130_vm2 = vcmp.lt.s32.totalorder %v7965_v20, 2  ;;  %v2298_v15 = vmul.u32 %v2291_v43, %v2282_v11 }
 0x2f9   :  { %v2354_v47 = vand.u32 8388607, %v9202_v17  ;;  %v2364_v50 = vshll.u32 %v9344_v49, %v9654_v1  ;;  %v2368_v57 = vshrl.u32 %v9346_v33, %v9653_v12  ;;  %vm2127_vm13 = vweird.f32 %v9607_v60 }
 0x2fa   :  { %vm2134_vm3 = vcmp.eq.s32.totalorder %v7965_v20, 2  ;;  %v2218_v23 = vor.u32 4788187, %v2217_v54  ;;  %v2302_v9 = vsel %vm2300_vm0, %v2301_v19, %v8020_v36  ;;  %v2367_v43 = vshll.u32 %v9345_v56, %v9654_v1 }
 0x2fb   :  { %v2303_v29 = vadd.s32 %v2302_v9, %v2298_v15  ;;  %v2366_v51 = vor.u32 %v2365_v5, %v2364_v50  ;;  %v2370_v16 = vshll.u32 %v9346_v33, %v9654_v1  ;;  %v2371_v27 = vshrl.u32 %v9273_v10, %v9653_v12  ;;  %v9656_v1 = vld [vmem:[#allocation146_spill] sm:$0xff] }
 0x2fc   :  { %vm2869_vm1 = vcmp.lt.s32.totalorder %v9655_v18, 0  ;;  %v2219_v21 = vand.u32 2147483647, %v2218_v23  ;;  %v2221_v2 = vcvt.s32.f32 %v2214_v30  ;;  %v2232_v34 = vadd.s32 3, %v2228_v53  ;;  %v4630_v54 = vpop.eup %4629 }
 0x2fd   :  { %v2369_v11 = vor.u32 %v2368_v57, %v2367_v43  ;;  %v2304_v17 = vadd.s32 536870912, %v2303_v29  ;;  %v2355_v36 = vor.u32 8388608, %v2354_v47  ;;  %v2363_v19 = vshrl.u32 %v9344_v49, %v9653_v12  ;;  %v4632_v5 = vpop.eup %4631 }
 0x2fe   :  { %v2372_v15 = vor.u32 %v2371_v27, %v2370_v16  ;;  %v2135_v50 = vxor.u32 2147483648, %v4630_v54  ;;  %v2222_v9 = vmul.f32 %v2221_v2, %v2219_v21  ;;  %vm2379_vm7 = vcmp.lt.s32.totalorder %v9656_v1, 1  ;;  %v9662_v2 = vld [vmem:[#allocation152_spill] sm:$0xff] }
 0x2ff   :  { %vm2380_vm5 = vcmp.lt.s32.totalorder %v9656_v1, 2  ;;  %v9657_v13 = vand.u32 2147483647, %v9655_v18  ;;  %v2132_v53 = vxor.u32 2147483648, %v4632_v5  ;;  %v2305_v57 = vshrl.u32 %v2304_v17, 30  ;;  %v9661_v17 = vld [vmem:[#allocation150_spill] sm:$0xff] }
 0x300   :  { %vm2381_vm14 = vcmp.lt.s32.totalorder %v9656_v1, 3  ;;  %v2383_v12 = vsel %vm2379_vm7, %v2363_v19, %v2366_v51  ;;  %v2136_v47 = vsel %vm2134_vm3, %v2135_v50, %v4632_v5  ;;  %v2223_v23 = vxor.u32 2147483648, %v2222_v9  ;;  %v9663_v19 = vld [vmem:[#allocation148_spill] sm:$0xff] }
 0x301   :  { %vm8080_vm15 = vcmp.le.f32.partialorder %v9657_v13, 0.7853982  ;;  %vm9660_vm9 = vcmp.lt.s32.totalorder %v9656_v1, 4  ;;  %v2387_v13 = vsel %vm2379_vm7, %v2366_v51, %v2369_v11  ;;  %v2133_v16 = vsel %vm2131_vm4, %v4630_v54, %v2132_v53 }
 0x302   :  { %v2384_v43 = vsel %vm9660_vm9, %v2372_v15, 2102212464  ;;  %v2306_v27 = vshll.u32 %v2305_v57, 30  ;;  %v2389_v21 = vsel %vm2381_vm14, %v2372_v15, %v9661_v17  ;;  %v2393_v5 = vsel %vm2381_vm14, %v9663_v19, %v9662_v2 }
 0x303   :  { %v2137_v50 = vsel %vm2130_vm2, %v2133_v16, %v2136_v47  ;;  %v2224_v7 = vsel %vm2141_vm11, %v2223_v23, %v2222_v9  ;;  %v2391_v51 = vsel %vm2379_vm7, %v2369_v11, %v2372_v15  ;;  %v2395_v54 = vshll.u32 %v2355_v36, 8 }
 0x304   :  { %v2138_v53 = vsel %vm2127_vm13, nan, %v2137_v50  ;;  %v2227_v17 = vsel %vm8032_vm6, %v9620_v62, %v2224_v7  ;;  %v8113_v0 = vsub.s32 %v2303_v29, %v2306_v27  ;;  %v2385_v20 = vsel %vm2381_vm14, %v2369_v11, %v2384_v43  ;;  %v9670_v50 = vld [vmem:[#allocation9_spill] sm:$0xff] }
 0x305   :  { %4633 = vcosq.f32 %v2227_v17  ;;  %v8117_v47 = vmul.f32 %v2138_v53, %v2138_v53  ;;  %v2390_v9 = vsel %vm2380_vm5, %v2387_v13, %v2389_v21  ;;  %v2394_v36 = vsel %vm2380_vm5, %v2391_v51, %v2393_v5 }
 0x306   :  { %v9664_v60 = vsub.s32 4, %v9652_v63  ;;  %4635 = vsinq.f32 %v2227_v17  ;;  %v2233_v7 = vand.u32 3, %v2232_v34  ;;  %v2309_v29 = vsub.s32 0, %v8113_v0 }
 0x307   :  { %v9204_v11 = vand.u32 4294901760, %v8117_v47  ;;  %v2329_v15 = vsub.s32 4, %v2305_v57  ;;  %v8132_v23 = vmul.u32.u64.low %v2395_v54, %v2394_v36  ;;  %v8133_v43 = vmul.u32.u64.high %v2395_v54, %v2394_v36, %v8132_v23  ;;  %v9672_v36 = vld [vmem:[#allocation46_spill] sm:$0xff] }
 0x308   :  { %v8128_v44 = vsel %vm2869_vm1, %v9664_v60, %v9652_v63  ;;  %v4119_v13 = vmin.u32 %v2309_v29, %v8113_v0  ;;  %v2386_v16 = vsel %vm2380_vm5, %v2383_v12, %v2385_v20  ;;  %v8146_v63 = vsel %vm6195_vm10, %v9634_v58, %v7927_v25  ;;  %v9671_v20 = vld [vmem:[#allocation40_spill] sm:$0xff] }
 0x309   :  { %v8138_v27 = vmul.u32.u64.low %v2395_v54, %v2390_v9  ;;  %v8139_v21 = vmul.u32.u64.high %v2395_v54, %v2390_v9, %v8138_v27  ;;  %v9665_v34 = vxor.u32 2147483648, %v7933_v22  ;;  %v8161_v12 = vsub.f32 %v8117_v47, %v9204_v11 }
 0x30a   :  { %vm2235_vm11 = vcmp.eq.s32.totalorder %v2233_v7, 0  ;;  %v9667_v26 = vand.u32 2147483647, %v9633_v24  ;;  %vm2245_vm6 = vcmp.lt.s32.totalorder %v9633_v24, 0  ;;  %vm2234_vm0 = vcmp.lt.s32.totalorder %v2233_v7, 2 }
 0x30b   :  { %v8153_v2 = vsel %vm2869_vm1, %v9665_v34, %v7933_v22  ;;  %9666 = vst [vmem:[#allocation15_spill] sm:$0xff] %v8161_v12  ;;  %v2311_v22 = vclz %v4119_v13  ;;  %v2330_v19 = vsel %vm2245_vm6, %v2329_v15, %v2305_v57  ;;  %v2402_v5 = vmul.u32 %v2395_v54, %v2386_v16 }
 0x30c   :  { %vm8165_vm10 = vcmp.le.f32.partialorder %v9667_v26, 0.7853982  ;;  %vm2404_vm4 = vc.u32 %v8133_v43, %v8138_v27  ;;  %v9211_v51 = vand.u32 2147483647, %v9670_v50  ;;  %vm2231_vm2 = vweird.f32 %v9620_v62 }
 0x30d   :  { %v4120_v53 = vadd.s32 4294967294, %v2311_v22  ;;  %v2405_v17 = vadd.s32 1, %v8139_v21  ;;  %v2468_v9 = vshll.u32 %v9344_v49, %v9671_v20  ;;  %v2469_v60 = vshrl.u32 %v9345_v56, %v9672_v36 }
 0x30e   :  { %v2471_v57 = vshll.u32 %v9345_v56, %v9671_v20  ;;  %v2472_v54 = vshrl.u32 %v9346_v33, %v9672_v36  ;;  %v2474_v29 = vshll.u32 %v9346_v33, %v9671_v20  ;;  %v2475_v15 = vshrl.u32 %v9273_v10, %v9672_v36 }
 0x30f   :  { %vm2238_vm13 = vcmp.eq.s32.totalorder %v2233_v7, 2  ;;  %v2299_v23 = vadd.s32 %v8019_v59, %v8015_v52  ;;  %vm4121_vm3 = vcmp.lt.s32.totalorder %v4120_v53, 0  ;;  %v2406_v13 = vsel %vm2404_vm4, %v2405_v17, %v8139_v21  ;;  %v4634_v16 = vpop.eup %4633 }
 0x310   :  { %v2314_v34 = vsel %vm4121_vm3, 0, %v4120_v53  ;;  %v2332_v26 = vsel %vm8165_vm10, 0, %v2330_v19  ;;  %v2407_v22 = vadd.s32 %v2406_v13, %v2402_v5  ;;  %v2458_v1 = vand.u32 8388607, %v9211_v51  ;;  %v4636_v20 = vpop.eup %4635 }
 0x311   :  { %v2239_v11 = vxor.u32 2147483648, %v4634_v16  ;;  %v2315_v55 = vsub.s32 32, %v2314_v34  ;;  %v2319_v6 = vsub.s32 4294967266, %v2314_v34  ;;  %v2470_v31 = vor.u32 %v2469_v60, %v2468_v9 }
 0x312   :  { %v2236_v38 = vxor.u32 2147483648, %v4636_v20  ;;  %v2408_v14 = vadd.s32 536870912, %v2407_v22  ;;  %v2473_v52 = vor.u32 %v2472_v54, %v2471_v57  ;;  %v2476_v59 = vor.u32 %v2475_v15, %v2474_v29  ;;  %v9673_v57 = vld [vmem:[#allocation47_spill] sm:$0xff]  ;;  %v9677_v54 = vld [vmem:[#allocation57_spill] sm:$0xff] }
 0x313   :  { %v2240_v21 = vsel %vm2238_vm13, %v2239_v11, %v4636_v20  ;;  %v2316_v53 = vshll.u32 %v8113_v0, %v2314_v34  ;;  %v2317_v17 = vshrl.u32 %v2299_v23, %v2315_v55  ;;  %v2320_v12 = vadd.s32 127, %v2319_v6  ;;  %v9674_v0 = vld [vmem:[#allocation63_spill] sm:$0xff] }
 0x314   :  { %v2237_v19 = vsel %vm2235_vm11, %v4634_v16, %v2236_v38  ;;  %v8199_v5 = vshrl.u32 %v2408_v14, 30  ;;  %v2459_v13 = vor.u32 8388608, %v2458_v1  ;;  %v2467_v51 = vshrl.u32 %v9344_v49, %v9672_v36  ;;  %v9676_v36 = vld [vmem:[#allocation66_spill] sm:$0xff] }
 0x315   :  { %v2241_v9 = vsel %vm2234_vm0, %v2237_v19, %v2240_v21  ;;  %v2318_v60 = vor.u32 %v2317_v17, %v2316_v53  ;;  %v2321_v40 = vshll.u32 %v2320_v12, 23  ;;  %vm2483_vm1 = vcmp.lt.s32.totalorder %v9673_v57, 1 }
 0x316   :  { %v2242_v11 = vsel %vm2231_vm2, nan, %v2241_v9  ;;  %v2410_v55 = vshll.u32 %v8199_v5, 30  ;;  %vm2484_vm7 = vcmp.lt.s32.totalorder %v9673_v57, 2  ;;  %vm2485_vm5 = vcmp.lt.s32.totalorder %v9673_v57, 3 }
 0x317   :  { %v3094_v14 = vmul.f32 %v2242_v11, %v2242_v11  ;;  %v2322_v38 = vor.u32 4788187, %v2321_v40  ;;  %v2491_v6 = vsel %vm2483_vm1, %v2470_v31, %v2473_v52  ;;  %v2493_v7 = vsel %vm2485_vm5, %v2476_v59, %v9674_v0  ;;  %v9681_v0 = vld [vmem:[#allocation29_spill] sm:$0xff] }
 0x318   :  { %v8215_v1 = vsub.s32 %v2407_v22, %v2410_v55  ;;  %vm9675_vm14 = vcmp.lt.s32.totalorder %v9673_v57, 4  ;;  %v2495_v12 = vsel %vm2483_vm1, %v2473_v52, %v2476_v59  ;;  %v2497_v40 = vsel %vm2485_vm5, %v9677_v54, %v9676_v36 }
 0x319   :  { %v2488_v62 = vsel %vm9675_vm14, %v2476_v59, 2102212464  ;;  %v3168_v29 = vand.u32 4294901760, %v3094_v14  ;;  %v2323_v15 = vand.u32 2147483647, %v2322_v38  ;;  %v2325_v23 = vcvt.s32.f32 %v2318_v60 }
 0x31a   :  { %v2498_v16 = vsel %vm2484_vm7, %v2495_v12, %v2497_v40  ;;  %v2336_v34 = vadd.s32 3, %v2332_v26  ;;  %v2413_v22 = vsub.s32 0, %v8215_v1  ;;  %v2494_v20 = vsel %vm2484_vm7, %v2491_v6, %v2493_v7  ;;  %v9685_v40 = vld [vmem:[#allocation107_spill] sm:$0xff] }
 0x31b   :  { %v2499_v21 = vshll.u32 %v2459_v13, 8  ;;  %v9678_v59 = vand.u32 4294901760, %v8117_v47  ;;  %v8234_v17 = vsub.f32 %v3094_v14, %v3168_v29  ;;  %v2326_v19 = vmul.f32 %v2325_v23, %v2323_v15 }
 0x31c   :  { %v2487_v9 = vsel %vm2483_vm1, %v2467_v51, %v2470_v31  ;;  %v4123_v60 = vmin.u32 %v2413_v22, %v8215_v1  ;;  %v2489_v26 = vsel %vm2485_vm5, %v2473_v52, %v2488_v62  ;;  %4637 = vcosq.f32 %v8146_v63 }
 0x31d   :  { %v8232_v53 = vpack.c.bf16 %v3168_v29, %v9678_v59  ;;  %v8241_v11 = vmul.u32.u64.low %v2499_v21, %v2498_v16  ;;  %v8242_v55 = vmul.u32.u64.high %v2499_v21, %v2498_v16, %v8241_v11  ;;  %v2327_v47 = vxor.u32 2147483648, %v2326_v19  ;;  %v9686_v16 = vld [vmem:[#allocation102_spill] sm:$0xff] }
 0x31e   :  { %v8247_v13 = vmul.u32.u64.low %v2499_v21, %v2494_v20  ;;  %v8248_v14 = vmul.u32.u64.high %v2499_v21, %v2494_v20, %v8247_v13  ;;  %4639 = vsinq.f32 %v8146_v63  ;;  %v8256_v31 = vsel %vm8080_vm15, %v9655_v18, %v8153_v2 }
 0x31f   :  { %9679 = vst [vmem:[#allocation55_spill] sm:$0xff] %v8232_v53  ;;  %4179 = vmatpush1.bf16.msra.mxu1 %v8232_v53  ;;  %4305 = vmatpush1.bf16.msra.mxu0 %v8232_v53  ;;  %v9680_v51 = vsel %vm8080_vm15, 0, %v8128_v44  ;;  %v2415_v38 = vclz %v4123_v60  ;;  %v2328_v63 = vsel %vm2245_vm6, %v2327_v47, %v2326_v19  ;;  %v8268_v6 = vand.u32 3, %v2336_v34 }
 0x320   :  { %v8262_v52 = vadd.s32 3, %v9680_v51  ;;  %4180 = vmatprep.subr.bf16.mxu1 %v9480_v28  ;;  %4306 = vmatprep.subr.bf16.mxu0 %v9480_v28  ;;  %vm2349_vm9 = vcmp.lt.s32.totalorder %v9648_v3, 0  ;;  %v2490_v2 = vsel %vm2484_vm7, %v2487_v9, %v2489_v26  ;;  %v2331_v30 = vsel %vm8165_vm10, %v9633_v24, %v2328_v63 }
 0x321   :  { %v4124_v44 = vadd.s32 4294967294, %v2415_v38  ;;  %vm2508_vm15 = vc.u32 %v8242_v55, %v8247_v13  ;;  %v2555_v7 = vand.u32 2147483647, %v9681_v0  ;;  %4641 = vcosq.f32 %v2331_v30 }
 0x322   :  { %v9682_v62 = vand.u32 2147483647, %v9648_v3  ;;  %v2403_v57 = vadd.s32 %v8138_v27, %v8133_v43  ;;  %v2433_v36 = vsub.s32 4, %v8199_v5  ;;  %v2509_v25 = vadd.s32 1, %v8248_v14 }
 0x323   :  { %4643 = vsinq.f32 %v2331_v30  ;;  %vm4125_vm10 = vcmp.lt.s32.totalorder %v4124_v44, 0  ;;  %v2506_v54 = vmul.u32 %v2499_v21, %v2490_v2  ;;  %v2573_v29 = vshrl.u32 %v9345_v56, %v9685_v40  ;;  %v9687_v2 = vld [vmem:[#allocation112_spill] sm:$0xff] }
 0x324   :  { %vm8281_vm11 = vcmp.le.f32.partialorder %v9682_v62, 0.7853982  ;;  %v2418_v15 = vsel %vm4125_vm10, 0, %v4124_v44  ;;  %v2510_v23 = vsel %vm2508_vm15, %v2509_v25, %v8248_v14  ;;  %v2575_v34 = vshll.u32 %v9345_v56, %v9686_v16  ;;  %v9688_v62 = vld [vmem:[#allocation118_spill] sm:$0xff] }
 0x325   :  { %v2576_v22 = vshrl.u32 %v9346_v33, %v9685_v40  ;;  %v2419_v43 = vsub.s32 32, %v2418_v15  ;;  %v2423_v27 = vsub.s32 4294967266, %v2418_v15  ;;  %v2511_v20 = vadd.s32 %v2510_v23, %v2506_v54 }
 0x326   :  { %v2562_v59 = vand.u32 8388607, %v2555_v7  ;;  %v2572_v21 = vshll.u32 %v9344_v49, %v9686_v16  ;;  %v2578_v9 = vshll.u32 %v9346_v33, %v9686_v16  ;;  %v2579_v60 = vshrl.u32 %v9273_v10, %v9685_v40  ;;  %v8305_v14 = vpop.eup %4637 }
 0x327   :  { %v2577_v19 = vor.u32 %v2576_v22, %v2575_v34  ;;  %v2420_v56 = vshll.u32 %v8215_v1, %v2418_v15  ;;  %v2421_v26 = vshrl.u32 %v2403_v57, %v2419_v43  ;;  %v2424_v11 = vadd.s32 127, %v2423_v27  ;;  %v9689_v57 = vld [vmem:[#allocation115_spill] sm:$0xff]  ;;  %v9690_v34 = vld [vmem:[#allocation116_spill] sm:$0xff] }
 0x328   :  { %v2512_v47 = vadd.s32 536870912, %v2511_v20  ;;  %vm2338_vm6 = vcmp.lt.s32.totalorder %v8268_v6, 2  ;;  %v2434_v51 = vsel %vm2349_vm9, %v2433_v36, %v8199_v5  ;;  %v2574_v38 = vor.u32 %v2573_v29, %v2572_v21  ;;  %v8312_v33 = vpop.eup %4639 }
 0x329   :  { %v2580_v63 = vor.u32 %v2579_v60, %v2578_v9  ;;  %vm2587_vm0 = vcmp.lt.s32.totalorder %v9687_v2, 1  ;;  %vm2335_vm4 = vweird.f32 %v9633_v24  ;;  %v2422_v10 = vor.u32 %v2421_v26, %v2420_v56 }
 0x32a   :  { %v2425_v1 = vshll.u32 %v2424_v11, 23  ;;  %v8315_v30 = vshrl.u32 %v2512_v47, 30  ;;  %vm2589_vm2 = vcmp.lt.s32.totalorder %v9687_v2, 3  ;;  %vm2339_vm13 = vcmp.eq.s32.totalorder %v8268_v6, 0 }
 0x32b   :  { %v2563_v44 = vor.u32 8388608, %v2562_v59  ;;  %v2599_v5 = vsel %vm2587_vm0, %v2577_v19, %v2580_v63  ;;  %v2601_v36 = vsel %vm2589_vm2, %v9689_v57, %v9688_v62  ;;  %vm2342_vm3 = vcmp.eq.s32.totalorder %v8268_v6, 2  ;;  %v4642_v15 = vpop.eup %4641 }
 0x32c   :  { %v2426_v25 = vor.u32 4788187, %v2425_v1  ;;  %v2436_v54 = vsel %vm8281_vm11, 0, %v2434_v51  ;;  %v2514_v29 = vshll.u32 %v8315_v30, 30  ;;  %v2429_v23 = vcvt.s32.f32 %v2422_v10 }
 0x32d   :  { %vm2588_vm1 = vcmp.lt.s32.totalorder %v9687_v2, 2  ;;  %v2595_v16 = vsel %vm2587_vm0, %v2574_v38, %v2577_v19  ;;  %v2597_v22 = vsel %vm2589_vm2, %v2580_v63, %v9690_v34  ;;  %v4644_v43 = vpop.eup %4643  ;;  %v2343_v27 = vxor.u32 2147483648, %v4642_v15 }
 0x32e   :  { %v2427_v59 = vand.u32 2147483647, %v2426_v25  ;;  %v8335_v21 = vsub.s32 %v2511_v20, %v2514_v29  ;;  %v2602_v9 = vsel %vm2588_vm1, %v2599_v5, %v2601_v36  ;;  %v2340_v60 = vxor.u32 2147483648, %v4644_v43 }
 0x32f   :  { %v2571_v56 = vshrl.u32 %v9344_v49, %v9685_v40  ;;  %vm9691_vm7 = vcmp.lt.s32.totalorder %v9687_v2, 4  ;;  %v2603_v11 = vshll.u32 %v2563_v44, 8  ;;  %v2344_v47 = vsel %vm2342_vm3, %v2343_v27, %v4644_v43 }
 0x330   :  { %v2592_v26 = vsel %vm9691_vm7, %v2580_v63, 2102212464  ;;  %v2430_v51 = vmul.f32 %v2429_v23, %v2427_v59  ;;  %v2517_v10 = vsub.s32 0, %v8335_v21  ;;  %v2598_v20 = vsel %vm2588_vm1, %v2595_v16, %v2597_v22  ;;  %v9692_v16 = vld [vmem:[#allocation155_spill] sm:$0xff] }
 0x331   :  { %v2341_v1 = vsel %vm2339_vm13, %v4642_v15, %v2340_v60  ;;  %v2591_v5 = vsel %vm2587_vm0, %v2571_v56, %v2574_v38  ;;  %v8352_v49 = vmul.u32.u64.low %v2603_v11, %v2602_v9  ;;  %v8353_v40 = vmul.u32.u64.high %v2603_v11, %v2602_v9, %v8352_v49 }
 0x332   :  { %v2345_v63 = vsel %vm2338_vm6, %v2341_v1, %v2344_v47  ;;  %v2431_v44 = vxor.u32 2147483648, %v2430_v51  ;;  %v4127_v62 = vmin.u32 %v2517_v10, %v8335_v21  ;;  %v2593_v57 = vsel %vm2589_vm2, %v2577_v19, %v2592_v26 }
 0x333   :  { %v2346_v36 = vsel %vm2335_vm4, nan, %v2345_v63  ;;  %v2440_v25 = vadd.s32 3, %v2436_v54  ;;  %v8362_v29 = vmul.u32.u64.low %v2603_v11, %v2598_v20  ;;  %v8363_v15 = vmul.u32.u64.high %v2603_v11, %v2598_v20, %v8362_v29  ;;  %v9698_v63 = vld [vmem:[#allocation81_spill] sm:$0xff] }
 0x334   :  { %v2432_v38 = vsel %vm2349_vm9, %v2431_v44, %v2430_v51  ;;  %v8368_v23 = vmul.f32 %v2346_v36, %v2346_v36  ;;  %v2519_v6 = vclz %v4127_v62  ;;  %v2748_v22 = vsel %vm6004_vm12, 0, %v9692_v16 }
 0x335   :  { %4645 = vcosq.f32 %v8256_v31  ;;  %v2435_v24 = vsel %vm8281_vm11, %v9648_v3, %v2432_v38  ;;  %v2537_v19 = vsub.s32 4, %v8315_v30  ;;  %v2594_v54 = vsel %vm2588_vm1, %v2591_v5, %v2593_v57 }
 0x336   :  { %4647 = vcosq.f32 %v2435_v24  ;;  %v3171_v43 = vand.u32 4294901760, %v8368_v23  ;;  %v4128_v27 = vadd.s32 4294967294, %v2519_v6  ;;  %vm2612_vm5 = vc.u32 %v8353_v40, %v8362_v29 }
 0x337   :  { %4649 = vsinq.f32 %v2435_v24  ;;  %vm2453_vm12 = vcmp.lt.s32.totalorder %v9670_v50, 0  ;;  %v2613_v59 = vadd.s32 1, %v8363_v15  ;;  %v2752_v9 = vadd.s32 3, %v2748_v22 }
 0x338   :  { %v2441_v12 = vand.u32 3, %v2440_v25  ;;  %v8388_v60 = vsub.f32 %v8368_v23, %v3171_v43  ;;  %vm4129_vm14 = vcmp.lt.s32.totalorder %v4128_v27, 0  ;;  %v2610_v2 = vmul.u32 %v2603_v11, %v2594_v54  ;;  %v9699_v25 = vld [vmem:[#allocation154_spill] sm:$0xff]  ;;  %v9707_v23 = vld [vmem:[#allocation109_spill] sm:$0xff] }
 0x339   :  { %v2507_v56 = vadd.s32 %v8247_v13, %v8242_v55  ;;  %v2522_v26 = vsel %vm4129_vm14, 0, %v4128_v27  ;;  %v2538_v47 = vsel %vm2453_vm12, %v2537_v19, %v8315_v30  ;;  %v2614_v51 = vsel %vm2612_vm5, %v2613_v59, %v8363_v15  ;;  %v9697_v55 = vld [vmem:[#allocation121_spill] sm:$0xff] }
 0x33a   :  { %v2523_v10 = vsub.s32 32, %v2522_v26  ;;  %v2527_v20 = vsub.s32 4294967266, %v2522_v26  ;;  %v2615_v1 = vadd.s32 %v2614_v51, %v2610_v2  ;;  %v2753_v5 = vand.u32 3, %v2752_v9 }
 0x33b   :  { %4651 = vsinq.f32 %v8256_v31  ;;  %v9694_v49 = vand.u32 2147483647, %v9670_v50  ;;  %v2756_v13 = vxor.u32 2147483648, %v9697_v55  ;;  %v2759_v44 = vxor.u32 2147483648, %v9698_v63 }
 0x33c   :  { %v2524_v30 = vshll.u32 %v8335_v21, %v2522_v26  ;;  %v2525_v62 = vshrl.u32 %v2507_v56, %v2523_v10  ;;  %v2528_v57 = vadd.s32 127, %v2527_v20  ;;  %v2616_v36 = vadd.s32 536870912, %v2615_v1 }
 0x33d   :  { %vm8399_vm9 = vcmp.le.f32.partialorder %v9694_v49, 0.7853982  ;;  %vm2439_vm15 = vweird.f32 %v9648_v3  ;;  %vm2442_vm11 = vcmp.lt.s32.totalorder %v2441_v12, 2  ;;  %v2852_v38 = vsel %vm5929_vm8, 0, %v9699_v25 }
 0x33e   :  { %v2540_v31 = vsel %vm8399_vm9, 0, %v2538_v47  ;;  %v2526_v6 = vor.u32 %v2525_v62, %v2524_v30  ;;  %v2529_v16 = vshll.u32 %v2528_v57, 23  ;;  %v2617_v34 = vshrl.u32 %v2616_v36, 30  ;;  %v9703_v36 = vld [vmem:[#allocation41_spill] sm:$0xff] }
 0x33f   :  { %vm2755_vm10 = vcmp.eq.s32.totalorder %v2753_v5, 0  ;;  %v8412_v22 = vpop.eup %4645  ;;  %vm2443_vm6 = vcmp.eq.s32.totalorder %v2441_v12, 0  ;;  %vm2446_vm0 = vcmp.eq.s32.totalorder %v2441_v12, 2  ;;  %vm2758_vm4 = vcmp.eq.s32.totalorder %v2753_v5, 2 }
 0x340   :  { %v2757_v21 = vsel %vm2755_vm10, %v9698_v63, %v2756_v13  ;;  %v4648_v24 = vpop.eup %4647  ;;  %v2530_v19 = vor.u32 4788187, %v2529_v16  ;;  %v2618_v54 = vshll.u32 %v2617_v34, 30  ;;  %v2760_v27 = vsel %vm2758_vm4, %v2759_v44, %v9697_v55  ;;  %v9705_v16 = vld [vmem:[#allocation124_spill] sm:$0xff] }
 0x341   :  { %v2856_v59 = vadd.s32 3, %v2852_v38  ;;  %v4650_v9 = vpop.eup %4649  ;;  %v2447_v2 = vxor.u32 2147483648, %v4648_v24  ;;  %v2544_v56 = vadd.s32 3, %v2540_v31  ;;  %vm8418_vm8 = vcmp.le.f32.partialorder %v2555_v7, 0.7853982  ;;  %v9704_v31 = vld [vmem:[#allocation48_spill] sm:$0xff] }
 0x342   :  { %vm2754_vm2 = vcmp.lt.s32.totalorder %v2753_v5, 2  ;;  %v2444_v47 = vxor.u32 2147483648, %v4650_v9  ;;  %v2531_v51 = vand.u32 2147483647, %v2530_v19  ;;  %v2533_v10 = vcvt.s32.f32 %v2526_v6 }
 0x343   :  { %v8422_v20 = vsub.s32 %v2615_v1, %v2618_v54  ;;  %v2448_v49 = vsel %vm2446_vm0, %v2447_v2, %v4650_v9  ;;  %vm2557_vm13 = vcmp.lt.s32.totalorder %v9681_v0, 0  ;;  %v2641_v55 = vsub.s32 4, %v2617_v34 }
 0x344   :  { %v2761_v13 = vsel %vm2754_vm2, %v2757_v21, %v2760_v27  ;;  %v2445_v63 = vsel %vm2443_vm6, %v4648_v24, %v2444_v47  ;;  %v2534_v44 = vmul.f32 %v2533_v10, %v2531_v51  ;;  %v2857_v30 = vand.u32 3, %v2856_v59 }
 0x345   :  { %v2621_v7 = vsub.s32 0, %v8422_v20  ;;  %v4652_v62 = vpop.eup %4651  ;;  %v2449_v5 = vsel %vm2442_vm11, %v2445_v63, %v2448_v49  ;;  %v8429_v57 = vand.u32 3, %v2544_v56  ;;  %v2860_v1 = vxor.u32 2147483648, %v9703_v36 }
 0x346   :  { %v2863_v25 = vxor.u32 2147483648, %v9704_v31  ;;  %v2450_v15 = vsel %vm2439_vm15, nan, %v2449_v5  ;;  %v2535_v38 = vxor.u32 2147483648, %v2534_v44  ;;  %vm2751_vm3 = vweird.f32 %v9705_v16 }
 0x347   :  { %v4131_v6 = vmin.u32 %v2621_v7, %v8422_v20  ;;  %v3096_v21 = vmul.f32 %v2450_v15, %v2450_v15  ;;  %v2642_v24 = vsel %vm2557_vm13, %v2641_v55, %v2617_v34  ;;  %v2762_v12 = vsel %vm2751_vm3, nan, %v2761_v13 }
 0x348   :  { %v2961_v19 = vand.u32 3, %v8262_v52  ;;  %v2536_v54 = vsel %vm2453_vm12, %v2535_v38, %v2534_v44  ;;  %vm2859_vm1 = vcmp.eq.s32.totalorder %v2857_v30, 0  ;;  %vm2862_vm7 = vcmp.eq.s32.totalorder %v2857_v30, 2 }
 0x349   :  { %v2623_v27 = vclz %v4131_v6  ;;  %v3174_v3 = vand.u32 4294901760, %v3096_v21  ;;  %v2539_v59 = vsel %vm8399_vm9, %v9670_v50, %v2536_v54  ;;  %v2861_v9 = vsel %vm2859_vm1, %v9704_v31, %v2860_v1  ;;  %v28_v31 = vld [vmem:[%s8929_s3 + $0x8] sm:$0xff] }
 0x34a   :  { %v2864_v2 = vsel %vm2862_vm7, %v2863_v25, %v9703_v36  ;;  %4653 = vcosq.f32 %v2539_v59  ;;  %v2644_v52 = vsel %vm8418_vm8, 0, %v2642_v24  ;;  %vm2858_vm5 = vcmp.lt.s32.totalorder %v2857_v30, 2 }
 0x34b   :  { %v4132_v34 = vadd.s32 4294967294, %v2623_v27  ;;  %v8451_v56 = vpack.c.bf16 %v3174_v3, %v3171_v43  ;;  %v8453_v47 = vsub.f32 %v3096_v21, %v3174_v3  ;;  %4655 = vsinq.f32 %v2539_v59 }
 0x34c   :  { %v2964_v51 = vxor.u32 2147483648, %v4652_v62  ;;  %v2611_v11 = vadd.s32 %v8362_v29, %v8353_v40  ;;  %v2865_v10 = vsel %vm2858_vm5, %v2861_v9, %v2864_v2  ;;  %v2967_v49 = vxor.u32 2147483648, %v8412_v22 }
 0x34d   :  { %9706 = vst [vmem:[#allocation52_spill] sm:$0xff] %v8451_v56  ;;  %vm4133_vm12 = vcmp.lt.s32.totalorder %v4132_v34, 0  ;;  %4182 = vmatpush1.bf16.msra.mxu1 %v8451_v56  ;;  %4308 = vmatpush1.bf16.msra.mxu0 %v8451_v56  ;;  %v2648_v13 = vadd.s32 3, %v2644_v52  ;;  %vm2855_vm14 = vweird.f32 %v9707_v23  ;;  %v8461_v43 = vmul.f32 %v2762_v12, %v2762_v12  ;;  %v30_v23 = vld [vmem:[%s8929_s3 + $0x18] sm:$0x1] }
 0x34e   :  { %v2626_v55 = vsel %vm4133_vm12, 0, %v4132_v34  ;;  %4183 = vmatprep.subr.bf16.mxu1 %v9480_v28  ;;  %4309 = vmatprep.subr.bf16.mxu0 %v9480_v28  ;;  %vm2963_vm9 = vcmp.eq.s32.totalorder %v2961_v19, 0  ;;  %vm2966_vm15 = vcmp.eq.s32.totalorder %v2961_v19, 2  ;;  %vm2547_vm11 = vcmp.eq.s32.totalorder %v8429_v57, 0 }
 0x34f   :  { %v2627_v63 = vsub.s32 32, %v2626_v55  ;;  %v2631_v40 = vsub.s32 4294967266, %v2626_v55  ;;  %v2628_v29 = vshll.u32 %v8422_v20, %v2626_v55  ;;  %v2866_v44 = vsel %vm2855_vm14, nan, %v2865_v10 }
 0x350   :  { %v2965_v7 = vsel %vm2963_vm9, %v8412_v22, %v2964_v51  ;;  %v2968_v30 = vsel %vm2966_vm15, %v2967_v49, %v4652_v62  ;;  %vm2546_vm10 = vcmp.lt.s32.totalorder %v8429_v57, 2  ;;  %v3065_v1 = vand.u32 3, %v7686_v45  ;;  %v27_v51 = vld [vmem:[%s8929_s3] sm:$0xff] }
 0x351   :  { %v2629_v5 = vshrl.u32 %v2611_v11, %v2627_v63  ;;  %v2632_v36 = vadd.s32 127, %v2631_v40  ;;  %vm3103_vm6 = vcmask 785408   ;;  %vm2550_vm0 = vcmp.eq.s32.totalorder %v8429_v57, 2  ;;  %v9709_v11 = vld [vmem:[#allocation133_spill] sm:$0xff]  ;;  %v9710_v49 = vld [vmem:[#allocation12_spill] sm:$0xff] }
 0x352   :  { %vm2962_vm4 = vcmp.lt.s32.totalorder %v2961_v19, 2  ;;  %v3068_v20 = vxor.u32 2147483648, %v8312_v33  ;;  %v3071_v25 = vxor.u32 2147483648, %v8305_v14  ;;  %vm2959_vm2 = vweird.f32 %v9655_v18 }
 0x353   :  { %v2630_v22 = vor.u32 %v2629_v5, %v2628_v29  ;;  %v2633_v62 = vshll.u32 %v2632_v36, 23  ;;  %v2969_v15 = vsel %vm2962_vm4, %v2965_v7, %v2968_v30  ;;  %vm2543_vm3 = vweird.f32 %v9670_v50 }
 0x354   :  { %v8478_v45 = vand.u32 3, %v2648_v13  ;;  %v8480_v38 = vmul.f32 %v2866_v44, %v2866_v44  ;;  %v3105_v16 = vsel %vm3103_vm6, %v28_v31, 0  ;;  %v4654_v21 = vpop.eup %4653  ;;  %vm3067_vm1 = vcmp.eq.s32.totalorder %v3065_v1, 0 }
 0x355   :  { %v2634_v24 = vor.u32 4788187, %v2633_v62  ;;  %vm3070_vm7 = vcmp.eq.s32.totalorder %v3065_v1, 2  ;;  %v8484_v12 = vand.u32 4294901760, %v3105_v16  ;;  %v4656_v19 = vpop.eup %4655  ;;  %v2551_v54 = vxor.u32 2147483648, %v4654_v21  ;;  %v9712_v62 = vld [vmem:[#allocation16_spill] sm:$0xff] }
 0x356   :  { %v2970_v18 = vsel %vm2959_vm2, nan, %v2969_v15  ;;  %v3069_v27 = vsel %vm3067_vm1, %v8305_v14, %v3068_v20  ;;  %v3072_v3 = vsel %vm3070_vm7, %v3071_v25, %v8312_v33  ;;  %v2548_v59 = vxor.u32 2147483648, %v4656_v19 }
 0x357   :  { %v2635_v9 = vand.u32 2147483647, %v2634_v24  ;;  %v2637_v2 = vcvt.s32.f32 %v2630_v22  ;;  %v8489_v34 = vsub.f32 %v3105_v16, %v8484_v12  ;;  %v2552_v52 = vsel %vm2550_vm0, %v2551_v54, %v4656_v19  ;;  %v9713_v19 = vld [vmem:[#allocation22_spill] sm:$0xff] }
 0x358   :  { %vm3066_vm5 = vcmp.lt.s32.totalorder %v3065_v1, 2  ;;  %v3236_v10 = vand.u32 4294901760, %v9709_v11  ;;  %v3243_v14 = vand.u32 4294901760, %v9710_v49  ;;  %v2549_v33 = vsel %vm2547_vm11, %v4654_v21, %v2548_v59 }
 0x359   :  { %9708 = vst [vmem:[#allocation54_spill] sm:$0xff] %v8489_v34  ;;  %v2638_v55 = vmul.f32 %v2637_v2, %v2635_v9  ;;  %v3073_v13 = vsel %vm3066_vm5, %v3069_v27, %v3072_v3  ;;  %v3204_v63 = vand.u32 4294901760, %v8489_v34  ;;  %v2553_v40 = vsel %vm2546_vm10, %v2549_v33, %v2552_v52  ;;  %v9715_v27 = vld [vmem:[#allocation36_spill] sm:$0xff]  ;;  %v9716_v33 = vld [vmem:[#allocation31_spill] sm:$0xff] }
 0x35a   :  { %vm3063_vm12 = vweird.f32 %v9634_v58  ;;  %v3237_v44 = vsub.f32 %v9709_v11, %v3236_v10  ;;  %v8509_v30 = vmul.f32 %v2970_v18, %v2970_v18  ;;  %v8512_v36 = vand.u32 4294901760, %v27_v51 }
 0x35b   :  { %v2639_v7 = vxor.u32 2147483648, %v2638_v55  ;;  %v3205_v5 = vsub.f32 %v8489_v34, %v3204_v63  ;;  %3686 = vmatprep.mubr.f32.mxu0 %v3204_v63  ;;  %v8514_v1 = vsel %vm3063_vm12, nan, %v3073_v13  ;;  %v8517_v31 = vsel %vm3103_vm6, %v30_v23, 0 }
 0x35c   :  { %9711 = vst [vmem:[#allocation72_spill] sm:$0xff] %v8512_v36  ;;  %v3244_v57 = vsub.f32 %v9710_v49, %v3243_v14  ;;  %v8520_v20 = vpack.c.bf16 %v3243_v14, %v3236_v10  ;;  %v2554_v58 = vsel %vm2543_vm3, nan, %v2553_v40  ;;  %v3250_v15 = vand.u32 4294901760, %v9712_v62 }
 0x35d   :  { %v2640_v25 = vsel %vm2557_vm13, %v2639_v7, %v2638_v55  ;;  %v3206_v22 = vand.u32 4294901760, %v3205_v5  ;;  %v3238_v21 = vand.u32 4294901760, %v3237_v44  ;;  %v3257_v54 = vand.u32 4294901760, %v9713_v19 }
 0x35e   :  { %v2643_v16 = vsel %vm8418_vm8, %v9681_v0, %v2640_v25  ;;  %v3245_v24 = vand.u32 4294901760, %v3244_v57  ;;  %v8532_v18 = vsub.f32 %v27_v51, %v8512_v36  ;;  %v3251_v50 = vsub.f32 %v9712_v62, %v3250_v15 }
 0x35f   :  { %4657 = vcosq.f32 %v2643_v16  ;;  %3207 = vmatprep.mubr.f32.mxu1 %v3206_v22  ;;  %v3264_v3 = vand.u32 4294901760, %v9715_v27  ;;  %v8536_v59 = vmul.f32 %v2554_v58, %v2554_v58  ;;  %v3258_v26 = vsub.f32 %v9713_v19, %v3257_v54 }
 0x360   :  { %9714 = vst [vmem:[#allocation73_spill] sm:$0xff] %v8532_v18  ;;  %4659 = vsinq.f32 %v2643_v16  ;;  %v8538_v9 = vpack.c.bf16 %v3245_v24, %v3238_v21  ;;  %v3252_v2 = vand.u32 4294901760, %v3251_v50  ;;  %v8541_v52 = vpack.c.bf16 %v3257_v54, %v3250_v15 }
 0x361   :  { %v3265_v10 = vsub.f32 %v9715_v27, %v3264_v3  ;;  %v3271_v14 = vand.u32 4294901760, %v7097_v8  ;;  %v3259_v51 = vand.u32 4294901760, %v3258_v26  ;;  %v3278_v55 = vand.u32 4294901760, %v9716_v33 }
 0x362   :  { %v3285_v13 = vand.u32 4294901760, %v7296_v61  ;;  %v3292_v23 = vand.u32 4294901760, %v7419_v32  ;;  %vm2654_vm8 = vcmp.eq.s32.totalorder %v8478_v45, 2  ;;  %v3299_v7 = vand.u32 4294901760, %v7491_v39 }
 0x363   :  { %v3266_v63 = vand.u32 4294901760, %v3265_v10  ;;  %v3272_v40 = vsub.f32 %v7097_v8, %v3271_v14  ;;  %v8550_v44 = vpack.c.bf16 %v3271_v14, %v3264_v3  ;;  %vm2651_vm13 = vcmp.eq.s32.totalorder %v8478_v45, 0 }
 0x364   :  { %v8554_v5 = vpack.c.bf16 %v3259_v51, %v3252_v2  ;;  %v3279_v57 = vsub.f32 %v9716_v33, %v3278_v55  ;;  %v3286_v58 = vsub.f32 %v7296_v61, %v3285_v13  ;;  %v8558_v25 = vpack.c.bf16 %v3285_v13, %v3278_v55 }
 0x365   :  { %vm2650_vm14 = vcmp.lt.s32.totalorder %v8478_v45, 2  ;;  %v3273_v22 = vand.u32 4294901760, %v3272_v40  ;;  %v3293_v15 = vsub.f32 %v7419_v32, %v3292_v23  ;;  %v3300_v16 = vsub.f32 %v7491_v39, %v3299_v7 }
 0x366   :  { %v8563_v21 = vpack.c.bf16 %v3299_v7, %v3292_v23  ;;  %vm2647_vm9 = vweird.f32 %v9681_v0  ;;  %v3280_v24 = vand.u32 4294901760, %v3279_v57  ;;  %v3287_v54 = vand.u32 4294901760, %v3286_v58 }
 0x367   :  { %v3306_v50 = vand.u32 4294901760, %v7622_v41  ;;  %v3313_v3 = vand.u32 4294901760, %v7719_v35  ;;  %v8568_v26 = vpack.c.bf16 %v3273_v22, %v3266_v63  ;;  %v3294_v2 = vand.u32 4294901760, %v3293_v15 }
 0x368   :  { %v3301_v10 = vand.u32 4294901760, %v3300_v16  ;;  %v3320_v14 = vand.u32 4294901760, %v7485_v48  ;;  %v8571_v51 = vpack.c.bf16 %v3287_v54, %v3280_v24  ;;  %v3327_v63 = vand.u32 4294901760, %v7518_v4 }
 0x369   :  { %v3307_v55 = vsub.f32 %v7622_v41, %v3306_v50  ;;  %v3314_v13 = vsub.f32 %v7719_v35, %v3313_v3  ;;  %v8575_v23 = vpack.c.bf16 %v3313_v3, %v3306_v50  ;;  %v4658_v40 = vpop.eup %4657  ;;  %v3334_v58 = vand.u32 4294901760, %v7552_v42 }
 0x36a   :  { %v8577_v7 = vpack.c.bf16 %v3301_v10, %v3294_v2  ;;  %v3321_v57 = vsub.f32 %v7485_v48, %v3320_v14  ;;  %v4660_v22 = vpop.eup %4659  ;;  %v2655_v15 = vxor.u32 2147483648, %v4658_v40  ;;  %v3341_v54 = vand.u32 4294901760, %v7572_v46 }
 0x36b   :  { %v3308_v16 = vand.u32 4294901760, %v3307_v55  ;;  %v3315_v24 = vand.u32 4294901760, %v3314_v13  ;;  %v2652_v29 = vxor.u32 2147483648, %v4660_v22  ;;  %v3328_v50 = vsub.f32 %v7518_v4, %v3327_v63 }
 0x36c   :  { %v3322_v6 = vand.u32 4294901760, %v3321_v57  ;;  %v8584_v3 = vpack.c.bf16 %v3327_v63, %v3320_v14  ;;  %v2656_v2 = vsel %vm2654_vm8, %v2655_v15, %v4660_v22  ;;  %v3335_v56 = vsub.f32 %v7552_v42, %v3334_v58  ;;  %v9719_v22 = vld [vmem:[#allocation98_spill] sm:$0xff] }
 0x36d   :  { %v8588_v10 = vpack.c.bf16 %v3315_v24, %v3308_v16  ;;  %v3342_v53 = vsub.f32 %v7572_v46, %v3341_v54  ;;  %v2653_v55 = vsel %vm2651_vm13, %v4658_v40, %v2652_v29  ;;  %v3329_v13 = vand.u32 4294901760, %v3328_v50  ;;  %v9720_v29 = vld [vmem:[#allocation15_spill] sm:$0xff] }
 0x36e   :  { %9717 = vst [vmem:[#allocation64_spill] sm:$0xff] %v8584_v3  ;;  %v8594_v34 = vpack.c.bf16 %v3341_v54, %v3334_v58  ;;  %v3348_v57 = vand.u32 4294901760, %v7952_v37  ;;  %v2657_v14 = vsel %vm2650_vm14, %v2653_v55, %v2656_v2  ;;  %v3336_v63 = vand.u32 4294901760, %v3335_v56 }
 0x36f   :  { %v3343_v36 = vand.u32 4294901760, %v3342_v53  ;;  %v3355_v15 = vand.u32 4294901760, %v9719_v22  ;;  %v2658_v16 = vsel %vm2647_vm9, nan, %v2657_v14  ;;  %v8602_v24 = vpack.c.bf16 %v3329_v13, %v3322_v6 }
 0x370   :  { %9718 = vst [vmem:[#allocation95_spill] sm:$0xff] %v8594_v34  ;;  %v3349_v3 = vsub.f32 %v7952_v37, %v3348_v57  ;;  %v3362_v40 = vand.u32 4294901760, %v9720_v29  ;;  %v8606_v58 = vmul.f32 %v2658_v16, %v2658_v16  ;;  %v9218_v53 = vand.u32 4294901760, %v8536_v59 }
 0x371   :  { %v8608_v54 = vpack.c.bf16 %v3343_v36, %v3336_v63  ;;  %v3356_v45 = vsub.f32 %v9719_v22, %v3355_v15  ;;  %v8611_v50 = vpack.c.bf16 %v3355_v15, %v3348_v57  ;;  %v3369_v0 = vand.u32 4294901760, %v8234_v17 }
 0x372   :  { %v3363_v56 = vsub.f32 %v9720_v29, %v3362_v40  ;;  %v3376_v6 = vand.u32 4294901760, %v8388_v60  ;;  %v9219_v2 = vand.u32 4294901760, %v8606_v58  ;;  %v3350_v55 = vand.u32 4294901760, %v3349_v3 }
 0x373   :  { %9721 = vst [vmem:[#allocation123_spill] sm:$0xff] %v8608_v54  ;;  %9722 = vst [vmem:[#allocation119_spill] sm:$0xff] %v8611_v50  ;;  %v3357_v13 = vand.u32 4294901760, %v3356_v45  ;;  %v3383_v14 = vand.u32 4294901760, %v8453_v47  ;;  %v8620_v36 = vand.u32 4294901760, %v8517_v31  ;;  %v3370_v57 = vsub.f32 %v8234_v17, %v3369_v0 }
 0x374   :  { %v8623_v63 = vpack.c.bf16 %v3369_v0, %v3362_v40  ;;  %v3377_v15 = vsub.f32 %v8388_v60, %v3376_v6  ;;  %v8630_v16 = vpack.c.bf16 %v9219_v2, %v9218_v53  ;;  %v8634_v3 = vmul.f32 %v8514_v1, %v8514_v1  ;;  %v29_v40 = vld [vmem:[%s8929_s3 + $0x10] sm:$0x1]  ;;  %s4693_s3 = smov [#allocation2]  }
 0x375   :  { %v8636_v45 = vpack.c.bf16 %v3357_v13, %v3350_v55  ;;  %v3384_v50 = vsub.f32 %v8453_v47, %v3383_v14  ;;  %v3210_v0 = vand.u32 4294901760, %v8532_v18  ;;  %v3371_v34 = vand.u32 4294901760, %v3370_v57  ;;  %s4030_s12 = sshll.u32 %s4693_s3, 4  ;;  %s4031_s12 = int_to_ptr.vmem [resolvable:$true] %s4030_s12 }
 0x376   :  { %9723 = vst [vmem:[#allocation122_spill] sm:$0xff] %v8623_v63  ;;  %9724 = vst [vmem:[#allocation135_spill] sm:$0xff] %v8630_v16  ;;  %v3364_v63 = vand.u32 4294901760, %v3363_v56  ;;  %v8643_v54 = vpack.c.bf16 %v3383_v14, %v3376_v6  ;;  %4185 = vmatpush1.bf16.msra.mxu1 %v8630_v16  ;;  %4311 = vmatpush1.bf16.msra.mxu0 %v8630_v16  ;;  %v3378_v1 = vand.u32 4294901760, %v3377_v15  ;;  %v8655_v56 = vand.u32 4294901760, %v29_v40  ;;  %s4661_s13 = scalar_lea.vmem %s4031_s12, 64  ;;  %p4666_p1 = scmp.lt.s32.totalorder %s4031_s12, %s4031_s12 }
 0x377   :  { %v3385_v53 = vand.u32 4294901760, %v3384_v50  ;;  %4186 = vmatprep.subr.bf16.mxu1 %v9480_v28  ;;  %4312 = vmatprep.subr.bf16.mxu0 %v9480_v28  ;;  %v8653_v13 = vsub.f32 %v8517_v31, %v8620_v36  ;;  %v9726_v6 = vand.u32 4294901760, %v8461_v43  ;;  %v9727_v14 = vand.u32 4294901760, %v8480_v38  ;;  %p4662_p0 = scmp.ne.s32.totalorder %s4031_s12, %s4661_s13  ;;  %p4667_p2 = scmp.lt.s32.totalorder %s4661_s13, %s4661_s13 }
 0x378   :  { %v8649_v55 = vpack.c.bf16 %v3371_v34, %v3364_v63  ;;  %v9224_v50 = vand.u32 4294901760, %v8509_v30  ;;  %v9223_v15 = vand.u32 4294901760, %v8634_v3  ;;  %v3211_v34 = vsub.f32 %v8532_v18, %v3210_v0 }
 0x379   :  { %9725 = vst [vmem:[#allocation136_spill] sm:$0xff] %v8653_v13  ;;  %v8661_v57 = vpack.c.bf16 %v9727_v14, %v9726_v6  ;;  %v8665_v2 = vpack.c.bf16 %v3385_v53, %v3378_v1  ;;  %v3219_v63 = vand.u32 4294901760, %v8653_v13  ;;  %v8670_v31 = vsub.f32 %v29_v40, %v8655_v56  ;;  %p4668_p3 = por %p4667_p2, %p4666_p1 }
 0x37a   :  { %v8683_v1 = vpack.c.bf16 %v9223_v15, %v9224_v50  ;;  %v3212_v14 = vand.u32 4294901760, %v3211_v34  ;;  %v4253_v15 = vpack.c.bf16 %v7518_v4, %v7485_v48  ;;  %v4256_v53 = vpack.c.bf16 %v7572_v46, %v7552_v42  ;;  %v9756_v48 = vld [vmem:[#allocation89_spill] sm:$0xff]  ;;  %v9757_v4 = vld [vmem:[#allocation55_spill] sm:$0xff]  ;;  %v9758_v42 = vld [vmem:[#allocation52_spill] sm:$0xff] }
 0x37b   :  { %9728 = vst [vmem:[#allocation127_spill] sm:$0xff] %v8661_v57  ;;  %9729 = vst [vmem:[#allocation13_spill] sm:$0xff] %v8670_v31  ;;  %4188 = vmatpush1.bf16.msra.mxu1 %v8661_v57  ;;  %4314 = vmatpush1.bf16.msra.mxu0 %v8661_v57  ;;  %v3225_v6 = vand.u32 4294901760, %v8670_v31  ;;  %v3220_v40 = vsub.f32 %v8653_v13, %v3219_v63  ;;  %v4250_v57 = vpack.c.bf16 %v7719_v35, %v7622_v41  ;;  %vm4017_vm10 = vcmask 1040384   ;;  %p4669_p4 = pnand %p4668_p3, %p4662_p0 }
 0x37c   :  { %4189 = vmatprep.subr.bf16.mxu1 %v9480_v28  ;;  %4315 = vmatprep.subr.bf16.mxu0 %v9480_v28  ;;  %v4259_v16 = vpack.c.bf16 %v9719_v22, %v7952_v37  ;;  %v4265_v34 = vpack.c.bf16 %v8453_v47, %v8388_v60  ;;  %v9761_v60 = vld [vmem:[#allocation73_spill] sm:$0xff]  ;;  %vm4019_vm6 = vcmask 1041408   ;;  %vm4021_vm0 = vcmask 1042432  }
 0x37d   :  { %v3226_v18 = vsub.f32 %v8670_v31, %v3225_v6  ;;  %v3221_v50 = vand.u32 4294901760, %v3220_v40  ;;  %v4262_v31 = vpack.c.bf16 %v8234_v17, %v9720_v29  ;;  %v9759_v41 = vld [vmem:[#allocation135_spill] sm:$0xff] }
 0x37f   :  { %4191 = vmatpush1.bf16.msra.mxu1 %v8683_v1  ;;  %4317 = vmatpush1.bf16.msra.mxu0 %v8683_v1  ;;  %v3227_v13 = vand.u32 4294901760, %v3226_v18  ;;  %v9731_v18 = vand.u32 4294901760, %v8606_v58 }
 0x380   :  { %4192 = vmatprep.subr.bf16.mxu1 %v9480_v28  ;;  %4318 = vmatprep.subr.bf16.mxu0 %v9480_v28  ;;  %v9762_v47 = vld [vmem:[#allocation136_spill] sm:$0xff] }
 0x382   :  { %3213 = vmatmul.mubr.f32.vlgmr.msra.gmra.mrb[0].mxu1 %v3212_v14  ;;  %3690 = vmatmul.mubr.f32.vlgmr.msra.gmra.mrb[0].mxu0 %v3210_v0  ;;  %v9760_v37 = vld [vmem:[#allocation127_spill] sm:$0xff] }
 0x383   :  { %4194 = vmatpush1.bf16.msra.mxu1 %v8538_v9  ;;  %4320 = vmatpush1.bf16.msra.mxu0 %v8520_v20  ;;  %v9730_v20 = vld [vmem:[#allocation64_spill] sm:$0xff]  ;;  %v8744_v9 = vsub.f32 %v8606_v58, %v9731_v18 }
 0x384   :  { %4195 = vmatprep.subr.bf16.mxu1 %v9480_v28  ;;  %4321 = vmatprep.subr.bf16.mxu0 %v9480_v28 }
 0x385   :  { %3222 = vmatprep.mubr.f32.mxu1 %v3221_v50  ;;  %3697 = vmatprep.mubr.f32.mxu0 %v3219_v63  ;;  %v9740_v50 = vld [vmem:[#allocation122_spill] sm:$0xff] }
 0x386   :  { %3228 = vmatmul.mubr.f32.gmra.mrb[2].mxu1 %v3227_v13  ;;  %3701 = vmatmul.mubr.f32.gmra.mrb[2].mxu0 %v3225_v6 }
 0x387   :  { %4197 = vmatpush1.bf16.msra.mxu1 %v8554_v5  ;;  %4323 = vmatpush1.bf16.msra.mxu0 %v8541_v52  ;;  %v9732_v52 = vand.u32 4294901760, %v8536_v59  ;;  %v9733_v5 = vld [vmem:[#allocation123_spill] sm:$0xff] }
 0x388   :  { %4198 = vmatprep.subr.bf16.mxu1 %v9480_v28  ;;  %4324 = vmatprep.subr.bf16.mxu0 %v9480_v28 }
 0x389   :  { %3438 = vmatprep.mubr.f32.mxu1 %v8484_v12  ;;  %3855 = vmatprep.mubr.f32.mxu0 %v8484_v12 }
 0x38b   :  { %4200 = vmatpush1.bf16.msra.mxu1 %v8568_v26  ;;  %4326 = vmatpush1.bf16.msra.mxu0 %v8550_v44  ;;  %v8749_v44 = vsub.f32 %v8536_v59, %v9732_v52  ;;  %v3397_v59 = vand.u32 4294901760, %v8744_v9 }
 0x38c   :  { %4201 = vmatprep.subr.bf16.mxu1 %v9480_v28  ;;  %4327 = vmatprep.subr.bf16.mxu0 %v9480_v28 }
 0x38d   :  { %v4268_v46 = vpack.c.bf16 %v8744_v9, %v8749_v44 }
 0x38f   :  { %4203 = vmatpush1.bf16.msra.mxu1 %v8571_v51  ;;  %4329 = vmatpush1.bf16.msra.mxu0 %v8558_v25  ;;  %v9734_v25 = vld [vmem:[#allocation95_spill] sm:$0xff]  ;;  %v9736_v51 = vand.u32 4294901760, %v8480_v38 }
 0x390   :  { %4204 = vmatprep.subr.bf16.mxu1 %v9480_v28  ;;  %4330 = vmatprep.subr.bf16.mxu0 %v9480_v28 }
 0x393   :  { %4206 = vmatpush1.bf16.msra.mxu1 %v8577_v7  ;;  %4332 = vmatpush1.bf16.msra.mxu0 %v8563_v21  ;;  %v9735_v21 = vand.u32 4294901760, %v8461_v43  ;;  %v9737_v7 = vld [vmem:[#allocation119_spill] sm:$0xff] }
 0x394   :  { %4207 = vmatprep.subr.bf16.mxu1 %v9480_v28  ;;  %4333 = vmatprep.subr.bf16.mxu0 %v9480_v28 }
 0x395   :  { %v8756_v26 = vsub.f32 %v8461_v43, %v9735_v21 }
 0x397   :  { %4209 = vmatpush1.bf16.msra.mxu1 %v8588_v10  ;;  %4335 = vmatpush1.bf16.msra.mxu0 %v8575_v23  ;;  %v8763_v23 = vsub.f32 %v8480_v38, %v9736_v51  ;;  %v3390_v10 = vand.u32 4294901760, %v8749_v44  ;;  %v3404_v43 = vand.u32 4294901760, %v8756_v26  ;;  %v9739_v38 = vand.u32 4294901760, %v8634_v3 }
 0x398   :  { %4210 = vmatprep.subr.bf16.mxu1 %v9480_v28  ;;  %4336 = vmatprep.subr.bf16.mxu0 %v9480_v28 }
 0x399   :  { %v8780_v0 = vsub.f32 %v8634_v3, %v9739_v38  ;;  %v3411_v13 = vand.u32 4294901760, %v8763_v23  ;;  %v3391_v63 = vsub.f32 %v8749_v44, %v3390_v10  ;;  %v9743_v38 = vld [vmem:[#allocation125_spill] sm:$0xff]  ;;  %v4271_v35 = vpack.c.bf16 %v8763_v23, %v8756_v26 }
 0x39b   :  { %4212 = vmatpush1.bf16.msra.mxu1 %v8602_v24  ;;  %4338 = vmatpush1.bf16.msra.mxu0 %v9730_v20  ;;  %v9738_v24 = vand.u32 4294901760, %v8509_v30  ;;  %v3412_v3 = vsub.f32 %v8763_v23, %v3411_v13  ;;  %v3425_v14 = vand.u32 4294901760, %v8780_v0  ;;  %v4352_v20 = vpack.c.bf16 %v3397_v59, %v3390_v10 }
 0x39c   :  { %4213 = vmatprep.subr.bf16.mxu1 %v9480_v28  ;;  %4339 = vmatprep.subr.bf16.mxu0 %v9480_v28 }
 0x39d   :  { %v8775_v58 = vsub.f32 %v8509_v30, %v9738_v24  ;;  %v3405_v30 = vsub.f32 %v8756_v26, %v3404_v43  ;;  %v3426_v21 = vsub.f32 %v8780_v0, %v3425_v14  ;;  %v9741_v24 = vld [vmem:[#allocation72_spill] sm:$0xff] }
 0x39f   :  { %4215 = vmatpush1.bf16.msra.mxu1 %v9733_v5  ;;  %4341 = vmatpush1.bf16.msra.mxu0 %v9734_v25  ;;  %v3418_v40 = vand.u32 4294901760, %v8775_v58  ;;  %v3406_v18 = vand.u32 4294901760, %v3405_v30  ;;  %v3413_v5 = vand.u32 4294901760, %v3412_v3  ;;  %v4274_v17 = vpack.c.bf16 %v8780_v0, %v8775_v58 }
 0x3a0   :  { %4216 = vmatprep.subr.bf16.mxu1 %v9480_v28  ;;  %4342 = vmatprep.subr.bf16.mxu0 %v9480_v28 }
 0x3a1   :  { %v3419_v25 = vsub.f32 %v8775_v58, %v3418_v40  ;;  %v4358_v10 = vpack.c.bf16 %v3425_v14, %v3418_v40 }
 0x3a3   :  { %4218 = vmatpush1.bf16.msra.mxu1 %v8636_v45  ;;  %4344 = vmatpush1.bf16.msra.mxu0 %v9737_v7  ;;  %v3398_v45 = vsub.f32 %v8744_v9, %v3397_v59  ;;  %v3420_v51 = vand.u32 4294901760, %v3419_v25  ;;  %v3427_v7 = vand.u32 4294901760, %v3426_v21 }
 0x3a4   :  { %4219 = vmatprep.subr.bf16.mxu1 %v9480_v28  ;;  %4345 = vmatprep.subr.bf16.mxu0 %v9480_v28 }
 0x3a5   :  { %v3399_v6 = vand.u32 4294901760, %v3398_v45  ;;  %v4232_v59 = vpack.c.bf16 %v3427_v7, %v3420_v51  ;;  %v9744_v45 = vpack.c.bf16 %v9713_v19, %v9712_v62  ;;  %v9749_v62 = vpack.c.bf16 %v7296_v61, %v9716_v33  ;;  %v9750_v19 = vld [vmem:[#allocation33_spill] sm:$0xff] }
 0x3a6   :  { %v9753_v61 = vld [vmem:[#allocation69_spill] sm:$0xff] }
 0x3a7   :  { %4221 = vmatpush1.bf16.msra.mxu1 %v8649_v55  ;;  %4347 = vmatpush1.bf16.msra.mxu0 %v9740_v50  ;;  %v3392_v55 = vand.u32 4294901760, %v3391_v63  ;;  %v9748_v50 = vld [vmem:[#allocation37_spill] sm:$0xff] }
 0x3a8   :  { %4222 = vmatprep.subr.bf16.mxu1 %v9480_v28  ;;  %4348 = vmatprep.subr.bf16.mxu0 %v9480_v28 }
 0x3a9   :  { %v4226_v52 = vpack.c.bf16 %v3399_v6, %v3392_v55 }
 0x3ab   :  { %4224 = vmatpush1.bf16.msra.mxu1 %v8665_v2  ;;  %4350 = vmatpush1.bf16.msra.mxu0 %v8643_v54  ;;  %v4229_v54 = vpack.c.bf16 %v3413_v5, %v3406_v18  ;;  %v4355_v2 = vpack.c.bf16 %v3411_v13, %v3404_v43  ;;  %v9742_v43 = vpack.c.bf16 %v9710_v49, %v9709_v11  ;;  %v9745_v11 = vld [vmem:[#allocation19_spill] sm:$0xff]  ;;  %v9746_v49 = vld [vmem:[#allocation54_spill] sm:$0xff] }
 0x3ac   :  { %4225 = vmatprep.subr.bf16.mxu1 %v9480_v28  ;;  %4351 = vmatprep.subr.bf16.mxu0 %v9480_v28  ;;  %v9747_v13 = vpack.c.bf16 %v7097_v8, %v9715_v27  ;;  %v9751_v8 = vpack.c.bf16 %v7491_v39, %v7419_v32  ;;  %v9754_v32 = vld [vmem:[#allocation87_spill] sm:$0xff]  ;;  %v9763_v27 = vld [vmem:[#allocation13_spill] sm:$0xff] }
 0x3ad   :  { %v9755_v39 = vld [vmem:[#allocation99_spill] sm:$0xff] }
 0x3af   :  { %4227 = vmatpush1.bf16.msra.mxu1 %v4226_v52  ;;  %4353 = vmatpush1.bf16.msra.mxu0 %v4352_v20 }
 0x3b0   :  { %4228 = vmatprep.subr.bf16.mxu1 %v9480_v28  ;;  %4354 = vmatprep.subr.bf16.mxu0 %v9480_v28 }
 0x3b3   :  { %4230 = vmatpush1.bf16.msra.mxu1 %v4229_v54  ;;  %4356 = vmatpush1.bf16.msra.mxu0 %v4355_v2 }
 0x3b4   :  { %4231 = vmatprep.subr.bf16.mxu1 %v9480_v28  ;;  %4357 = vmatprep.subr.bf16.mxu0 %v9480_v28 }
 0x3b7   :  { %4233 = vmatpush1.bf16.msra.mxu1 %v4232_v59  ;;  %4359 = vmatpush1.bf16.msra.mxu0 %v4358_v10 }
 0x3b8   :  { %4234 = vmatprep.subr.bf16.mxu1 %v9480_v28  ;;  %4360 = vmatprep.subr.bf16.mxu0 %v9480_v28 }
 0x3ba   :  { %3440 = vmatmul.mubr.f32.vlgmr.msra.gmra.mrb[0].mxu1 %v9741_v24  ;;  %3857 = vmatmul.mubr.f32.vlgmr.msra.gmra.mrb[0].mxu0 %v9741_v24 }
 0x3bb   :  { %4236 = vmatpush1.bf16.msra.mxu1 %v9742_v43  ;;  %4362 = vmatpush1.bf16.msra.mxu0 %v9743_v38 }
 0x3bc   :  { %4237 = vmatprep.subr.bf16.mxu1 %v9480_v28  ;;  %4363 = vmatprep.subr.bf16.mxu0 %v9480_v28 }
 0x3bd   :  { %3445 = vmatprep.mubr.f32.mxu1 %v8620_v36  ;;  %3862 = vmatprep.mubr.f32.mxu0 %v8620_v36 }
 0x3be   :  { %3447 = vmatmul.mubr.f32.gmra.mrb[2].mxu1 %v8655_v56  ;;  %3864 = vmatmul.mubr.f32.gmra.mrb[2].mxu0 %v8655_v56 }
 0x3bf   :  { %4239 = vmatpush1.bf16.msra.mxu1 %v9744_v45  ;;  %4365 = vmatpush1.bf16.msra.mxu0 %v9745_v11 }
 0x3c0   :  { %4240 = vmatprep.subr.bf16.mxu1 %v9480_v28  ;;  %4366 = vmatprep.subr.bf16.mxu0 %v9480_v28 }
 0x3c1   :  { %3574 = vmatprep.mubr.f32.mxu1 %v9746_v49  ;;  %3962 = vmatprep.mubr.f32.mxu0 %v8484_v12  ;;  %v9752_v12 = vld [vmem:[#allocation79_spill] sm:$0xff] }
 0x3c3   :  { %4242 = vmatpush1.bf16.msra.mxu1 %v9747_v13  ;;  %4368 = vmatpush1.bf16.msra.mxu0 %v9748_v50 }
 0x3c4   :  { %4243 = vmatprep.subr.bf16.mxu1 %v9480_v28  ;;  %4369 = vmatprep.subr.bf16.mxu0 %v9480_v28 }
 0x3c7   :  { %4245 = vmatpush1.bf16.msra.mxu1 %v9749_v62  ;;  %4371 = vmatpush1.bf16.msra.mxu0 %v9750_v19 }
 0x3c8   :  { %4246 = vmatprep.subr.bf16.mxu1 %v9480_v28  ;;  %4372 = vmatprep.subr.bf16.mxu0 %v9480_v28 }
 0x3cb   :  { %4248 = vmatpush1.bf16.msra.mxu1 %v9751_v8  ;;  %4374 = vmatpush1.bf16.msra.mxu0 %v9752_v12 }
 0x3cc   :  { %4249 = vmatprep.subr.bf16.mxu1 %v9480_v28  ;;  %4375 = vmatprep.subr.bf16.mxu0 %v9480_v28 }
 0x3cf   :  { %4251 = vmatpush1.bf16.msra.mxu1 %v4250_v57  ;;  %4377 = vmatpush1.bf16.msra.mxu0 %v9753_v61  ;;  %v9764_v57 = vld [vmem:[#allocation7_spill] sm:$0xff] }
 0x3d0   :  { %4252 = vmatprep.subr.bf16.mxu1 %v9480_v28  ;;  %4378 = vmatprep.subr.bf16.mxu0 %v9480_v28 }
 0x3d3   :  { %4254 = vmatpush1.bf16.msra.mxu1 %v4253_v15  ;;  %4380 = vmatpush1.bf16.msra.mxu0 %v9754_v32  ;;  %v9765_v15 = vld [vmem:[#allocation5_spill] sm:$0xff] }
 0x3d4   :  { %4255 = vmatprep.subr.bf16.mxu1 %v9480_v28  ;;  %4381 = vmatprep.subr.bf16.mxu0 %v9480_v28  ;;  %vm3980_vm15 = vcmp.ge.f32.partialorder %v9765_v15, %v9764_v57 }
 0x3d7   :  { %4257 = vmatpush1.bf16.msra.mxu1 %v4256_v53  ;;  %4383 = vmatpush1.bf16.msra.mxu0 %v9755_v39 }
 0x3d8   :  { %4258 = vmatprep.subr.bf16.mxu1 %v9480_v28  ;;  %4384 = vmatprep.subr.bf16.mxu0 %v9480_v28 }
 0x3db   :  { %4260 = vmatpush1.bf16.msra.mxu1 %v4259_v16  ;;  %4386 = vmatpush1.bf16.msra.mxu0 %v9756_v48 }
 0x3dc   :  { %4261 = vmatprep.subr.bf16.mxu1 %v9480_v28  ;;  %4387 = vmatprep.subr.bf16.mxu0 %v9480_v28 }
 0x3df   :  { %4263 = vmatpush1.bf16.msra.mxu1 %v4262_v31  ;;  %4389 = vmatpush1.bf16.msra.mxu0 %v9757_v4  ;;  %v9766_v31 = vld [vmem:[#allocation6_spill] sm:$0xff] }
 0x3e0   :  { %4264 = vmatprep.subr.bf16.mxu1 %v9480_v28  ;;  %4390 = vmatprep.subr.bf16.mxu0 %v9480_v28  ;;  %vm3981_vm11 = vcmp.ge.f32.partialorder %v9766_v31, %v9764_v57 }
 0x3e3   :  { %4266 = vmatpush1.bf16.msra.mxu1 %v4265_v34  ;;  %4392 = vmatpush1.bf16.msra.mxu0 %v9758_v42 }
 0x3e4   :  { %4267 = vmatprep.subr.bf16.mxu1 %v9480_v28  ;;  %4393 = vmatprep.subr.bf16.mxu0 %v9480_v28 }
 0x3e7   :  { %4269 = vmatpush1.bf16.msra.mxu1 %v4268_v46  ;;  %4395 = vmatpush1.bf16.msra.mxu0 %v9759_v41 }
 0x3e8   :  { %4270 = vmatprep.subr.bf16.mxu1 %v9480_v28  ;;  %4396 = vmatprep.subr.bf16.mxu0 %v9480_v28 }
 0x3eb   :  { %4272 = vmatpush1.bf16.msra.mxu1 %v4271_v35  ;;  %4398 = vmatpush1.bf16.msra.mxu0 %v9760_v37 }
 0x3ec   :  { %4273 = vmatprep.subr.bf16.mxu1 %v9480_v28  ;;  %4399 = vmatprep.subr.bf16.mxu0 %v9480_v28 }
 0x3ef   :  { %4275 = vmatpush1.bf16.msra.mxu1 %v4274_v17  ;;  %4401 = vmatpush1.bf16.msra.mxu0 %v8683_v1 }
 0x3f2   :  { %3577 = vmatmul.mubr.f32.vlgmr.msra.gmra.mrb[0].mxu1 %v9761_v60  ;;  %3964 = vmatmul.mubr.f32.vlgmr.msra.gmra.mrb[0].mxu0 %v9741_v24 }
 0x3f3   :  { %3583 = vmatprep.mubr.f32.mxu1 %v9762_v47  ;;  %3969 = vmatprep.mubr.f32.mxu0 %v8620_v36 }
 0x3f6   :  { %3586 = vmatmul.mubr.f32.gmra.mrb[2].mxu1 %v9763_v27  ;;  %3971 = vmatmul.mubr.f32.gmra.mrb[2].mxu0 %v8655_v56 }
 0x4c5   :  { %v3578_v33 = vpop.f32.mrb[0].mxu1  ;;  %v3965_v28 = vpop.f32.mrb[0].mxu0 }
 0x4c6   :  { %v4402_v22 = vadd.f32 %v3965_v28, %v3578_v33  ;;  %v3580_v29 = vpop.f32.mrb[1].mxu1  ;;  %v3967_v16 = vpop.f32.mrb[1].mxu0 }
 0x4c8   :  { %v3977_v53 = vrot.slane %v4402_v22, 1  ;;  %v3982_v1 = vrot.slane %v4402_v22, 3  ;;  %v3984_v34 = vrot.slane %v4402_v22, 4  ;;  %v3990_v9 = vrot.slane %v4402_v22, 6 }
 0x4c9   :  { %v3587_v36 = vpop.f32.mrb[2].mxu1  ;;  %v3972_v44 = vpop.f32.mrb[2].mxu0  ;;  %v3992_v26 = vrot.slane %v4402_v22, 7  ;;  %v3987_v23 = vrot.slane %v4402_v22, 5 }
 0x4ca   :  { %v4403_v56 = vadd.f32 %v3972_v44, %v3587_v36  ;;  %v3979_v58 = vsub.f32 %v4402_v22, %v3977_v53  ;;  %v3986_v0 = vsel %vm3980_vm15, %v3982_v1, %v3984_v34  ;;  %v3589_v63 = vpop.f32.mrb[3].mxu1  ;;  %v3974_v30 = vpop.f32.mrb[3].mxu0 }
 0x4cb   :  { %v3994_v6 = vsel %vm3981_vm11, %v3990_v9, %v3992_v26  ;;  %v3989_v3 = vsel %vm3980_vm15, %v3987_v23, 0.0 }
 0x4cc   :  { %v3995_v40 = vsel %vm3981_vm11, %v4403_v56, 0.0  ;;  %v3996_v14 = vmul.f32 %v3986_v0, %v3979_v58  ;;  %v4002_v55 = vmul.f32 %v3994_v6, %v3979_v58  ;;  %v3999_v20 = vrot.slane %v3989_v3, 6 }
 0x4cd   :  { %v4005_v18 = vrot.slane %v3995_v40, 6 }
 0x4ce   :  { %v4003_v52 = vadd.f32 %v4002_v55, %v3977_v53  ;;  %v3997_v5 = vadd.f32 %v3996_v14, %v3977_v53  ;;  %v4001_v25 = vmul.f32 %v4402_v22, %v3999_v20 }
 0x4cf   :  { %v4007_v21 = vmul.f32 %v4402_v22, %v4005_v18 }
 0x4d0   :  { %v4009_v54 = vrot.slane %v4001_v25, 1  ;;  %v4012_v2 = vrot.slane %v4003_v52, 6 }
 0x4d1   :  { %v4015_v51 = vrot.slane %v4007_v21, 7 }
 0x4d2   :  { %v4018_v7 = vsel %vm4017_vm10, %v3997_v5, %v4009_v54 }
 0x4d3   :  { %v4020_v59 = vsel %vm4019_vm6, %v4018_v7, %v4012_v2 }
 0x4d4   :  { %v4022_v10 = vsel %vm4021_vm0, %v4020_v59, %v4015_v51 }
 0x4d5   :  { %4023 = vst [vmem:[#allocation2] sm:$0xf] %v4022_v10 }
 0x4d6   :  { %4672 = shalt.err (!%p4669_p4)
}
 0x4d7   :  { %s4673_s16 = scalar_lea.hbm %s8930_s4, 64 }
 0x4d8   :  { %p4674_p5 = scmp.ne.s32.totalorder %s8930_s4, %s4673_s16  ;;  %p4677_p6 = scmp.lt.u32.totalorder %s4673_s16, %s8930_s4 }
 0x4da   :  { %p4679_p7 = pnand %p4677_p6, %p4674_p5 }
 0x4dc   :  { %4682 = shalt.err (!%p4679_p7)
}
 0x4dd   :  { %4033 = dma.vmem_to_hbm [thread:$0]  %s4031_s12, 64, %s8930_s4, [#allocation3]  }
 0x4de   :  { %4683 = dma.done.wait [#allocation3], 64  }
 0x4df   :  { %4684 = vsyncadd [#allocation3], 4294967232 }
 0x4e0   :  { %4037 = vsyncpa [#allocation3], 1 }

</bundles_post_ra>
